<compile_context>
chip_gen: v5e
topology: v5e:2x2
jax: 0.10.0
libtpu: 0.0.40
codegen_flags: <defaults>
</compile_context>

<pallas_src>
import jax
import jax.numpy as jnp
from jax.experimental import pallas as pl
from jax.experimental.pallas import tpu as pltpu

DIM = 32                          # d_model
NUM_LAYERS = 2
D_STATE = 16
D_CONV = 4
EXPAND = 2
D_INNER = EXPAND * DIM            # 64
DT_RANK = max(1, -(-DIM // 16))   # ceil(DIM / 16) = 2
LN_EPS = 1e-5

N_LAYER_WEIGHTS = 10              # prepped weights per layer passed to the kernel


def _softplus(x):
    return jnp.maximum(x, 0.0) + jnp.log1p(jnp.exp(-jnp.abs(x)))


def _silu(x):
    return x * jax.nn.sigmoid(x)


# ----------------------------------------------------------------------------
# In-kernel: one Block (residual add + LayerNorm + Mamba(v1) mixer)
# ----------------------------------------------------------------------------
def _layer_forward(hidden, resid_in, wl, da_s, dbx_s, cmb_s, y_s):
    (nw_ref, nb_ref, w_in_ref, conv_w_ref, conv_b_ref, wx_ref, dt_b_ref,
     neg_a_t_ref, d_par_ref, w_out_ref) = wl
    L = hidden.shape[0]

    # residual = hidden + residual   (first layer: residual is None)
    resid = hidden if resid_in is None else hidden + resid_in

    # LayerNorm (biased variance, eps=1e-5)
    mean = jnp.mean(resid, axis=-1, keepdims=True)
    cen = resid - mean
    var = jnp.mean(cen * cen, axis=-1, keepdims=True)
    ln = cen * jax.lax.rsqrt(var + LN_EPS) * nw_ref[...] + nb_ref[...]

    # fused in_proj: single (D, 2*d_inner) = (32, 128) matmul, split into x / z
    xz = jnp.dot(ln, w_in_ref[...], preferred_element_type=jnp.float32)
    x_in = xz[:, :D_INNER]
    z = xz[:, D_INNER:]

    # causal depthwise conv1d: one zero-pad, 4 static shifted accumulates
    cw = conv_w_ref[...]                                        # (d_conv, d_inner)
    x_pad = jnp.concatenate(
        [jnp.zeros((D_CONV - 1, D_INNER), jnp.float32), x_in], axis=0)
    conv = x_pad[0:L] * cw[0:1]
    for k in range(1, D_CONV):
        conv = conv + x_pad[k:k + L] * cw[k:k + 1]
    x_c = _silu(conv + conv_b_ref[...])                         # (L, d_inner)

    # fused x_proj (dt_proj's linear part folded in):
    # columns = [dt_lin (d_inner) | B (d_state) | C (d_state)]
    xp = jnp.dot(x_c, wx_ref[...], preferred_element_type=jnp.float32)
    dt = _softplus(xp[:, :D_INNER] + dt_b_ref[...])             # (L, d_inner)
    Bm = xp[:, D_INNER:D_INNER + D_STATE]                       # (L, d_state)
    Cm = xp[:, D_INNER + D_STATE:D_INNER + 2 * D_STATE]         # (L, d_state)

    # scan operands in lane-dense layout (d_inner last): (L, d_state, d_inner)
    dA = jnp.exp(dt[:, None, :] * neg_a_t_ref[...])             # (L, ds, di)
    dBx = (dt * x_c)[:, None, :] * Bm[:, :, None]               # (L, ds, di)
    da_s[...] = dA
    dbx_s[...] = dBx
    cmb_s[...] = jnp.broadcast_to(Cm[:, :, None], (L, D_STATE, D_INNER))

    # selective scan: h_t = dA_t * h_{t-1} + dBx_t ; y_t = sum_j h_t[j,:]*C_t[j]
    def scan_body(t, h):
        h = da_s[t] * h + dbx_s[t]                              # (ds, di)
        y_s[t] = jnp.sum(h * cmb_s[t], axis=0)                  # (di,)
        return h

    jax.lax.fori_loop(0, L, scan_body,
                      jnp.zeros((D_STATE, D_INNER), jnp.float32),
                      unroll=True)

    # skip term, gate with SiLU(z), out_proj
    y = (y_s[...] + x_c * d_par_ref[...]) * _silu(z)
    out = jnp.dot(y, w_out_ref[...], preferred_element_type=jnp.float32)
    return out, resid


def _mamba_x2_kernel(x_ref, *refs):
    n_w = NUM_LAYERS * N_LAYER_WEIGHTS
    w_refs = refs[:n_w]
    hid_ref = refs[n_w]
    res_ref = refs[n_w + 1]
    da_s, dbx_s, cmb_s, y_s = refs[n_w + 2:]

    hidden = x_ref[0]                                           # (L, D)
    resid = None
    for layer in range(NUM_LAYERS):
        wl = w_refs[layer * N_LAYER_WEIGHTS:(layer + 1) * N_LAYER_WEIGHTS]
        hidden, resid = _layer_forward(hidden, resid, wl,
                                       da_s, dbx_s, cmb_s, y_s)

    hid_ref[0] = hidden
    res_ref[0] = resid


# ----------------------------------------------------------------------------
# Wrapper: weight prep (fusion / pre-transpose) + one pallas_call for 2 layers
# ----------------------------------------------------------------------------
def _prep_layer(p):
    # fused in_proj weight (D, 2*d_inner) -> 128 output lanes
    w_in = jnp.concatenate([p["w_in_x"], p["w_in_z"]], axis=1)
    # fold dt_proj's linear part into x_proj's dt columns (softplus stays in-kernel)
    w_dt_full = jnp.dot(p["wx_dt"], p["w_dt"])                  # (d_inner, d_inner)
    wx_fused = jnp.concatenate([w_dt_full, p["wx_B"], p["wx_C"]], axis=1)
    # A = -exp(A_log), transposed to (d_state, d_inner) for the d_inner-last layout
    neg_a_t = -jnp.exp(p["A_log"]).T
    return (p["nw"], p["nb"], w_in, p["conv_w"], p["conv_b"],
            wx_fused, p["dt_b"], neg_a_t, p["D"], p["w_out"])


def mamba_x2(x, params):
    B, L, D = x.shape
    weights = []
    for p in params:
        weights.extend(_prep_layer(p))

    seq_spec = pl.BlockSpec((1, L, D), lambda b: (b, 0, 0))

    def w_spec(arr):
        return pl.BlockSpec(arr.shape, lambda b, _n=arr.ndim: (0,) * _n)

    hidden, residual = pl.pallas_call(
        _mamba_x2_kernel,
        out_shape=(jax.ShapeDtypeStruct((B, L, D), jnp.float32),
                   jax.ShapeDtypeStruct((B, L, D), jnp.float32)),
        grid_spec=pltpu.PrefetchScalarGridSpec(
            num_scalar_prefetch=0,
            grid=(B,),
            in_specs=[seq_spec] + [w_spec(w) for w in weights],
            out_specs=[seq_spec, seq_spec],
            scratch_shapes=[
                pltpu.VMEM((L, D_STATE, D_INNER), jnp.float32),  # dA
                pltpu.VMEM((L, D_STATE, D_INNER), jnp.float32),  # dBx
                pltpu.VMEM((L, D_STATE, D_INNER), jnp.float32),  # C broadcast
                pltpu.VMEM((L, D_INNER), jnp.float32),           # per-step y
            ]),
        compiler_params=pltpu.CompilerParams(
            dimension_semantics=("parallel",)),
    )(x, *weights)
    return hidden, residual


# ----------------------------------------------------------------------------
# Deterministic parameter init (shapes from Mamba.__init__ defaults)
# ----------------------------------------------------------------------------
def init_params(key):
    params = []
    for layer in range(NUM_LAYERS):
        key, *ks = jax.random.split(key, 10)

        def rnd(k, shape, scale):
            return (scale * jax.random.normal(k, shape)).astype(jnp.float32)

        p = {
            "nw": jnp.ones((1, DIM), jnp.float32),
            "nb": jnp.zeros((1, DIM), jnp.float32),
            "w_in_x": rnd(ks[0], (DIM, D_INNER), 0.1),
            "w_in_z": rnd(ks[1], (DIM, D_INNER), 0.1),
            "conv_w": rnd(ks[2], (D_CONV, D_INNER), 0.2),
            "conv_b": rnd(ks[3], (1, D_INNER), 0.1),
            "wx_dt": rnd(ks[4], (D_INNER, DT_RANK), 0.1),
            "wx_B": rnd(ks[5], (D_INNER, D_STATE), 0.1),
            "wx_C": rnd(ks[6], (D_INNER, D_STATE), 0.1),
            "w_dt": rnd(ks[7], (DT_RANK, D_INNER), 0.5),
            "dt_b": jnp.full((1, D_INNER), -1.0 + 0.01 * layer, jnp.float32),
            "A_log": jnp.log(jnp.tile(
                jnp.arange(1, D_STATE + 1, dtype=jnp.float32)[None, :],
                (D_INNER, 1))),
            "D": jnp.ones((1, D_INNER), jnp.float32),
            "w_out": rnd(ks[8], (D_INNER, DIM), 0.1),
        }
        params.append(p)
    return params


# ----------------------------------------------------------------------------
# Pure-JAX reference (same math, standard op order) for a numerics sanity check
# ----------------------------------------------------------------------------
def block_ref(x, residual, p):
    L = x.shape[1]
    resid = x + residual
    mean = resid.mean(-1, keepdims=True)
    c = resid - mean
    var = (c * c).mean(-1, keepdims=True)
    ln = c / jnp.sqrt(var + LN_EPS) * p["nw"][0] + p["nb"][0]
    x_in = ln @ p["w_in_x"]
    z = ln @ p["w_in_z"]
    conv = jnp.zeros_like(x_in)
    for k in range(D_CONV):
        shift = D_CONV - 1 - k
        xs = jnp.pad(x_in, ((0, 0), (shift, 0), (0, 0)))[:, :L]
        conv = conv + xs * p["conv_w"][k]
    conv = conv + p["conv_b"][0]
    x_c = _silu(conv)
    dt_low = x_c @ p["wx_dt"]
    Bm = x_c @ p["wx_B"]
    Cm = x_c @ p["wx_C"]
    dt = _softplus(dt_low @ p["w_dt"] + p["dt_b"][0])
    A = -jnp.exp(p["A_log"])
    dA = jnp.exp(dt[..., None] * A)                              # (B,L,di,ds)
    dBx = dt[..., None] * Bm[:, :, None, :] * x_c[..., None]
    h = jnp.zeros((x.shape[0], D_INNER, D_STATE), jnp.float32)
    ys = []
    for t in range(L):
        h = dA[:, t] * h + dBx[:, t]
        ys.append(jnp.sum(h * Cm[:, t, None, :], axis=-1))
    y = jnp.stack(ys, axis=1) + x_c * p["D"][0]
    y = y * _silu(z)
    return y @ p["w_out"], resid


def mamba_x2_ref(x, params):
    hidden = x
    residual = jnp.zeros_like(x)
    for p in params:
        hidden, residual = block_ref(hidden, residual, p)
    return hidden, residual


if __name__ == "__main__":
    key = jax.random.PRNGKey(0)
    key, xk = jax.random.split(key)
    B, L = 2, 8
    x = jax.random.normal(xk, (B, L, DIM), dtype=jnp.float32)
    params = init_params(key)

    hidden, residual = jax.block_until_ready(mamba_x2(x, params))
    hidden_ref, residual_ref = jax.block_until_ready(mamba_x2_ref(x, params))

    assert bool(jnp.all(jnp.isfinite(hidden))) and bool(jnp.all(jnp.isfinite(residual)))
    assert bool(jnp.allclose(hidden, hidden_ref, atol=1e-2, rtol=1e-2))
    assert bool(jnp.allclose(residual, residual_ref, atol=1e-2, rtol=1e-2))
    print("KERNEL_OK")
</pallas_src>

<mosaic_0001>
module attributes {stable_mosaic.version = 11 : i64} {
  func.func @_mamba_x2_kernel(%arg0: i32, %arg1: memref<1x8x32xf32, #tpu.memory_space<vmem>>, %arg2: memref<1x32xf32, #tpu.memory_space<vmem>>, %arg3: memref<1x32xf32, #tpu.memory_space<vmem>>, %arg4: memref<32x128xf32, #tpu.memory_space<vmem>>, %arg5: memref<4x64xf32, #tpu.memory_space<vmem>>, %arg6: memref<1x64xf32, #tpu.memory_space<vmem>>, %arg7: memref<64x96xf32, #tpu.memory_space<vmem>>, %arg8: memref<1x64xf32, #tpu.memory_space<vmem>>, %arg9: memref<16x64xf32, #tpu.memory_space<vmem>>, %arg10: memref<1x64xf32, #tpu.memory_space<vmem>>, %arg11: memref<64x32xf32, #tpu.memory_space<vmem>>, %arg12: memref<1x32xf32, #tpu.memory_space<vmem>>, %arg13: memref<1x32xf32, #tpu.memory_space<vmem>>, %arg14: memref<32x128xf32, #tpu.memory_space<vmem>>, %arg15: memref<4x64xf32, #tpu.memory_space<vmem>>, %arg16: memref<1x64xf32, #tpu.memory_space<vmem>>, %arg17: memref<64x96xf32, #tpu.memory_space<vmem>>, %arg18: memref<1x64xf32, #tpu.memory_space<vmem>>, %arg19: memref<16x64xf32, #tpu.memory_space<vmem>>, %arg20: memref<1x64xf32, #tpu.memory_space<vmem>>, %arg21: memref<64x32xf32, #tpu.memory_space<vmem>>, %arg22: memref<1x8x32xf32, #tpu.memory_space<vmem>>, %arg23: memref<1x8x32xf32, #tpu.memory_space<vmem>>, %arg24: memref<8x16x64xf32, #tpu.memory_space<vmem>>, %arg25: memref<8x16x64xf32, #tpu.memory_space<vmem>>, %arg26: memref<8x16x64xf32, #tpu.memory_space<vmem>>, %arg27: memref<8x64xf32, #tpu.memory_space<vmem>>) attributes {dimension_semantics = [#tpu.dimension_semantics<parallel>], iteration_bounds = array<i64: 2>, scalar_prefetch = 0 : i64, scratch_operands = 4 : i64, tpu.core_type = #tpu.core_type<tc>, window_params = [{transform_indices = @transform_0, window_bounds = array<i64: 1, 8, 32>}, {pipeline_mode = #tpu.pipeline_mode<synchronous>, transform_indices = @transform_1, window_bounds = array<i64: 1, 32>}, {pipeline_mode = #tpu.pipeline_mode<synchronous>, transform_indices = @transform_2, window_bounds = array<i64: 1, 32>}, {pipeline_mode = #tpu.pipeline_mode<synchronous>, transform_indices = @transform_3, window_bounds = array<i64: 32, 128>}, {pipeline_mode = #tpu.pipeline_mode<synchronous>, transform_indices = @transform_4, window_bounds = array<i64: 4, 64>}, {pipeline_mode = #tpu.pipeline_mode<synchronous>, transform_indices = @transform_5, window_bounds = array<i64: 1, 64>}, {pipeline_mode = #tpu.pipeline_mode<synchronous>, transform_indices = @transform_6, window_bounds = array<i64: 64, 96>}, {pipeline_mode = #tpu.pipeline_mode<synchronous>, transform_indices = @transform_7, window_bounds = array<i64: 1, 64>}, {pipeline_mode = #tpu.pipeline_mode<synchronous>, transform_indices = @transform_8, window_bounds = array<i64: 16, 64>}, {pipeline_mode = #tpu.pipeline_mode<synchronous>, transform_indices = @transform_9, window_bounds = array<i64: 1, 64>}, {pipeline_mode = #tpu.pipeline_mode<synchronous>, transform_indices = @transform_10, window_bounds = array<i64: 64, 32>}, {pipeline_mode = #tpu.pipeline_mode<synchronous>, transform_indices = @transform_11, window_bounds = array<i64: 1, 32>}, {pipeline_mode = #tpu.pipeline_mode<synchronous>, transform_indices = @transform_12, window_bounds = array<i64: 1, 32>}, {pipeline_mode = #tpu.pipeline_mode<synchronous>, transform_indices = @transform_13, window_bounds = array<i64: 32, 128>}, {pipeline_mode = #tpu.pipeline_mode<synchronous>, transform_indices = @transform_14, window_bounds = array<i64: 4, 64>}, {pipeline_mode = #tpu.pipeline_mode<synchronous>, transform_indices = @transform_15, window_bounds = array<i64: 1, 64>}, {pipeline_mode = #tpu.pipeline_mode<synchronous>, transform_indices = @transform_16, window_bounds = array<i64: 64, 96>}, {pipeline_mode = #tpu.pipeline_mode<synchronous>, transform_indices = @transform_17, window_bounds = array<i64: 1, 64>}, {pipeline_mode = #tpu.pipeline_mode<synchronous>, transform_indices = @transform_18, window_bounds = array<i64: 16, 64>}, {pipeline_mode = #tpu.pipeline_mode<synchronous>, transform_indices = @transform_19, window_bounds = array<i64: 1, 64>}, {pipeline_mode = #tpu.pipeline_mode<synchronous>, transform_indices = @transform_20, window_bounds = array<i64: 64, 32>}, {transform_indices = @transform_21, window_bounds = array<i64: 1, 8, 32>}, {transform_indices = @transform_22, window_bounds = array<i64: 1, 8, 32>}]} {
    %c0 = arith.constant 0 : index
    %c0_0 = arith.constant 0 : index
    %c0_1 = arith.constant 0 : index
    %0 = vector.load %arg1[%c0, %c0_0, %c0_1] : memref<1x8x32xf32, #tpu.memory_space<vmem>>, vector<1x8x32xf32>
    %1 = vector.shape_cast %0 : vector<1x8x32xf32> to vector<8x32xf32>
    %cst = arith.constant dense<0.000000e+00> : vector<8xf32>
    %2 = vector.multi_reduction <add>, %1, %cst [1] : vector<8x32xf32> to vector<8xf32>
    %3 = vector.shape_cast %2 : vector<8xf32> to vector<8x1xf32>
    %cst_2 = arith.constant 3.200000e+01 : f32
    %4 = vector.broadcast %cst_2 : f32 to vector<8x1xf32>
    %5 = arith.divf %3, %4 : vector<8x1xf32>
    %6 = vector.broadcast %5 : vector<8x1xf32> to vector<8x32xf32>
    %7 = arith.subf %1, %6 : vector<8x32xf32>
    %8 = arith.mulf %7, %7 : vector<8x32xf32>
    %cst_3 = arith.constant dense<0.000000e+00> : vector<8xf32>
    %9 = vector.multi_reduction <add>, %8, %cst_3 [1] : vector<8x32xf32> to vector<8xf32>
    %10 = vector.shape_cast %9 : vector<8xf32> to vector<8x1xf32>
    %cst_4 = arith.constant 3.200000e+01 : f32
    %11 = vector.broadcast %cst_4 : f32 to vector<8x1xf32>
    %12 = arith.divf %10, %11 : vector<8x1xf32>
    %cst_5 = arith.constant 9.99999974E-6 : f32
    %13 = vector.broadcast %cst_5 : f32 to vector<8x1xf32>
    %14 = arith.addf %12, %13 : vector<8x1xf32>
    %15 = math.rsqrt %14 : vector<8x1xf32>
    %16 = vector.broadcast %15 : vector<8x1xf32> to vector<8x32xf32>
    %17 = arith.mulf %7, %16 : vector<8x32xf32>
    %c0_6 = arith.constant 0 : index
    %c0_7 = arith.constant 0 : index
    %18 = vector.load %arg2[%c0_6, %c0_7] : memref<1x32xf32, #tpu.memory_space<vmem>>, vector<1x32xf32>
    %19 = vector.broadcast %18 : vector<1x32xf32> to vector<8x32xf32>
    %20 = arith.mulf %17, %19 : vector<8x32xf32>
    %c0_8 = arith.constant 0 : index
    %c0_9 = arith.constant 0 : index
    %21 = vector.load %arg3[%c0_8, %c0_9] : memref<1x32xf32, #tpu.memory_space<vmem>>, vector<1x32xf32>
    %22 = vector.broadcast %21 : vector<1x32xf32> to vector<8x32xf32>
    %23 = arith.addf %20, %22 : vector<8x32xf32>
    %c0_10 = arith.constant 0 : index
    %c0_11 = arith.constant 0 : index
    %24 = vector.load %arg4[%c0_10, %c0_11] : memref<32x128xf32, #tpu.memory_space<vmem>>, vector<32x128xf32>
    %cst_12 = arith.constant dense<0.000000e+00> : vector<8x128xf32>
    %25 = tpu.matmul %23, %24, %cst_12 {dimension_numbers = #tpu.dot_dimension_numbers<[1], [0], [0], [1], [0, 0, 1, 1], [], []>} : vector<8x32xf32>, vector<32x128xf32>, vector<8x128xf32> -> vector<8x128xf32>
    %26 = vector.extract_strided_slice %25 {offsets = [0, 0], sizes = [8, 64], strides = [1, 1]} : vector<8x128xf32> to vector<8x64xf32>
    %27 = vector.extract_strided_slice %25 {offsets = [0, 64], sizes = [8, 64], strides = [1, 1]} : vector<8x128xf32> to vector<8x64xf32>
    %c0_13 = arith.constant 0 : index
    %c0_14 = arith.constant 0 : index
    %28 = vector.load %arg5[%c0_13, %c0_14] : memref<4x64xf32, #tpu.memory_space<vmem>>, vector<4x64xf32>
    %cst_15 = arith.constant 0.000000e+00 : f32
    %29 = vector.broadcast %cst_15 : f32 to vector<3x64xf32>
    %30 = tpu.concatenate %29, %26 in 0 : vector<3x64xf32>, vector<8x64xf32> -> vector<11x64xf32>
    %31 = vector.extract_strided_slice %30 {offsets = [0, 0], sizes = [8, 64], strides = [1, 1]} : vector<11x64xf32> to vector<8x64xf32>
    %32 = vector.extract_strided_slice %28 {offsets = [0, 0], sizes = [1, 64], strides = [1, 1]} : vector<4x64xf32> to vector<1x64xf32>
    %33 = vector.broadcast %32 : vector<1x64xf32> to vector<8x64xf32>
    %34 = arith.mulf %31, %33 : vector<8x64xf32>
    %35 = vector.extract_strided_slice %30 {offsets = [1, 0], sizes = [8, 64], strides = [1, 1]} : vector<11x64xf32> to vector<8x64xf32>
    %36 = vector.extract_strided_slice %28 {offsets = [1, 0], sizes = [1, 64], strides = [1, 1]} : vector<4x64xf32> to vector<1x64xf32>
    %37 = vector.broadcast %36 : vector<1x64xf32> to vector<8x64xf32>
    %38 = arith.mulf %35, %37 : vector<8x64xf32>
    %39 = arith.addf %34, %38 : vector<8x64xf32>
    %40 = vector.extract_strided_slice %30 {offsets = [2, 0], sizes = [8, 64], strides = [1, 1]} : vector<11x64xf32> to vector<8x64xf32>
    %41 = vector.extract_strided_slice %28 {offsets = [2, 0], sizes = [1, 64], strides = [1, 1]} : vector<4x64xf32> to vector<1x64xf32>
    %42 = vector.broadcast %41 : vector<1x64xf32> to vector<8x64xf32>
    %43 = arith.mulf %40, %42 : vector<8x64xf32>
    %44 = arith.addf %39, %43 : vector<8x64xf32>
    %45 = vector.extract_strided_slice %30 {offsets = [3, 0], sizes = [8, 64], strides = [1, 1]} : vector<11x64xf32> to vector<8x64xf32>
    %46 = vector.extract_strided_slice %28 {offsets = [3, 0], sizes = [1, 64], strides = [1, 1]} : vector<4x64xf32> to vector<1x64xf32>
    %47 = vector.broadcast %46 : vector<1x64xf32> to vector<8x64xf32>
    %48 = arith.mulf %45, %47 : vector<8x64xf32>
    %49 = arith.addf %44, %48 : vector<8x64xf32>
    %c0_16 = arith.constant 0 : index
    %c0_17 = arith.constant 0 : index
    %50 = vector.load %arg6[%c0_16, %c0_17] : memref<1x64xf32, #tpu.memory_space<vmem>>, vector<1x64xf32>
    %51 = vector.broadcast %50 : vector<1x64xf32> to vector<8x64xf32>
    %52 = arith.addf %49, %51 : vector<8x64xf32>
    %53 = arith.negf %52 : vector<8x64xf32>
    %54 = math.exp %53 : vector<8x64xf32>
    %cst_18 = arith.constant 1.000000e+00 : f32
    %55 = vector.broadcast %cst_18 : f32 to vector<8x64xf32>
    %56 = arith.addf %55, %54 : vector<8x64xf32>
    %57 = arith.divf %55, %56 : vector<8x64xf32>
    %58 = arith.mulf %52, %57 : vector<8x64xf32>
    %c0_19 = arith.constant 0 : index
    %c0_20 = arith.constant 0 : index
    %59 = vector.load %arg7[%c0_19, %c0_20] : memref<64x96xf32, #tpu.memory_space<vmem>>, vector<64x96xf32>
    %cst_21 = arith.constant dense<0.000000e+00> : vector<8x96xf32>
    %60 = tpu.matmul %58, %59, %cst_21 {dimension_numbers = #tpu.dot_dimension_numbers<[1], [0], [0], [1], [0, 0, 1, 1], [], []>} : vector<8x64xf32>, vector<64x96xf32>, vector<8x96xf32> -> vector<8x96xf32>
    %61 = vector.extract_strided_slice %60 {offsets = [0, 0], sizes = [8, 64], strides = [1, 1]} : vector<8x96xf32> to vector<8x64xf32>
    %c0_22 = arith.constant 0 : index
    %c0_23 = arith.constant 0 : index
    %62 = vector.load %arg8[%c0_22, %c0_23] : memref<1x64xf32, #tpu.memory_space<vmem>>, vector<1x64xf32>
    %63 = vector.broadcast %62 : vector<1x64xf32> to vector<8x64xf32>
    %64 = arith.addf %61, %63 : vector<8x64xf32>
    %cst_24 = arith.constant 0.000000e+00 : f32
    %65 = vector.broadcast %cst_24 : f32 to vector<8x64xf32>
    %66 = arith.maximumf %64, %65 : vector<8x64xf32>
    %67 = math.absf %64 : vector<8x64xf32>
    %cst_25 = arith.constant 0.000000e+00 : f32
    %68 = vector.broadcast %cst_25 : f32 to vector<8x64xf32>
    %69 = arith.subf %68, %67 : vector<8x64xf32>
    %70 = math.exp %69 : vector<8x64xf32>
    %71 = math.log1p %70 : vector<8x64xf32>
    %72 = arith.addf %66, %71 : vector<8x64xf32>
    %73 = vector.extract_strided_slice %60 {offsets = [0, 64], sizes = [8, 16], strides = [1, 1]} : vector<8x96xf32> to vector<8x16xf32>
    %74 = vector.extract_strided_slice %60 {offsets = [0, 80], sizes = [8, 16], strides = [1, 1]} : vector<8x96xf32> to vector<8x16xf32>
    %75 = vector.shape_cast %72 : vector<8x64xf32> to vector<8x1x64xf32>
    %c0_26 = arith.constant 0 : index
    %c0_27 = arith.constant 0 : index
    %76 = vector.load %arg9[%c0_26, %c0_27] : memref<16x64xf32, #tpu.memory_space<vmem>>, vector<16x64xf32>
    %77 = vector.shape_cast %76 : vector<16x64xf32> to vector<1x16x64xf32>
    %78 = vector.broadcast %75 : vector<8x1x64xf32> to vector<8x16x64xf32>
    %79 = vector.broadcast %77 : vector<1x16x64xf32> to vector<8x16x64xf32>
    %80 = arith.mulf %78, %79 : vector<8x16x64xf32>
    %81 = math.exp %80 : vector<8x16x64xf32>
    %82 = arith.mulf %72, %58 : vector<8x64xf32>
    %83 = vector.shape_cast %82 : vector<8x64xf32> to vector<8x1x64xf32>
    %84 = vector.shape_cast %73 : vector<8x16xf32> to vector<8x16x1xf32>
    %85 = vector.broadcast %83 : vector<8x1x64xf32> to vector<8x16x64xf32>
    %86 = vector.broadcast %84 : vector<8x16x1xf32> to vector<8x16x64xf32>
    %87 = arith.mulf %85, %86 : vector<8x16x64xf32>
    %c0_28 = arith.constant 0 : index
    %c0_29 = arith.constant 0 : index
    %c0_30 = arith.constant 0 : index
    %88 = vector.load %arg24[%c0_28, %c0_29, %c0_30] : memref<8x16x64xf32, #tpu.memory_space<vmem>>, vector<8x16x64xf32>
    tpu.vector_store %arg24[%c0_28, %c0_29, %c0_30], %81 {strides = array<i32>} : memref<8x16x64xf32, #tpu.memory_space<vmem>>, vector<8x16x64xf32>,
    %c0_31 = arith.constant 0 : index
    %c0_32 = arith.constant 0 : index
    %c0_33 = arith.constant 0 : index
    %89 = vector.load %arg25[%c0_31, %c0_32, %c0_33] : memref<8x16x64xf32, #tpu.memory_space<vmem>>, vector<8x16x64xf32>
    tpu.vector_store %arg25[%c0_31, %c0_32, %c0_33], %87 {strides = array<i32>} : memref<8x16x64xf32, #tpu.memory_space<vmem>>, vector<8x16x64xf32>,
    %90 = vector.shape_cast %74 : vector<8x16xf32> to vector<8x16x1xf32>
    %91 = vector.shape_cast %90 : vector<8x16x1xf32> to vector<8x16x1xf32>
    %92 = vector.broadcast %91 : vector<8x16x1xf32> to vector<8x16x64xf32>
    %c0_34 = arith.constant 0 : index
    %c0_35 = arith.constant 0 : index
    %c0_36 = arith.constant 0 : index
    %93 = vector.load %arg26[%c0_34, %c0_35, %c0_36] : memref<8x16x64xf32, #tpu.memory_space<vmem>>, vector<8x16x64xf32>
    tpu.vector_store %arg26[%c0_34, %c0_35, %c0_36], %92 {strides = array<i32>} : memref<8x16x64xf32, #tpu.memory_space<vmem>>, vector<8x16x64xf32>,
    %cst_37 = arith.constant 0.000000e+00 : f32
    %94 = vector.broadcast %cst_37 : f32 to vector<16x64xf32>
    %c0_i32 = arith.constant 0 : i32
    %95 = arith.index_cast %c0_i32 : i32 to index
    %c0_38 = arith.constant 0 : index
    %c0_39 = arith.constant 0 : index
    %96 = vector.load %arg24[%95, %c0_38, %c0_39] : memref<8x16x64xf32, #tpu.memory_space<vmem>>, vector<1x16x64xf32>
    %97 = vector.shape_cast %96 : vector<1x16x64xf32> to vector<16x64xf32>
    %98 = arith.mulf %97, %94 : vector<16x64xf32>
    %99 = arith.index_cast %c0_i32 : i32 to index
    %c0_40 = arith.constant 0 : index
    %c0_41 = arith.constant 0 : index
    %100 = vector.load %arg25[%99, %c0_40, %c0_41] : memref<8x16x64xf32, #tpu.memory_space<vmem>>, vector<1x16x64xf32>
    %101 = vector.shape_cast %100 : vector<1x16x64xf32> to vector<16x64xf32>
    %102 = arith.addf %98, %101 : vector<16x64xf32>
    %103 = arith.index_cast %c0_i32 : i32 to index
    %c0_42 = arith.constant 0 : index
    %c0_43 = arith.constant 0 : index
    %104 = vector.load %arg26[%103, %c0_42, %c0_43] : memref<8x16x64xf32, #tpu.memory_space<vmem>>, vector<1x16x64xf32>
    %105 = vector.shape_cast %104 : vector<1x16x64xf32> to vector<16x64xf32>
    %106 = arith.mulf %102, %105 : vector<16x64xf32>
    %cst_44 = arith.constant dense<0.000000e+00> : vector<64xf32>
    %107 = vector.multi_reduction <add>, %106, %cst_44 [0] : vector<16x64xf32> to vector<64xf32>
    %108 = arith.index_cast %c0_i32 : i32 to index
    %c0_45 = arith.constant 0 : index
    %109 = vector.load %arg27[%108, %c0_45] : memref<8x64xf32, #tpu.memory_space<vmem>>, vector<1x64xf32>
    %110 = vector.shape_cast %109 : vector<1x64xf32> to vector<64xf32>
    %111 = vector.shape_cast %107 : vector<64xf32> to vector<1x64xf32>
    tpu.vector_store %arg27[%108, %c0_45], %111 {strides = array<i32>} : memref<8x64xf32, #tpu.memory_space<vmem>>, vector<1x64xf32>,
    %c1_i32 = arith.constant 1 : i32
    %112 = arith.index_cast %c1_i32 : i32 to index
    %c0_46 = arith.constant 0 : index
    %c0_47 = arith.constant 0 : index
    %113 = vector.load %arg24[%112, %c0_46, %c0_47] : memref<8x16x64xf32, #tpu.memory_space<vmem>>, vector<1x16x64xf32>
    %114 = vector.shape_cast %113 : vector<1x16x64xf32> to vector<16x64xf32>
    %115 = arith.mulf %114, %102 : vector<16x64xf32>
    %116 = arith.index_cast %c1_i32 : i32 to index
    %c0_48 = arith.constant 0 : index
    %c0_49 = arith.constant 0 : index
    %117 = vector.load %arg25[%116, %c0_48, %c0_49] : memref<8x16x64xf32, #tpu.memory_space<vmem>>, vector<1x16x64xf32>
    %118 = vector.shape_cast %117 : vector<1x16x64xf32> to vector<16x64xf32>
    %119 = arith.addf %115, %118 : vector<16x64xf32>
    %120 = arith.index_cast %c1_i32 : i32 to index
    %c0_50 = arith.constant 0 : index
    %c0_51 = arith.constant 0 : index
    %121 = vector.load %arg26[%120, %c0_50, %c0_51] : memref<8x16x64xf32, #tpu.memory_space<vmem>>, vector<1x16x64xf32>
    %122 = vector.shape_cast %121 : vector<1x16x64xf32> to vector<16x64xf32>
    %123 = arith.mulf %119, %122 : vector<16x64xf32>
    %cst_52 = arith.constant dense<0.000000e+00> : vector<64xf32>
    %124 = vector.multi_reduction <add>, %123, %cst_52 [0] : vector<16x64xf32> to vector<64xf32>
    %125 = arith.index_cast %c1_i32 : i32 to index
    %c0_53 = arith.constant 0 : index
    %126 = vector.load %arg27[%125, %c0_53] : memref<8x64xf32, #tpu.memory_space<vmem>>, vector<1x64xf32>
    %127 = vector.shape_cast %126 : vector<1x64xf32> to vector<64xf32>
    %128 = vector.shape_cast %124 : vector<64xf32> to vector<1x64xf32>
    tpu.vector_store %arg27[%125, %c0_53], %128 {strides = array<i32>} : memref<8x64xf32, #tpu.memory_space<vmem>>, vector<1x64xf32>,
    %c2_i32 = arith.constant 2 : i32
    %129 = arith.index_cast %c2_i32 : i32 to index
    %c0_54 = arith.constant 0 : index
    %c0_55 = arith.constant 0 : index
    %130 = vector.load %arg24[%129, %c0_54, %c0_55] : memref<8x16x64xf32, #tpu.memory_space<vmem>>, vector<1x16x64xf32>
    %131 = vector.shape_cast %130 : vector<1x16x64xf32> to vector<16x64xf32>
    %132 = arith.mulf %131, %119 : vector<16x64xf32>
    %133 = arith.index_cast %c2_i32 : i32 to index
    %c0_56 = arith.constant 0 : index
    %c0_57 = arith.constant 0 : index
    %134 = vector.load %arg25[%133, %c0_56, %c0_57] : memref<8x16x64xf32, #tpu.memory_space<vmem>>, vector<1x16x64xf32>
    %135 = vector.shape_cast %134 : vector<1x16x64xf32> to vector<16x64xf32>
    %136 = arith.addf %132, %135 : vector<16x64xf32>
    %137 = arith.index_cast %c2_i32 : i32 to index
    %c0_58 = arith.constant 0 : index
    %c0_59 = arith.constant 0 : index
    %138 = vector.load %arg26[%137, %c0_58, %c0_59] : memref<8x16x64xf32, #tpu.memory_space<vmem>>, vector<1x16x64xf32>
    %139 = vector.shape_cast %138 : vector<1x16x64xf32> to vector<16x64xf32>
    %140 = arith.mulf %136, %139 : vector<16x64xf32>
    %cst_60 = arith.constant dense<0.000000e+00> : vector<64xf32>
    %141 = vector.multi_reduction <add>, %140, %cst_60 [0] : vector<16x64xf32> to vector<64xf32>
    %142 = arith.index_cast %c2_i32 : i32 to index
    %c0_61 = arith.constant 0 : index
    %143 = vector.load %arg27[%142, %c0_61] : memref<8x64xf32, #tpu.memory_space<vmem>>, vector<1x64xf32>
    %144 = vector.shape_cast %143 : vector<1x64xf32> to vector<64xf32>
    %145 = vector.shape_cast %141 : vector<64xf32> to vector<1x64xf32>
    tpu.vector_store %arg27[%142, %c0_61], %145 {strides = array<i32>} : memref<8x64xf32, #tpu.memory_space<vmem>>, vector<1x64xf32>,
    %c3_i32 = arith.constant 3 : i32
    %146 = arith.index_cast %c3_i32 : i32 to index
    %c0_62 = arith.constant 0 : index
    %c0_63 = arith.constant 0 : index
    %147 = vector.load %arg24[%146, %c0_62, %c0_63] : memref<8x16x64xf32, #tpu.memory_space<vmem>>, vector<1x16x64xf32>
    %148 = vector.shape_cast %147 : vector<1x16x64xf32> to vector<16x64xf32>
    %149 = arith.mulf %148, %136 : vector<16x64xf32>
    %150 = arith.index_cast %c3_i32 : i32 to index
    %c0_64 = arith.constant 0 : index
    %c0_65 = arith.constant 0 : index
    %151 = vector.load %arg25[%150, %c0_64, %c0_65] : memref<8x16x64xf32, #tpu.memory_space<vmem>>, vector<1x16x64xf32>
    %152 = vector.shape_cast %151 : vector<1x16x64xf32> to vector<16x64xf32>
    %153 = arith.addf %149, %152 : vector<16x64xf32>
    %154 = arith.index_cast %c3_i32 : i32 to index
    %c0_66 = arith.constant 0 : index
    %c0_67 = arith.constant 0 : index
    %155 = vector.load %arg26[%154, %c0_66, %c0_67] : memref<8x16x64xf32, #tpu.memory_space<vmem>>, vector<1x16x64xf32>
    %156 = vector.shape_cast %155 : vector<1x16x64xf32> to vector<16x64xf32>
    %157 = arith.mulf %153, %156 : vector<16x64xf32>
    %cst_68 = arith.constant dense<0.000000e+00> : vector<64xf32>
    %158 = vector.multi_reduction <add>, %157, %cst_68 [0] : vector<16x64xf32> to vector<64xf32>
    %159 = arith.index_cast %c3_i32 : i32 to index
    %c0_69 = arith.constant 0 : index
    %160 = vector.load %arg27[%159, %c0_69] : memref<8x64xf32, #tpu.memory_space<vmem>>, vector<1x64xf32>
    %161 = vector.shape_cast %160 : vector<1x64xf32> to vector<64xf32>
    %162 = vector.shape_cast %158 : vector<64xf32> to vector<1x64xf32>
    tpu.vector_store %arg27[%159, %c0_69], %162 {strides = array<i32>} : memref<8x64xf32, #tpu.memory_space<vmem>>, vector<1x64xf32>,
    %c4_i32 = arith.constant 4 : i32
    %163 = arith.index_cast %c4_i32 : i32 to index
    %c0_70 = arith.constant 0 : index
    %c0_71 = arith.constant 0 : index
    %164 = vector.load %arg24[%163, %c0_70, %c0_71] : memref<8x16x64xf32, #tpu.memory_space<vmem>>, vector<1x16x64xf32>
    %165 = vector.shape_cast %164 : vector<1x16x64xf32> to vector<16x64xf32>
    %166 = arith.mulf %165, %153 : vector<16x64xf32>
    %167 = arith.index_cast %c4_i32 : i32 to index
    %c0_72 = arith.constant 0 : index
    %c0_73 = arith.constant 0 : index
    %168 = vector.load %arg25[%167, %c0_72, %c0_73] : memref<8x16x64xf32, #tpu.memory_space<vmem>>, vector<1x16x64xf32>
    %169 = vector.shape_cast %168 : vector<1x16x64xf32> to vector<16x64xf32>
    %170 = arith.addf %166, %169 : vector<16x64xf32>
    %171 = arith.index_cast %c4_i32 : i32 to index
    %c0_74 = arith.constant 0 : index
    %c0_75 = arith.constant 0 : index
    %172 = vector.load %arg26[%171, %c0_74, %c0_75] : memref<8x16x64xf32, #tpu.memory_space<vmem>>, vector<1x16x64xf32>
    %173 = vector.shape_cast %172 : vector<1x16x64xf32> to vector<16x64xf32>
    %174 = arith.mulf %170, %173 : vector<16x64xf32>
    %cst_76 = arith.constant dense<0.000000e+00> : vector<64xf32>
    %175 = vector.multi_reduction <add>, %174, %cst_76 [0] : vector<16x64xf32> to vector<64xf32>
    %176 = arith.index_cast %c4_i32 : i32 to index
    %c0_77 = arith.constant 0 : index
    %177 = vector.load %arg27[%176, %c0_77] : memref<8x64xf32, #tpu.memory_space<vmem>>, vector<1x64xf32>
    %178 = vector.shape_cast %177 : vector<1x64xf32> to vector<64xf32>
    %179 = vector.shape_cast %175 : vector<64xf32> to vector<1x64xf32>
    tpu.vector_store %arg27[%176, %c0_77], %179 {strides = array<i32>} : memref<8x64xf32, #tpu.memory_space<vmem>>, vector<1x64xf32>,
    %c5_i32 = arith.constant 5 : i32
    %180 = arith.index_cast %c5_i32 : i32 to index
    %c0_78 = arith.constant 0 : index
    %c0_79 = arith.constant 0 : index
    %181 = vector.load %arg24[%180, %c0_78, %c0_79] : memref<8x16x64xf32, #tpu.memory_space<vmem>>, vector<1x16x64xf32>
    %182 = vector.shape_cast %181 : vector<1x16x64xf32> to vector<16x64xf32>
    %183 = arith.mulf %182, %170 : vector<16x64xf32>
    %184 = arith.index_cast %c5_i32 : i32 to index
    %c0_80 = arith.constant 0 : index
    %c0_81 = arith.constant 0 : index
    %185 = vector.load %arg25[%184, %c0_80, %c0_81] : memref<8x16x64xf32, #tpu.memory_space<vmem>>, vector<1x16x64xf32>
    %186 = vector.shape_cast %185 : vector<1x16x64xf32> to vector<16x64xf32>
    %187 = arith.addf %183, %186 : vector<16x64xf32>
    %188 = arith.index_cast %c5_i32 : i32 to index
    %c0_82 = arith.constant 0 : index
    %c0_83 = arith.constant 0 : index
    %189 = vector.load %arg26[%188, %c0_82, %c0_83] : memref<8x16x64xf32, #tpu.memory_space<vmem>>, vector<1x16x64xf32>
    %190 = vector.shape_cast %189 : vector<1x16x64xf32> to vector<16x64xf32>
    %191 = arith.mulf %187, %190 : vector<16x64xf32>
    %cst_84 = arith.constant dense<0.000000e+00> : vector<64xf32>
    %192 = vector.multi_reduction <add>, %191, %cst_84 [0] : vector<16x64xf32> to vector<64xf32>
    %193 = arith.index_cast %c5_i32 : i32 to index
    %c0_85 = arith.constant 0 : index
    %194 = vector.load %arg27[%193, %c0_85] : memref<8x64xf32, #tpu.memory_space<vmem>>, vector<1x64xf32>
    %195 = vector.shape_cast %194 : vector<1x64xf32> to vector<64xf32>
    %196 = vector.shape_cast %192 : vector<64xf32> to vector<1x64xf32>
    tpu.vector_store %arg27[%193, %c0_85], %196 {strides = array<i32>} : memref<8x64xf32, #tpu.memory_space<vmem>>, vector<1x64xf32>,
    %c6_i32 = arith.constant 6 : i32
    %197 = arith.index_cast %c6_i32 : i32 to index
    %c0_86 = arith.constant 0 : index
    %c0_87 = arith.constant 0 : index
    %198 = vector.load %arg24[%197, %c0_86, %c0_87] : memref<8x16x64xf32, #tpu.memory_space<vmem>>, vector<1x16x64xf32>
    %199 = vector.shape_cast %198 : vector<1x16x64xf32> to vector<16x64xf32>
    %200 = arith.mulf %199, %187 : vector<16x64xf32>
    %201 = arith.index_cast %c6_i32 : i32 to index
    %c0_88 = arith.constant 0 : index
    %c0_89 = arith.constant 0 : index
    %202 = vector.load %arg25[%201, %c0_88, %c0_89] : memref<8x16x64xf32, #tpu.memory_space<vmem>>, vector<1x16x64xf32>
    %203 = vector.shape_cast %202 : vector<1x16x64xf32> to vector<16x64xf32>
    %204 = arith.addf %200, %203 : vector<16x64xf32>
    %205 = arith.index_cast %c6_i32 : i32 to index
    %c0_90 = arith.constant 0 : index
    %c0_91 = arith.constant 0 : index
    %206 = vector.load %arg26[%205, %c0_90, %c0_91] : memref<8x16x64xf32, #tpu.memory_space<vmem>>, vector<1x16x64xf32>
    %207 = vector.shape_cast %206 : vector<1x16x64xf32> to vector<16x64xf32>
    %208 = arith.mulf %204, %207 : vector<16x64xf32>
    %cst_92 = arith.constant dense<0.000000e+00> : vector<64xf32>
    %209 = vector.multi_reduction <add>, %208, %cst_92 [0] : vector<16x64xf32> to vector<64xf32>
    %210 = arith.index_cast %c6_i32 : i32 to index
    %c0_93 = arith.constant 0 : index
    %211 = vector.load %arg27[%210, %c0_93] : memref<8x64xf32, #tpu.memory_space<vmem>>, vector<1x64xf32>
    %212 = vector.shape_cast %211 : vector<1x64xf32> to vector<64xf32>
    %213 = vector.shape_cast %209 : vector<64xf32> to vector<1x64xf32>
    tpu.vector_store %arg27[%210, %c0_93], %213 {strides = array<i32>} : memref<8x64xf32, #tpu.memory_space<vmem>>, vector<1x64xf32>,
    %c7_i32 = arith.constant 7 : i32
    %214 = arith.index_cast %c7_i32 : i32 to index
    %c0_94 = arith.constant 0 : index
    %c0_95 = arith.constant 0 : index
    %215 = vector.load %arg24[%214, %c0_94, %c0_95] : memref<8x16x64xf32, #tpu.memory_space<vmem>>, vector<1x16x64xf32>
    %216 = vector.shape_cast %215 : vector<1x16x64xf32> to vector<16x64xf32>
    %217 = arith.mulf %216, %204 : vector<16x64xf32>
    %218 = arith.index_cast %c7_i32 : i32 to index
    %c0_96 = arith.constant 0 : index
    %c0_97 = arith.constant 0 : index
    %219 = vector.load %arg25[%218, %c0_96, %c0_97] : memref<8x16x64xf32, #tpu.memory_space<vmem>>, vector<1x16x64xf32>
    %220 = vector.shape_cast %219 : vector<1x16x64xf32> to vector<16x64xf32>
    %221 = arith.addf %217, %220 : vector<16x64xf32>
    %222 = arith.index_cast %c7_i32 : i32 to index
    %c0_98 = arith.constant 0 : index
    %c0_99 = arith.constant 0 : index
    %223 = vector.load %arg26[%222, %c0_98, %c0_99] : memref<8x16x64xf32, #tpu.memory_space<vmem>>, vector<1x16x64xf32>
    %224 = vector.shape_cast %223 : vector<1x16x64xf32> to vector<16x64xf32>
    %225 = arith.mulf %221, %224 : vector<16x64xf32>
    %cst_100 = arith.constant dense<0.000000e+00> : vector<64xf32>
    %226 = vector.multi_reduction <add>, %225, %cst_100 [0] : vector<16x64xf32> to vector<64xf32>
    %227 = arith.index_cast %c7_i32 : i32 to index
    %c0_101 = arith.constant 0 : index
    %228 = vector.load %arg27[%227, %c0_101] : memref<8x64xf32, #tpu.memory_space<vmem>>, vector<1x64xf32>
    %229 = vector.shape_cast %228 : vector<1x64xf32> to vector<64xf32>
    %230 = vector.shape_cast %226 : vector<64xf32> to vector<1x64xf32>
    tpu.vector_store %arg27[%227, %c0_101], %230 {strides = array<i32>} : memref<8x64xf32, #tpu.memory_space<vmem>>, vector<1x64xf32>,
    %c8_i32 = arith.constant 8 : i32
    %c0_102 = arith.constant 0 : index
    %c0_103 = arith.constant 0 : index
    %231 = vector.load %arg27[%c0_102, %c0_103] : memref<8x64xf32, #tpu.memory_space<vmem>>, vector<8x64xf32>
    %c0_104 = arith.constant 0 : index
    %c0_105 = arith.constant 0 : index
    %232 = vector.load %arg10[%c0_104, %c0_105] : memref<1x64xf32, #tpu.memory_space<vmem>>, vector<1x64xf32>
    %233 = vector.broadcast %232 : vector<1x64xf32> to vector<8x64xf32>
    %234 = arith.mulf %58, %233 : vector<8x64xf32>
    %235 = arith.addf %231, %234 : vector<8x64xf32>
    %236 = arith.negf %27 : vector<8x64xf32>
    %237 = math.exp %236 : vector<8x64xf32>
    %cst_106 = arith.constant 1.000000e+00 : f32
    %238 = vector.broadcast %cst_106 : f32 to vector<8x64xf32>
    %239 = arith.addf %238, %237 : vector<8x64xf32>
    %240 = arith.divf %238, %239 : vector<8x64xf32>
    %241 = arith.mulf %27, %240 : vector<8x64xf32>
    %242 = arith.mulf %235, %241 : vector<8x64xf32>
    %c0_107 = arith.constant 0 : index
    %c0_108 = arith.constant 0 : index
    %243 = vector.load %arg11[%c0_107, %c0_108] : memref<64x32xf32, #tpu.memory_space<vmem>>, vector<64x32xf32>
    %cst_109 = arith.constant dense<0.000000e+00> : vector<8x32xf32>
    %244 = tpu.matmul %242, %243, %cst_109 {dimension_numbers = #tpu.dot_dimension_numbers<[1], [0], [0], [1], [0, 0, 1, 1], [], []>} : vector<8x64xf32>, vector<64x32xf32>, vector<8x32xf32> -> vector<8x32xf32>
    %245 = arith.addf %244, %1 : vector<8x32xf32>
    %cst_110 = arith.constant dense<0.000000e+00> : vector<8xf32>
    %246 = vector.multi_reduction <add>, %245, %cst_110 [1] : vector<8x32xf32> to vector<8xf32>
    %247 = vector.shape_cast %246 : vector<8xf32> to vector<8x1xf32>
    %cst_111 = arith.constant 3.200000e+01 : f32
    %248 = vector.broadcast %cst_111 : f32 to vector<8x1xf32>
    %249 = arith.divf %247, %248 : vector<8x1xf32>
    %250 = vector.broadcast %249 : vector<8x1xf32> to vector<8x32xf32>
    %251 = arith.subf %245, %250 : vector<8x32xf32>
    %252 = arith.mulf %251, %251 : vector<8x32xf32>
    %cst_112 = arith.constant dense<0.000000e+00> : vector<8xf32>
    %253 = vector.multi_reduction <add>, %252, %cst_112 [1] : vector<8x32xf32> to vector<8xf32>
    %254 = vector.shape_cast %253 : vector<8xf32> to vector<8x1xf32>
    %cst_113 = arith.constant 3.200000e+01 : f32
    %255 = vector.broadcast %cst_113 : f32 to vector<8x1xf32>
    %256 = arith.divf %254, %255 : vector<8x1xf32>
    %cst_114 = arith.constant 9.99999974E-6 : f32
    %257 = vector.broadcast %cst_114 : f32 to vector<8x1xf32>
    %258 = arith.addf %256, %257 : vector<8x1xf32>
    %259 = math.rsqrt %258 : vector<8x1xf32>
    %260 = vector.broadcast %259 : vector<8x1xf32> to vector<8x32xf32>
    %261 = arith.mulf %251, %260 : vector<8x32xf32>
    %c0_115 = arith.constant 0 : index
    %c0_116 = arith.constant 0 : index
    %262 = vector.load %arg12[%c0_115, %c0_116] : memref<1x32xf32, #tpu.memory_space<vmem>>, vector<1x32xf32>
    %263 = vector.broadcast %262 : vector<1x32xf32> to vector<8x32xf32>
    %264 = arith.mulf %261, %263 : vector<8x32xf32>
    %c0_117 = arith.constant 0 : index
    %c0_118 = arith.constant 0 : index
    %265 = vector.load %arg13[%c0_117, %c0_118] : memref<1x32xf32, #tpu.memory_space<vmem>>, vector<1x32xf32>
    %266 = vector.broadcast %265 : vector<1x32xf32> to vector<8x32xf32>
    %267 = arith.addf %264, %266 : vector<8x32xf32>
    %c0_119 = arith.constant 0 : index
    %c0_120 = arith.constant 0 : index
    %268 = vector.load %arg14[%c0_119, %c0_120] : memref<32x128xf32, #tpu.memory_space<vmem>>, vector<32x128xf32>
    %cst_121 = arith.constant dense<0.000000e+00> : vector<8x128xf32>
    %269 = tpu.matmul %267, %268, %cst_121 {dimension_numbers = #tpu.dot_dimension_numbers<[1], [0], [0], [1], [0, 0, 1, 1], [], []>} : vector<8x32xf32>, vector<32x128xf32>, vector<8x128xf32> -> vector<8x128xf32>
    %270 = vector.extract_strided_slice %269 {offsets = [0, 0], sizes = [8, 64], strides = [1, 1]} : vector<8x128xf32> to vector<8x64xf32>
    %271 = vector.extract_strided_slice %269 {offsets = [0, 64], sizes = [8, 64], strides = [1, 1]} : vector<8x128xf32> to vector<8x64xf32>
    %c0_122 = arith.constant 0 : index
    %c0_123 = arith.constant 0 : index
    %272 = vector.load %arg15[%c0_122, %c0_123] : memref<4x64xf32, #tpu.memory_space<vmem>>, vector<4x64xf32>
    %cst_124 = arith.constant 0.000000e+00 : f32
    %273 = vector.broadcast %cst_124 : f32 to vector<3x64xf32>
    %274 = tpu.concatenate %273, %270 in 0 : vector<3x64xf32>, vector<8x64xf32> -> vector<11x64xf32>
    %275 = vector.extract_strided_slice %274 {offsets = [0, 0], sizes = [8, 64], strides = [1, 1]} : vector<11x64xf32> to vector<8x64xf32>
    %276 = vector.extract_strided_slice %272 {offsets = [0, 0], sizes = [1, 64], strides = [1, 1]} : vector<4x64xf32> to vector<1x64xf32>
    %277 = vector.broadcast %276 : vector<1x64xf32> to vector<8x64xf32>
    %278 = arith.mulf %275, %277 : vector<8x64xf32>
    %279 = vector.extract_strided_slice %274 {offsets = [1, 0], sizes = [8, 64], strides = [1, 1]} : vector<11x64xf32> to vector<8x64xf32>
    %280 = vector.extract_strided_slice %272 {offsets = [1, 0], sizes = [1, 64], strides = [1, 1]} : vector<4x64xf32> to vector<1x64xf32>
    %281 = vector.broadcast %280 : vector<1x64xf32> to vector<8x64xf32>
    %282 = arith.mulf %279, %281 : vector<8x64xf32>
    %283 = arith.addf %278, %282 : vector<8x64xf32>
    %284 = vector.extract_strided_slice %274 {offsets = [2, 0], sizes = [8, 64], strides = [1, 1]} : vector<11x64xf32> to vector<8x64xf32>
    %285 = vector.extract_strided_slice %272 {offsets = [2, 0], sizes = [1, 64], strides = [1, 1]} : vector<4x64xf32> to vector<1x64xf32>
    %286 = vector.broadcast %285 : vector<1x64xf32> to vector<8x64xf32>
    %287 = arith.mulf %284, %286 : vector<8x64xf32>
    %288 = arith.addf %283, %287 : vector<8x64xf32>
    %289 = vector.extract_strided_slice %274 {offsets = [3, 0], sizes = [8, 64], strides = [1, 1]} : vector<11x64xf32> to vector<8x64xf32>
    %290 = vector.extract_strided_slice %272 {offsets = [3, 0], sizes = [1, 64], strides = [1, 1]} : vector<4x64xf32> to vector<1x64xf32>
    %291 = vector.broadcast %290 : vector<1x64xf32> to vector<8x64xf32>
    %292 = arith.mulf %289, %291 : vector<8x64xf32>
    %293 = arith.addf %288, %292 : vector<8x64xf32>
    %c0_125 = arith.constant 0 : index
    %c0_126 = arith.constant 0 : index
    %294 = vector.load %arg16[%c0_125, %c0_126] : memref<1x64xf32, #tpu.memory_space<vmem>>, vector<1x64xf32>
    %295 = vector.broadcast %294 : vector<1x64xf32> to vector<8x64xf32>
    %296 = arith.addf %293, %295 : vector<8x64xf32>
    %297 = arith.negf %296 : vector<8x64xf32>
    %298 = math.exp %297 : vector<8x64xf32>
    %cst_127 = arith.constant 1.000000e+00 : f32
    %299 = vector.broadcast %cst_127 : f32 to vector<8x64xf32>
    %300 = arith.addf %299, %298 : vector<8x64xf32>
    %301 = arith.divf %299, %300 : vector<8x64xf32>
    %302 = arith.mulf %296, %301 : vector<8x64xf32>
    %c0_128 = arith.constant 0 : index
    %c0_129 = arith.constant 0 : index
    %303 = vector.load %arg17[%c0_128, %c0_129] : memref<64x96xf32, #tpu.memory_space<vmem>>, vector<64x96xf32>
    %cst_130 = arith.constant dense<0.000000e+00> : vector<8x96xf32>
    %304 = tpu.matmul %302, %303, %cst_130 {dimension_numbers = #tpu.dot_dimension_numbers<[1], [0], [0], [1], [0, 0, 1, 1], [], []>} : vector<8x64xf32>, vector<64x96xf32>, vector<8x96xf32> -> vector<8x96xf32>
    %305 = vector.extract_strided_slice %304 {offsets = [0, 0], sizes = [8, 64], strides = [1, 1]} : vector<8x96xf32> to vector<8x64xf32>
    %c0_131 = arith.constant 0 : index
    %c0_132 = arith.constant 0 : index
    %306 = vector.load %arg18[%c0_131, %c0_132] : memref<1x64xf32, #tpu.memory_space<vmem>>, vector<1x64xf32>
    %307 = vector.broadcast %306 : vector<1x64xf32> to vector<8x64xf32>
    %308 = arith.addf %305, %307 : vector<8x64xf32>
    %cst_133 = arith.constant 0.000000e+00 : f32
    %309 = vector.broadcast %cst_133 : f32 to vector<8x64xf32>
    %310 = arith.maximumf %308, %309 : vector<8x64xf32>
    %311 = math.absf %308 : vector<8x64xf32>
    %cst_134 = arith.constant 0.000000e+00 : f32
    %312 = vector.broadcast %cst_134 : f32 to vector<8x64xf32>
    %313 = arith.subf %312, %311 : vector<8x64xf32>
    %314 = math.exp %313 : vector<8x64xf32>
    %315 = math.log1p %314 : vector<8x64xf32>
    %316 = arith.addf %310, %315 : vector<8x64xf32>
    %317 = vector.extract_strided_slice %304 {offsets = [0, 64], sizes = [8, 16], strides = [1, 1]} : vector<8x96xf32> to vector<8x16xf32>
    %318 = vector.extract_strided_slice %304 {offsets = [0, 80], sizes = [8, 16], strides = [1, 1]} : vector<8x96xf32> to vector<8x16xf32>
    %319 = vector.shape_cast %316 : vector<8x64xf32> to vector<8x1x64xf32>
    %c0_135 = arith.constant 0 : index
    %c0_136 = arith.constant 0 : index
    %320 = vector.load %arg19[%c0_135, %c0_136] : memref<16x64xf32, #tpu.memory_space<vmem>>, vector<16x64xf32>
    %321 = vector.shape_cast %320 : vector<16x64xf32> to vector<1x16x64xf32>
    %322 = vector.broadcast %319 : vector<8x1x64xf32> to vector<8x16x64xf32>
    %323 = vector.broadcast %321 : vector<1x16x64xf32> to vector<8x16x64xf32>
    %324 = arith.mulf %322, %323 : vector<8x16x64xf32>
    %325 = math.exp %324 : vector<8x16x64xf32>
    %326 = arith.mulf %316, %302 : vector<8x64xf32>
    %327 = vector.shape_cast %326 : vector<8x64xf32> to vector<8x1x64xf32>
    %328 = vector.shape_cast %317 : vector<8x16xf32> to vector<8x16x1xf32>
    %329 = vector.broadcast %327 : vector<8x1x64xf32> to vector<8x16x64xf32>
    %330 = vector.broadcast %328 : vector<8x16x1xf32> to vector<8x16x64xf32>
    %331 = arith.mulf %329, %330 : vector<8x16x64xf32>
    %c0_137 = arith.constant 0 : index
    %c0_138 = arith.constant 0 : index
    %c0_139 = arith.constant 0 : index
    %332 = vector.load %arg24[%c0_137, %c0_138, %c0_139] : memref<8x16x64xf32, #tpu.memory_space<vmem>>, vector<8x16x64xf32>
    tpu.vector_store %arg24[%c0_137, %c0_138, %c0_139], %325 {strides = array<i32>} : memref<8x16x64xf32, #tpu.memory_space<vmem>>, vector<8x16x64xf32>,
    %c0_140 = arith.constant 0 : index
    %c0_141 = arith.constant 0 : index
    %c0_142 = arith.constant 0 : index
    %333 = vector.load %arg25[%c0_140, %c0_141, %c0_142] : memref<8x16x64xf32, #tpu.memory_space<vmem>>, vector<8x16x64xf32>
    tpu.vector_store %arg25[%c0_140, %c0_141, %c0_142], %331 {strides = array<i32>} : memref<8x16x64xf32, #tpu.memory_space<vmem>>, vector<8x16x64xf32>,
    %334 = vector.shape_cast %318 : vector<8x16xf32> to vector<8x16x1xf32>
    %335 = vector.shape_cast %334 : vector<8x16x1xf32> to vector<8x16x1xf32>
    %336 = vector.broadcast %335 : vector<8x16x1xf32> to vector<8x16x64xf32>
    %c0_143 = arith.constant 0 : index
    %c0_144 = arith.constant 0 : index
    %c0_145 = arith.constant 0 : index
    %337 = vector.load %arg26[%c0_143, %c0_144, %c0_145] : memref<8x16x64xf32, #tpu.memory_space<vmem>>, vector<8x16x64xf32>
    tpu.vector_store %arg26[%c0_143, %c0_144, %c0_145], %336 {strides = array<i32>} : memref<8x16x64xf32, #tpu.memory_space<vmem>>, vector<8x16x64xf32>,
    %cst_146 = arith.constant 0.000000e+00 : f32
    %338 = vector.broadcast %cst_146 : f32 to vector<16x64xf32>
    %c0_i32_147 = arith.constant 0 : i32
    %339 = arith.index_cast %c0_i32_147 : i32 to index
    %c0_148 = arith.constant 0 : index
    %c0_149 = arith.constant 0 : index
    %340 = vector.load %arg24[%339, %c0_148, %c0_149] : memref<8x16x64xf32, #tpu.memory_space<vmem>>, vector<1x16x64xf32>
    %341 = vector.shape_cast %340 : vector<1x16x64xf32> to vector<16x64xf32>
    %342 = arith.mulf %341, %338 : vector<16x64xf32>
    %343 = arith.index_cast %c0_i32_147 : i32 to index
    %c0_150 = arith.constant 0 : index
    %c0_151 = arith.constant 0 : index
    %344 = vector.load %arg25[%343, %c0_150, %c0_151] : memref<8x16x64xf32, #tpu.memory_space<vmem>>, vector<1x16x64xf32>
    %345 = vector.shape_cast %344 : vector<1x16x64xf32> to vector<16x64xf32>
    %346 = arith.addf %342, %345 : vector<16x64xf32>
    %347 = arith.index_cast %c0_i32_147 : i32 to index
    %c0_152 = arith.constant 0 : index
    %c0_153 = arith.constant 0 : index
    %348 = vector.load %arg26[%347, %c0_152, %c0_153] : memref<8x16x64xf32, #tpu.memory_space<vmem>>, vector<1x16x64xf32>
    %349 = vector.shape_cast %348 : vector<1x16x64xf32> to vector<16x64xf32>
    %350 = arith.mulf %346, %349 : vector<16x64xf32>
    %cst_154 = arith.constant dense<0.000000e+00> : vector<64xf32>
    %351 = vector.multi_reduction <add>, %350, %cst_154 [0] : vector<16x64xf32> to vector<64xf32>
    %352 = arith.index_cast %c0_i32_147 : i32 to index
    %c0_155 = arith.constant 0 : index
    %353 = vector.load %arg27[%352, %c0_155] : memref<8x64xf32, #tpu.memory_space<vmem>>, vector<1x64xf32>
    %354 = vector.shape_cast %353 : vector<1x64xf32> to vector<64xf32>
    %355 = vector.shape_cast %351 : vector<64xf32> to vector<1x64xf32>
    tpu.vector_store %arg27[%352, %c0_155], %355 {strides = array<i32>} : memref<8x64xf32, #tpu.memory_space<vmem>>, vector<1x64xf32>,
    %c1_i32_156 = arith.constant 1 : i32
    %356 = arith.index_cast %c1_i32_156 : i32 to index
    %c0_157 = arith.constant 0 : index
    %c0_158 = arith.constant 0 : index
    %357 = vector.load %arg24[%356, %c0_157, %c0_158] : memref<8x16x64xf32, #tpu.memory_space<vmem>>, vector<1x16x64xf32>
    %358 = vector.shape_cast %357 : vector<1x16x64xf32> to vector<16x64xf32>
    %359 = arith.mulf %358, %346 : vector<16x64xf32>
    %360 = arith.index_cast %c1_i32_156 : i32 to index
    %c0_159 = arith.constant 0 : index
    %c0_160 = arith.constant 0 : index
    %361 = vector.load %arg25[%360, %c0_159, %c0_160] : memref<8x16x64xf32, #tpu.memory_space<vmem>>, vector<1x16x64xf32>
    %362 = vector.shape_cast %361 : vector<1x16x64xf32> to vector<16x64xf32>
    %363 = arith.addf %359, %362 : vector<16x64xf32>
    %364 = arith.index_cast %c1_i32_156 : i32 to index
    %c0_161 = arith.constant 0 : index
    %c0_162 = arith.constant 0 : index
    %365 = vector.load %arg26[%364, %c0_161, %c0_162] : memref<8x16x64xf32, #tpu.memory_space<vmem>>, vector<1x16x64xf32>
    %366 = vector.shape_cast %365 : vector<1x16x64xf32> to vector<16x64xf32>
    %367 = arith.mulf %363, %366 : vector<16x64xf32>
    %cst_163 = arith.constant dense<0.000000e+00> : vector<64xf32>
    %368 = vector.multi_reduction <add>, %367, %cst_163 [0] : vector<16x64xf32> to vector<64xf32>
    %369 = arith.index_cast %c1_i32_156 : i32 to index
    %c0_164 = arith.constant 0 : index
    %370 = vector.load %arg27[%369, %c0_164] : memref<8x64xf32, #tpu.memory_space<vmem>>, vector<1x64xf32>
    %371 = vector.shape_cast %370 : vector<1x64xf32> to vector<64xf32>
    %372 = vector.shape_cast %368 : vector<64xf32> to vector<1x64xf32>
    tpu.vector_store %arg27[%369, %c0_164], %372 {strides = array<i32>} : memref<8x64xf32, #tpu.memory_space<vmem>>, vector<1x64xf32>,
    %c2_i32_165 = arith.constant 2 : i32
    %373 = arith.index_cast %c2_i32_165 : i32 to index
    %c0_166 = arith.constant 0 : index
    %c0_167 = arith.constant 0 : index
    %374 = vector.load %arg24[%373, %c0_166, %c0_167] : memref<8x16x64xf32, #tpu.memory_space<vmem>>, vector<1x16x64xf32>
    %375 = vector.shape_cast %374 : vector<1x16x64xf32> to vector<16x64xf32>
    %376 = arith.mulf %375, %363 : vector<16x64xf32>
    %377 = arith.index_cast %c2_i32_165 : i32 to index
    %c0_168 = arith.constant 0 : index
    %c0_169 = arith.constant 0 : index
    %378 = vector.load %arg25[%377, %c0_168, %c0_169] : memref<8x16x64xf32, #tpu.memory_space<vmem>>, vector<1x16x64xf32>
    %379 = vector.shape_cast %378 : vector<1x16x64xf32> to vector<16x64xf32>
    %380 = arith.addf %376, %379 : vector<16x64xf32>
    %381 = arith.index_cast %c2_i32_165 : i32 to index
    %c0_170 = arith.constant 0 : index
    %c0_171 = arith.constant 0 : index
    %382 = vector.load %arg26[%381, %c0_170, %c0_171] : memref<8x16x64xf32, #tpu.memory_space<vmem>>, vector<1x16x64xf32>
    %383 = vector.shape_cast %382 : vector<1x16x64xf32> to vector<16x64xf32>
    %384 = arith.mulf %380, %383 : vector<16x64xf32>
    %cst_172 = arith.constant dense<0.000000e+00> : vector<64xf32>
    %385 = vector.multi_reduction <add>, %384, %cst_172 [0] : vector<16x64xf32> to vector<64xf32>
    %386 = arith.index_cast %c2_i32_165 : i32 to index
    %c0_173 = arith.constant 0 : index
    %387 = vector.load %arg27[%386, %c0_173] : memref<8x64xf32, #tpu.memory_space<vmem>>, vector<1x64xf32>
    %388 = vector.shape_cast %387 : vector<1x64xf32> to vector<64xf32>
    %389 = vector.shape_cast %385 : vector<64xf32> to vector<1x64xf32>
    tpu.vector_store %arg27[%386, %c0_173], %389 {strides = array<i32>} : memref<8x64xf32, #tpu.memory_space<vmem>>, vector<1x64xf32>,
    %c3_i32_174 = arith.constant 3 : i32
    %390 = arith.index_cast %c3_i32_174 : i32 to index
    %c0_175 = arith.constant 0 : index
    %c0_176 = arith.constant 0 : index
    %391 = vector.load %arg24[%390, %c0_175, %c0_176] : memref<8x16x64xf32, #tpu.memory_space<vmem>>, vector<1x16x64xf32>
    %392 = vector.shape_cast %391 : vector<1x16x64xf32> to vector<16x64xf32>
    %393 = arith.mulf %392, %380 : vector<16x64xf32>
    %394 = arith.index_cast %c3_i32_174 : i32 to index
    %c0_177 = arith.constant 0 : index
    %c0_178 = arith.constant 0 : index
    %395 = vector.load %arg25[%394, %c0_177, %c0_178] : memref<8x16x64xf32, #tpu.memory_space<vmem>>, vector<1x16x64xf32>
    %396 = vector.shape_cast %395 : vector<1x16x64xf32> to vector<16x64xf32>
    %397 = arith.addf %393, %396 : vector<16x64xf32>
    %398 = arith.index_cast %c3_i32_174 : i32 to index
    %c0_179 = arith.constant 0 : index
    %c0_180 = arith.constant 0 : index
    %399 = vector.load %arg26[%398, %c0_179, %c0_180] : memref<8x16x64xf32, #tpu.memory_space<vmem>>, vector<1x16x64xf32>
    %400 = vector.shape_cast %399 : vector<1x16x64xf32> to vector<16x64xf32>
    %401 = arith.mulf %397, %400 : vector<16x64xf32>
    %cst_181 = arith.constant dense<0.000000e+00> : vector<64xf32>
    %402 = vector.multi_reduction <add>, %401, %cst_181 [0] : vector<16x64xf32> to vector<64xf32>
    %403 = arith.index_cast %c3_i32_174 : i32 to index
    %c0_182 = arith.constant 0 : index
    %404 = vector.load %arg27[%403, %c0_182] : memref<8x64xf32, #tpu.memory_space<vmem>>, vector<1x64xf32>
    %405 = vector.shape_cast %404 : vector<1x64xf32> to vector<64xf32>
    %406 = vector.shape_cast %402 : vector<64xf32> to vector<1x64xf32>
    tpu.vector_store %arg27[%403, %c0_182], %406 {strides = array<i32>} : memref<8x64xf32, #tpu.memory_space<vmem>>, vector<1x64xf32>,
    %c4_i32_183 = arith.constant 4 : i32
    %407 = arith.index_cast %c4_i32_183 : i32 to index
    %c0_184 = arith.constant 0 : index
    %c0_185 = arith.constant 0 : index
    %408 = vector.load %arg24[%407, %c0_184, %c0_185] : memref<8x16x64xf32, #tpu.memory_space<vmem>>, vector<1x16x64xf32>
    %409 = vector.shape_cast %408 : vector<1x16x64xf32> to vector<16x64xf32>
    %410 = arith.mulf %409, %397 : vector<16x64xf32>
    %411 = arith.index_cast %c4_i32_183 : i32 to index
    %c0_186 = arith.constant 0 : index
    %c0_187 = arith.constant 0 : index
    %412 = vector.load %arg25[%411, %c0_186, %c0_187] : memref<8x16x64xf32, #tpu.memory_space<vmem>>, vector<1x16x64xf32>
    %413 = vector.shape_cast %412 : vector<1x16x64xf32> to vector<16x64xf32>
    %414 = arith.addf %410, %413 : vector<16x64xf32>
    %415 = arith.index_cast %c4_i32_183 : i32 to index
    %c0_188 = arith.constant 0 : index
    %c0_189 = arith.constant 0 : index
    %416 = vector.load %arg26[%415, %c0_188, %c0_189] : memref<8x16x64xf32, #tpu.memory_space<vmem>>, vector<1x16x64xf32>
    %417 = vector.shape_cast %416 : vector<1x16x64xf32> to vector<16x64xf32>
    %418 = arith.mulf %414, %417 : vector<16x64xf32>
    %cst_190 = arith.constant dense<0.000000e+00> : vector<64xf32>
    %419 = vector.multi_reduction <add>, %418, %cst_190 [0] : vector<16x64xf32> to vector<64xf32>
    %420 = arith.index_cast %c4_i32_183 : i32 to index
    %c0_191 = arith.constant 0 : index
    %421 = vector.load %arg27[%420, %c0_191] : memref<8x64xf32, #tpu.memory_space<vmem>>, vector<1x64xf32>
    %422 = vector.shape_cast %421 : vector<1x64xf32> to vector<64xf32>
    %423 = vector.shape_cast %419 : vector<64xf32> to vector<1x64xf32>
    tpu.vector_store %arg27[%420, %c0_191], %423 {strides = array<i32>} : memref<8x64xf32, #tpu.memory_space<vmem>>, vector<1x64xf32>,
    %c5_i32_192 = arith.constant 5 : i32
    %424 = arith.index_cast %c5_i32_192 : i32 to index
    %c0_193 = arith.constant 0 : index
    %c0_194 = arith.constant 0 : index
    %425 = vector.load %arg24[%424, %c0_193, %c0_194] : memref<8x16x64xf32, #tpu.memory_space<vmem>>, vector<1x16x64xf32>
    %426 = vector.shape_cast %425 : vector<1x16x64xf32> to vector<16x64xf32>
    %427 = arith.mulf %426, %414 : vector<16x64xf32>
    %428 = arith.index_cast %c5_i32_192 : i32 to index
    %c0_195 = arith.constant 0 : index
    %c0_196 = arith.constant 0 : index
    %429 = vector.load %arg25[%428, %c0_195, %c0_196] : memref<8x16x64xf32, #tpu.memory_space<vmem>>, vector<1x16x64xf32>
    %430 = vector.shape_cast %429 : vector<1x16x64xf32> to vector<16x64xf32>
    %431 = arith.addf %427, %430 : vector<16x64xf32>
    %432 = arith.index_cast %c5_i32_192 : i32 to index
    %c0_197 = arith.constant 0 : index
    %c0_198 = arith.constant 0 : index
    %433 = vector.load %arg26[%432, %c0_197, %c0_198] : memref<8x16x64xf32, #tpu.memory_space<vmem>>, vector<1x16x64xf32>
    %434 = vector.shape_cast %433 : vector<1x16x64xf32> to vector<16x64xf32>
    %435 = arith.mulf %431, %434 : vector<16x64xf32>
    %cst_199 = arith.constant dense<0.000000e+00> : vector<64xf32>
    %436 = vector.multi_reduction <add>, %435, %cst_199 [0] : vector<16x64xf32> to vector<64xf32>
    %437 = arith.index_cast %c5_i32_192 : i32 to index
    %c0_200 = arith.constant 0 : index
    %438 = vector.load %arg27[%437, %c0_200] : memref<8x64xf32, #tpu.memory_space<vmem>>, vector<1x64xf32>
    %439 = vector.shape_cast %438 : vector<1x64xf32> to vector<64xf32>
    %440 = vector.shape_cast %436 : vector<64xf32> to vector<1x64xf32>
    tpu.vector_store %arg27[%437, %c0_200], %440 {strides = array<i32>} : memref<8x64xf32, #tpu.memory_space<vmem>>, vector<1x64xf32>,
    %c6_i32_201 = arith.constant 6 : i32
    %441 = arith.index_cast %c6_i32_201 : i32 to index
    %c0_202 = arith.constant 0 : index
    %c0_203 = arith.constant 0 : index
    %442 = vector.load %arg24[%441, %c0_202, %c0_203] : memref<8x16x64xf32, #tpu.memory_space<vmem>>, vector<1x16x64xf32>
    %443 = vector.shape_cast %442 : vector<1x16x64xf32> to vector<16x64xf32>
    %444 = arith.mulf %443, %431 : vector<16x64xf32>
    %445 = arith.index_cast %c6_i32_201 : i32 to index
    %c0_204 = arith.constant 0 : index
    %c0_205 = arith.constant 0 : index
    %446 = vector.load %arg25[%445, %c0_204, %c0_205] : memref<8x16x64xf32, #tpu.memory_space<vmem>>, vector<1x16x64xf32>
    %447 = vector.shape_cast %446 : vector<1x16x64xf32> to vector<16x64xf32>
    %448 = arith.addf %444, %447 : vector<16x64xf32>
    %449 = arith.index_cast %c6_i32_201 : i32 to index
    %c0_206 = arith.constant 0 : index
    %c0_207 = arith.constant 0 : index
    %450 = vector.load %arg26[%449, %c0_206, %c0_207] : memref<8x16x64xf32, #tpu.memory_space<vmem>>, vector<1x16x64xf32>
    %451 = vector.shape_cast %450 : vector<1x16x64xf32> to vector<16x64xf32>
    %452 = arith.mulf %448, %451 : vector<16x64xf32>
    %cst_208 = arith.constant dense<0.000000e+00> : vector<64xf32>
    %453 = vector.multi_reduction <add>, %452, %cst_208 [0] : vector<16x64xf32> to vector<64xf32>
    %454 = arith.index_cast %c6_i32_201 : i32 to index
    %c0_209 = arith.constant 0 : index
    %455 = vector.load %arg27[%454, %c0_209] : memref<8x64xf32, #tpu.memory_space<vmem>>, vector<1x64xf32>
    %456 = vector.shape_cast %455 : vector<1x64xf32> to vector<64xf32>
    %457 = vector.shape_cast %453 : vector<64xf32> to vector<1x64xf32>
    tpu.vector_store %arg27[%454, %c0_209], %457 {strides = array<i32>} : memref<8x64xf32, #tpu.memory_space<vmem>>, vector<1x64xf32>,
    %c7_i32_210 = arith.constant 7 : i32
    %458 = arith.index_cast %c7_i32_210 : i32 to index
    %c0_211 = arith.constant 0 : index
    %c0_212 = arith.constant 0 : index
    %459 = vector.load %arg24[%458, %c0_211, %c0_212] : memref<8x16x64xf32, #tpu.memory_space<vmem>>, vector<1x16x64xf32>
    %460 = vector.shape_cast %459 : vector<1x16x64xf32> to vector<16x64xf32>
    %461 = arith.mulf %460, %448 : vector<16x64xf32>
    %462 = arith.index_cast %c7_i32_210 : i32 to index
    %c0_213 = arith.constant 0 : index
    %c0_214 = arith.constant 0 : index
    %463 = vector.load %arg25[%462, %c0_213, %c0_214] : memref<8x16x64xf32, #tpu.memory_space<vmem>>, vector<1x16x64xf32>
    %464 = vector.shape_cast %463 : vector<1x16x64xf32> to vector<16x64xf32>
    %465 = arith.addf %461, %464 : vector<16x64xf32>
    %466 = arith.index_cast %c7_i32_210 : i32 to index
    %c0_215 = arith.constant 0 : index
    %c0_216 = arith.constant 0 : index
    %467 = vector.load %arg26[%466, %c0_215, %c0_216] : memref<8x16x64xf32, #tpu.memory_space<vmem>>, vector<1x16x64xf32>
    %468 = vector.shape_cast %467 : vector<1x16x64xf32> to vector<16x64xf32>
    %469 = arith.mulf %465, %468 : vector<16x64xf32>
    %cst_217 = arith.constant dense<0.000000e+00> : vector<64xf32>
    %470 = vector.multi_reduction <add>, %469, %cst_217 [0] : vector<16x64xf32> to vector<64xf32>
    %471 = arith.index_cast %c7_i32_210 : i32 to index
    %c0_218 = arith.constant 0 : index
    %472 = vector.load %arg27[%471, %c0_218] : memref<8x64xf32, #tpu.memory_space<vmem>>, vector<1x64xf32>
    %473 = vector.shape_cast %472 : vector<1x64xf32> to vector<64xf32>
    %474 = vector.shape_cast %470 : vector<64xf32> to vector<1x64xf32>
    tpu.vector_store %arg27[%471, %c0_218], %474 {strides = array<i32>} : memref<8x64xf32, #tpu.memory_space<vmem>>, vector<1x64xf32>,
    %c8_i32_219 = arith.constant 8 : i32
    %c0_220 = arith.constant 0 : index
    %c0_221 = arith.constant 0 : index
    %475 = vector.load %arg27[%c0_220, %c0_221] : memref<8x64xf32, #tpu.memory_space<vmem>>, vector<8x64xf32>
    %c0_222 = arith.constant 0 : index
    %c0_223 = arith.constant 0 : index
    %476 = vector.load %arg20[%c0_222, %c0_223] : memref<1x64xf32, #tpu.memory_space<vmem>>, vector<1x64xf32>
    %477 = vector.broadcast %476 : vector<1x64xf32> to vector<8x64xf32>
    %478 = arith.mulf %302, %477 : vector<8x64xf32>
    %479 = arith.addf %475, %478 : vector<8x64xf32>
    %480 = arith.negf %271 : vector<8x64xf32>
    %481 = math.exp %480 : vector<8x64xf32>
    %cst_224 = arith.constant 1.000000e+00 : f32
    %482 = vector.broadcast %cst_224 : f32 to vector<8x64xf32>
    %483 = arith.addf %482, %481 : vector<8x64xf32>
    %484 = arith.divf %482, %483 : vector<8x64xf32>
    %485 = arith.mulf %271, %484 : vector<8x64xf32>
    %486 = arith.mulf %479, %485 : vector<8x64xf32>
    %c0_225 = arith.constant 0 : index
    %c0_226 = arith.constant 0 : index
    %487 = vector.load %arg21[%c0_225, %c0_226] : memref<64x32xf32, #tpu.memory_space<vmem>>, vector<64x32xf32>
    %cst_227 = arith.constant dense<0.000000e+00> : vector<8x32xf32>
    %488 = tpu.matmul %486, %487, %cst_227 {dimension_numbers = #tpu.dot_dimension_numbers<[1], [0], [0], [1], [0, 0, 1, 1], [], []>} : vector<8x64xf32>, vector<64x32xf32>, vector<8x32xf32> -> vector<8x32xf32>
    %c0_228 = arith.constant 0 : index
    %c0_229 = arith.constant 0 : index
    %c0_230 = arith.constant 0 : index
    %489 = vector.load %arg22[%c0_228, %c0_229, %c0_230] : memref<1x8x32xf32, #tpu.memory_space<vmem>>, vector<1x8x32xf32>
    %490 = vector.shape_cast %489 : vector<1x8x32xf32> to vector<8x32xf32>
    %491 = vector.shape_cast %488 : vector<8x32xf32> to vector<1x8x32xf32>
    tpu.vector_store %arg22[%c0_228, %c0_229, %c0_230], %491 {strides = array<i32>} : memref<1x8x32xf32, #tpu.memory_space<vmem>>, vector<1x8x32xf32>,
    %c0_231 = arith.constant 0 : index
    %c0_232 = arith.constant 0 : index
    %c0_233 = arith.constant 0 : index
    %492 = vector.load %arg23[%c0_231, %c0_232, %c0_233] : memref<1x8x32xf32, #tpu.memory_space<vmem>>, vector<1x8x32xf32>
    %493 = vector.shape_cast %492 : vector<1x8x32xf32> to vector<8x32xf32>
    %494 = vector.shape_cast %245 : vector<8x32xf32> to vector<1x8x32xf32>
    tpu.vector_store %arg23[%c0_231, %c0_232, %c0_233], %494 {strides = array<i32>} : memref<1x8x32xf32, #tpu.memory_space<vmem>>, vector<1x8x32xf32>,
    return
  }
  func.func @transform_0(%arg0: i32) -> (i32, i32, i32) {
    %c0_i32 = arith.constant 0 : i32
    %c0_i32_0 = arith.constant 0 : i32
    %c0_i32_1 = arith.constant 0 : i32
    return %arg0, %c0_i32, %c0_i32_0 : i32, i32, i32
  }
  func.func @transform_1(%arg0: i32) -> (i32, i32) {
    %c0_i32 = arith.constant 0 : i32
    %c0_i32_0 = arith.constant 0 : i32
    %c0_i32_1 = arith.constant 0 : i32
    return %c0_i32, %c0_i32_0 : i32, i32
  }
  func.func @transform_2(%arg0: i32) -> (i32, i32) {
    %c0_i32 = arith.constant 0 : i32
    %c0_i32_0 = arith.constant 0 : i32
    %c0_i32_1 = arith.constant 0 : i32
    return %c0_i32, %c0_i32_0 : i32, i32
  }
  func.func @transform_3(%arg0: i32) -> (i32, i32) {
    %c0_i32 = arith.constant 0 : i32
    %c0_i32_0 = arith.constant 0 : i32
    %c0_i32_1 = arith.constant 0 : i32
    return %c0_i32, %c0_i32_0 : i32, i32
  }
  func.func @transform_4(%arg0: i32) -> (i32, i32) {
    %c0_i32 = arith.constant 0 : i32
    %c0_i32_0 = arith.constant 0 : i32
    %c0_i32_1 = arith.constant 0 : i32
    return %c0_i32, %c0_i32_0 : i32, i32
  }
  func.func @transform_5(%arg0: i32) -> (i32, i32) {
    %c0_i32 = arith.constant 0 : i32
    %c0_i32_0 = arith.constant 0 : i32
    %c0_i32_1 = arith.constant 0 : i32
    return %c0_i32, %c0_i32_0 : i32, i32
  }
  func.func @transform_6(%arg0: i32) -> (i32, i32) {
    %c0_i32 = arith.constant 0 : i32
    %c0_i32_0 = arith.constant 0 : i32
    %c0_i32_1 = arith.constant 0 : i32
    return %c0_i32, %c0_i32_0 : i32, i32
  }
  func.func @transform_7(%arg0: i32) -> (i32, i32) {
    %c0_i32 = arith.constant 0 : i32
    %c0_i32_0 = arith.constant 0 : i32
    %c0_i32_1 = arith.constant 0 : i32
    return %c0_i32, %c0_i32_0 : i32, i32
  }
  func.func @transform_8(%arg0: i32) -> (i32, i32) {
    %c0_i32 = arith.constant 0 : i32
    %c0_i32_0 = arith.constant 0 : i32
    %c0_i32_1 = arith.constant 0 : i32
    return %c0_i32, %c0_i32_0 : i32, i32
  }
  func.func @transform_9(%arg0: i32) -> (i32, i32) {
    %c0_i32 = arith.constant 0 : i32
    %c0_i32_0 = arith.constant 0 : i32
    %c0_i32_1 = arith.constant 0 : i32
    return %c0_i32, %c0_i32_0 : i32, i32
  }
  func.func @transform_10(%arg0: i32) -> (i32, i32) {
    %c0_i32 = arith.constant 0 : i32
    %c0_i32_0 = arith.constant 0 : i32
    %c0_i32_1 = arith.constant 0 : i32
    return %c0_i32, %c0_i32_0 : i32, i32
  }
  func.func @transform_11(%arg0: i32) -> (i32, i32) {
    %c0_i32 = arith.constant 0 : i32
    %c0_i32_0 = arith.constant 0 : i32
    %c0_i32_1 = arith.constant 0 : i32
    return %c0_i32, %c0_i32_0 : i32, i32
  }
  func.func @transform_12(%arg0: i32) -> (i32, i32) {
    %c0_i32 = arith.constant 0 : i32
    %c0_i32_0 = arith.constant 0 : i32
    %c0_i32_1 = arith.constant 0 : i32
    return %c0_i32, %c0_i32_0 : i32, i32
  }
  func.func @transform_13(%arg0: i32) -> (i32, i32) {
    %c0_i32 = arith.constant 0 : i32
    %c0_i32_0 = arith.constant 0 : i32
    %c0_i32_1 = arith.constant 0 : i32
    return %c0_i32, %c0_i32_0 : i32, i32
  }
  func.func @transform_14(%arg0: i32) -> (i32, i32) {
    %c0_i32 = arith.constant 0 : i32
    %c0_i32_0 = arith.constant 0 : i32
    %c0_i32_1 = arith.constant 0 : i32
    return %c0_i32, %c0_i32_0 : i32, i32
  }
  func.func @transform_15(%arg0: i32) -> (i32, i32) {
    %c0_i32 = arith.constant 0 : i32
    %c0_i32_0 = arith.constant 0 : i32
    %c0_i32_1 = arith.constant 0 : i32
    return %c0_i32, %c0_i32_0 : i32, i32
  }
  func.func @transform_16(%arg0: i32) -> (i32, i32) {
    %c0_i32 = arith.constant 0 : i32
    %c0_i32_0 = arith.constant 0 : i32
    %c0_i32_1 = arith.constant 0 : i32
    return %c0_i32, %c0_i32_0 : i32, i32
  }
  func.func @transform_17(%arg0: i32) -> (i32, i32) {
    %c0_i32 = arith.constant 0 : i32
    %c0_i32_0 = arith.constant 0 : i32
    %c0_i32_1 = arith.constant 0 : i32
    return %c0_i32, %c0_i32_0 : i32, i32
  }
  func.func @transform_18(%arg0: i32) -> (i32, i32) {
    %c0_i32 = arith.constant 0 : i32
    %c0_i32_0 = arith.constant 0 : i32
    %c0_i32_1 = arith.constant 0 : i32
    return %c0_i32, %c0_i32_0 : i32, i32
  }
  func.func @transform_19(%arg0: i32) -> (i32, i32) {
    %c0_i32 = arith.constant 0 : i32
    %c0_i32_0 = arith.constant 0 : i32
    %c0_i32_1 = arith.constant 0 : i32
    return %c0_i32, %c0_i32_0 : i32, i32
  }
  func.func @transform_20(%arg0: i32) -> (i32, i32) {
    %c0_i32 = arith.constant 0 : i32
    %c0_i32_0 = arith.constant 0 : i32
    %c0_i32_1 = arith.constant 0 : i32
    return %c0_i32, %c0_i32_0 : i32, i32
  }
  func.func @transform_21(%arg0: i32) -> (i32, i32, i32) {
    %c0_i32 = arith.constant 0 : i32
    %c0_i32_0 = arith.constant 0 : i32
    %c0_i32_1 = arith.constant 0 : i32
    return %arg0, %c0_i32, %c0_i32_0 : i32, i32, i32
  }
  func.func @transform_22(%arg0: i32) -> (i32, i32, i32) {
    %c0_i32 = arith.constant 0 : i32
    %c0_i32_0 = arith.constant 0 : i32
    %c0_i32_1 = arith.constant 0 : i32
    return %arg0, %c0_i32, %c0_i32_0 : i32, i32, i32
  }
}

</mosaic_0001>

<bundles_post_ra>
// kernel: tpu_custom_call.1
= control target key start
LH: loop header
LB: loop body
LE: loop exit
PB: predicated region body
PF: predicated region fallthrough
CT: control target
= control target key end

     0   :  { %s4625_s0 = inlined_call_operand.hbm [shape: f32[2,8,32], index: 0, kind: input, shape index: {}]   ;;  %s4626_s1 = inlined_call_operand.hbm [shape: f32[1,32], index: 1, kind: input, shape index: {}]   ;;  %s4627_s2 = inlined_call_operand.hbm [shape: f32[1,32], index: 2, kind: input, shape index: {}]   ;;  %s4628_s3 = inlined_call_operand.vmem [shape: f32[32,128], index: 3, kind: input, shape index: {}]   ;;  %s4629_s4 = inlined_call_operand.hbm [shape: f32[4,64], index: 4, kind: input, shape index: {}]   ;;  %s4630_s5 = inlined_call_operand.vmem [shape: f32[1,64], index: 5, kind: input, shape index: {}]   ;;  %s4631_s6 = inlined_call_operand.vmem [shape: f32[64,96], index: 6, kind: input, shape index: {}]   ;;  %s4632_s7 = inlined_call_operand.hbm [shape: f32[1,64], index: 7, kind: input, shape index: {}]   ;;  %s4633_s8 = inlined_call_operand.hbm [shape: f32[16,64], index: 8, kind: input, shape index: {}]   ;;  %s4634_s9 = inlined_call_operand.hbm [shape: f32[1,64], index: 9, kind: input, shape index: {}]   ;;  %s4635_s10 = inlined_call_operand.vmem [shape: f32[64,32], index: 10, kind: input, shape index: {}]   ;;  %s4636_s11 = inlined_call_operand.hbm [shape: f32[1,32], index: 11, kind: input, shape index: {}]   ;;  %s4637_s12 = inlined_call_operand.hbm [shape: f32[1,32], index: 12, kind: input, shape index: {}]   ;;  %s4638_s13 = inlined_call_operand.hbm [shape: f32[32,128], index: 13, kind: input, shape index: {}]   ;;  %s4639_s14 = inlined_call_operand.hbm [shape: f32[4,64], index: 14, kind: input, shape index: {}]   ;;  %s4640_s15 = inlined_call_operand.hbm [shape: f32[1,64], index: 15, kind: input, shape index: {}]   ;;  %s4641_s16 = inlined_call_operand.vmem [shape: f32[64,96], index: 16, kind: input, shape index: {}]   ;;  %s4642_s17 = inlined_call_operand.hbm [shape: f32[1,64], index: 17, kind: input, shape index: {}]   ;;  %s4643_s18 = inlined_call_operand.vmem [shape: f32[16,64], index: 18, kind: input, shape index: {}]   ;;  %s4644_s19 = inlined_call_operand.hbm [shape: f32[1,64], index: 19, kind: input, shape index: {}]   ;;  %s4645_s20 = inlined_call_operand.vmem [shape: f32[64,32], index: 20, kind: input, shape index: {}]   ;;  %s4646_s21 = inlined_call_operand.hbm [shape: f32[2,8,32], index: 21, kind: output, shape index: {0}]   ;;  %s4647_s22 = inlined_call_operand.hbm [shape: f32[2,8,32], index: 22, kind: output, shape index: {1}]  }
   0x1   :  { %4664 = sst [smem:[#allocation43_spill]] %s4625_s0 }
   0x2   :  { %4665 = sst [smem:[#allocation44_spill]] %s4626_s1 }
   0x3   :  { %4666 = sst [smem:[#allocation45_spill]] %s4627_s2 }
   0x4   :  { %4667 = sst [smem:[#allocation46_spill]] %s4628_s3 }
   0x5   :  { %4668 = sst [smem:[#allocation47_spill]] %s4629_s4 }
   0x6   :  { %4669 = sst [smem:[#allocation48_spill]] %s4630_s5 }
   0x7   :  { %4670 = sst [smem:[#allocation49_spill]] %s4631_s6 }
   0x8   :  { %4671 = sst [smem:[#allocation50_spill]] %s4632_s7 }
   0x9   :  { %4672 = sst [smem:[#allocation51_spill]] %s4633_s8 }
   0xa   :  { %4673 = sst [smem:[#allocation52_spill]] %s4634_s9 }
   0xb   :  { %4674 = sst [smem:[#allocation53_spill]] %s4635_s10 }
   0xc   :  { %4675 = sst [smem:[#allocation54_spill]] %s4636_s11 }
   0xd   :  { %4676 = sst [smem:[#allocation55_spill]] %s4637_s12 }
   0xe   :  { %4677 = sst [smem:[#allocation56_spill]] %s4638_s13 }
   0xf   :  { %4678 = sst [smem:[#allocation57_spill]] %s4639_s14 }
  0x10   :  { %4679 = sst [smem:[#allocation58_spill]] %s4640_s15 }
  0x11   :  { %4680 = sst [smem:[#allocation59_spill]] %s4641_s16 }
  0x12   :  { %4681 = sst [smem:[#allocation60_spill]] %s4643_s18 }
  0x13   :  { %4682 = sst [smem:[#allocation61_spill]] %s4645_s20 }
  0x14   :  { %4683 = sst [smem:[#allocation62_spill]] %s4646_s21 }
  0x15   :  { %4684 = sst [smem:[#allocation63_spill]] %s4647_s22 }
  0x16   :  { %28 = vsyncpa [#allocation7], 0 }
  0x17   :  { %30 = vsyncpa [#allocation7 + $0x1], 0 }
  0x18   :  { %31 = vsyncpa [#allocation10], 0 }
  0x19   :  { %32 = vsyncpa [#allocation13], 0 }
  0x1a   :  { %33 = vsyncpa [#allocation16], 0 }
  0x1b   :  { %34 = vsyncpa [#allocation19], 0 }
  0x1c   :  { %35 = vsyncpa [#allocation22], 0 }
  0x1d   :  { %36 = vsyncpa [#allocation25], 0 }
  0x1e   :  { %37 = vsyncpa [#allocation28], 0 }
  0x1f   :  { %38 = vsyncpa [#allocation8], 0 }
  0x20   :  { %40 = vsyncpa [#allocation8 + $0x1], 0 }
  0x21   :  { %41 = vsyncpa [#allocation31], 0 }
  0x22   :  { %43 = vsyncpa [#allocation31 + $0x1], 0  ;;  %s3818_s3 = smov 0   ;;  %s3820_s28 = smov 0  }
  0x23   :  { %s3822_s29 = smov 0   ;;  %s3824_s30 = smov 0  }
  0x24 LB: > { %s4685_s23 = sld [smem:[#allocation44_spill]]  ;;  %s3842_s5 = sadd.s32 4294967295, %s3684_s30   ;;  %s3684_s30 = sphi %s3824_s30, %s4719_s30   ;;  %s3680_s29 = sphi %s3822_s29, %s4718_s29   ;;  %s3676_s28 = sphi %s3820_s28, %s4717_s28   ;;  %s3672_s3 = sphi %s3818_s3, %s4716_s3  }
  0x25   : > { %p2754_p0 = scmp.ge.s32.totalorder %s3684_s30, 1  ;;  %p70_p1 = scmp.eq.s32.totalorder %s3842_s5, 0 }
  0x26   : > { %p552_p2 = scmp.lt.s32.totalorder %s3684_s30, 3  ;;  %s3686_s6 = smov [#allocation9]  }
  0x27   : > { %s566_s25 = sshll.u32 %s3686_s6, 4  ;;  %s4688_s27 = sld [smem:[#allocation47_spill]]  ;;  %s567_s25 = int_to_ptr.vmem [resolvable:$true] %s566_s25 }
  0x28   : > { %p3847_p3 = pnand %p2754_p0, %p552_p2  ;;  %s4690_s8 = sld [smem:[#allocation51_spill]] }
  0x29   : > { %s3688_s26 = smov [#allocation15]   ;;  %s4691_s11 = sld [smem:[#allocation54_spill]] }
  0x2a   : > { %s564_s1 = sshll.u32 %s4685_s23, 4  ;;  %p2862_p5 = pneg %p3847_p3  ;;  %s565_s1 = int_to_ptr.hbm [resolvable:$true] %s564_s1 }
  0x2b   : > { %s4686_s24 = scalar_select %p3847_p3, 1, 0 }
  0x2c   : > { %p3859_p6 = pnand %p2862_p5, %p70_p1  ;;  %s3687_s23 = smov [#allocation12]  }
  0x2d   : > { %4687 = sst [smem:[#allocation42_spill]] %s4686_s24  ;;  %s591_s4 = sshll.u32 %s4688_s27, 4  ;;  %s592_s4 = int_to_ptr.hbm [resolvable:$true] %s591_s4 }
  0x2e   : > { %s593_s21 = sshll.u32 %s3687_s23, 4  ;;  %s620_s20 = sshll.u32 %s4690_s8, 4  ;;  %s594_s21 = int_to_ptr.vmem [resolvable:$true] %s593_s21  ;;  %s621_s20 = int_to_ptr.hbm [resolvable:$true] %s620_s20 }
  0x2f   : > { %2865 = dma.hbm_to_vmem [thread:$0]  (!%p3859_p6), %s565_s1, 16, %s567_s25, [#allocation10]  }
  0x30   : > { %2871 = dma.hbm_to_vmem [thread:$0]  (!%p3859_p6), %s592_s4, 64, %s594_s21, [#allocation13]  }
  0x31   : > { %s622_s2 = sshll.u32 %s3688_s26, 4  ;;  %s650_s16 = sshll.u32 %s4691_s11, 4  ;;  %s623_s2 = int_to_ptr.vmem [resolvable:$true] %s622_s2  ;;  %s651_s16 = int_to_ptr.hbm [resolvable:$true] %s650_s16 }
  0x32   : > { %s3689_s23 = smov 128   ;;  %s3690_s10 = smov 8  }
  0x33   : > { %2877 = dma.hbm_to_vmem [thread:$0]  (!%p3859_p6), %s621_s20, 256, %s623_s2, [#allocation16], %s3689_s23, %s3689_s23, %s3690_s10  }
  0x34   : > { %s3691_s22 = smov [#allocation18]   ;;  %s4692_s13 = sld [smem:[#allocation56_spill]] }
  0x35   : > { %s652_s6 = sshll.u32 %s3691_s22, 4  ;;  %s4693_s15 = sld [smem:[#allocation58_spill]]  ;;  %s653_s6 = int_to_ptr.vmem [resolvable:$true] %s652_s6 }
  0x36   : > { %2883 = dma.hbm_to_vmem [thread:$0]  (!%p3859_p6), %s651_s16, 16, %s653_s6, [#allocation19]  }
  0x37   : > { %s3692_s4 = smov [#allocation21]   ;;  %s3693_s20 = smov [#allocation24]  }
  0x38   : > { %s675_s26 = sshll.u32 %s3692_s4, 4  ;;  %s702_s2 = sshll.u32 %s3693_s20, 4  ;;  %s676_s26 = int_to_ptr.vmem [resolvable:$true] %s675_s26  ;;  %s703_s2 = int_to_ptr.vmem [resolvable:$true] %s702_s2 }
  0x39   : > { %s4694_s27 = sld [smem:[#allocation45_spill]]  ;;  %s3694_s18 = smov [#allocation11]  }
  0x3a   : > { %s673_s21 = sshll.u32 %s4692_s13, 4  ;;  %s4695_s7 = sld [smem:[#allocation50_spill]]  ;;  %s674_s21 = int_to_ptr.hbm [resolvable:$true] %s673_s21 }
  0x3b   : > { %s700_s25 = sshll.u32 %s4693_s15, 4  ;;  %s578_s4 = sshll.u32 %s3694_s18, 4  ;;  %s701_s25 = int_to_ptr.hbm [resolvable:$true] %s700_s25  ;;  %s579_s4 = int_to_ptr.vmem [resolvable:$true] %s578_s4 }
  0x3c   : > { %2889 = dma.hbm_to_vmem [thread:$0]  (!%p3859_p6), %s674_s21, 512, %s676_s26, [#allocation22], %s3689_s23, %s3689_s23, %s3690_s10  }
  0x3d   : > { %2895 = dma.hbm_to_vmem [thread:$0]  (!%p3859_p6), %s701_s25, 16, %s703_s2, [#allocation25]  }
  0x3e   : > { %s3695_s10 = smov [#allocation14]   ;;  %s4696_s9 = sld [smem:[#allocation52_spill]] }
  0x3f   : > { %s576_s22 = sshll.u32 %s4694_s27, 4  ;;  %s611_s23 = sshll.u32 %s3695_s10, 4  ;;  %s577_s22 = int_to_ptr.hbm [resolvable:$true] %s576_s22  ;;  %s612_s23 = int_to_ptr.vmem [resolvable:$true] %s611_s23 }
  0x40   : > { %s609_s1 = sshll.u32 %s4695_s7, 4  ;;  %s4697_s12 = sld [smem:[#allocation55_spill]]  ;;  %s610_s1 = int_to_ptr.hbm [resolvable:$true] %s609_s1 }
  0x41   : > { %2868 = dma.hbm_to_vmem [thread:$0]  (!%p3859_p6), %s577_s22, 16, %s579_s4, [#allocation10]  }
  0x42   : > { %2874 = dma.hbm_to_vmem [thread:$0]  (!%p3859_p6), %s610_s1, 16, %s612_s23, [#allocation13]  }
  0x43   : > { %s3696_s24 = smov [#allocation17]   ;;  %s3697_s22 = smov [#allocation20]  }
  0x44   : > { %s635_s20 = sshll.u32 %s4696_s9, 4  ;;  %s637_s27 = sshll.u32 %s3696_s24, 4  ;;  %s636_s20 = int_to_ptr.hbm [resolvable:$true] %s635_s20  ;;  %s638_s27 = int_to_ptr.vmem [resolvable:$true] %s637_s27 }
  0x45   : > { %2880 = dma.hbm_to_vmem [thread:$0]  (!%p3859_p6), %s636_s20, 16, %s638_s27, [#allocation16]  }
  0x46   : > { %s662_s8 = sshll.u32 %s4697_s12, 4  ;;  %s664_s16 = sshll.u32 %s3697_s22, 4  ;;  %s663_s8 = int_to_ptr.hbm [resolvable:$true] %s662_s8  ;;  %s665_s16 = int_to_ptr.vmem [resolvable:$true] %s664_s16 }
  0x47   : > { %s4698_s14 = sld [smem:[#allocation57_spill]]  ;;  %s715_s23 = sshll.u32 %s4642_s17, 4  ;;  %s716_s23 = int_to_ptr.hbm [resolvable:$true] %s715_s23 }
  0x48   : > { %2886 = dma.hbm_to_vmem [thread:$0]  (!%p3859_p6), %s663_s8, 16, %s665_s16, [#allocation19]  }
  0x49   : > { %s3698_s21 = smov [#allocation23]   ;;  %s3699_s20 = smov [#allocation26]  }
  0x4a   : > { %s690_s26 = sshll.u32 %s3698_s21, 4  ;;  %s717_s25 = sshll.u32 %s3699_s20, 4  ;;  %s691_s26 = int_to_ptr.vmem [resolvable:$true] %s690_s26  ;;  %s718_s25 = int_to_ptr.vmem [resolvable:$true] %s717_s25 }
  0x4b   : > { %s730_s24 = sshll.u32 %s4644_s19, 4  ;;  %s3700_s27 = smov [#allocation27]   ;;  %s731_s24 = int_to_ptr.hbm [resolvable:$true] %s730_s24 }
  0x4c   : > { %2898 = dma.hbm_to_vmem [thread:$0]  (!%p3859_p6), %s716_s23, 16, %s718_s25, [#allocation25]  }
  0x4d   : > { %s688_s4 = sshll.u32 %s4698_s14, 4  ;;  %s732_s22 = sshll.u32 %s3700_s27, 4  ;;  %s689_s4 = int_to_ptr.hbm [resolvable:$true] %s688_s4  ;;  %s733_s22 = int_to_ptr.vmem [resolvable:$true] %s732_s22 }
  0x4e   : > { %2892 = dma.hbm_to_vmem [thread:$0]  (!%p3859_p6), %s689_s4, 64, %s691_s26, [#allocation22]  }
  0x4f   : > { %2901 = dma.hbm_to_vmem [thread:$0]  (!%p3859_p6), %s731_s24, 16, %s733_s22, [#allocation28]  }
  0x50   : > { %s2753_s16 = sadd.s32 4294967294, %s3684_s30   ;;  %s3924_s6 = sadd.s32 1, %s3684_s30  }
  0x51   : > { %s56_s18 = sadd.s32 1, %s3680_s29  ;;  %s53_s4 = ssub.s32 %s3684_s30, %s3924_s6 }
  0x52   : > { %p63_p7 = scmp.ne.s32.totalorder %s3680_s29, %s3676_s28  ;;  %p54_p8 = scmp.eq.s32.totalorder %s53_s4, 0 }
  0x53   : > { %p64_p9 = scmp.eq.s32.totalorder %s3684_s30, 0  ;;  %p69_p10 = scmp.ne.s32.totalorder %s3676_s28, %s3672_s3 }
  0x54   : > { %p513_p11 = scmp.eq.s32.totalorder %s3842_s5, 1  ;;  %p519_p0 = scmp.eq.s32.totalorder %s2753_s16, 1 }
  0x55   : > { %s3936_s1 = scalar_select %p54_p8, %s3680_s29, %s56_s18  }
  0x56   : > { %p3940_p12 = por %p70_p1, %p69_p10  ;;  %p3944_p13 = por %p513_p11, %p63_p7 }
  0x57   : > { %p65_p2 = por %p64_p9, %p63_p7  ;;  %s746_s23 = sand.u32 1, %s3680_s29  }
  0x58   : > { %p3949_p5 = por %p519_p0, %p69_p10  ;;  %p2926_p6 = scmp.lt.s32.totalorder %s3684_s30, 2 }
  0x59   : > { %s2769_s26 = sshll.u32 %s746_s23, 3  ;;  %s2770_s20 = sshll.u32 %s3684_s30, 3 }
  0x5a   : > { %s4702_s8 = sld [smem:[#allocation43_spill]]  ;;  %s750_s22 = scalar_lea.vmem [#allocation6], %s2769_s26 }
  0x5b   : > { %s758_s18 = sshll.u32 %s750_s22, 4  ;;  %p3958_p8 = pnand %p2926_p6, %p65_p2  ;;  %s759_s18 = int_to_ptr.vmem [resolvable:$true] %s758_s18 }
  0x5c   : > { %s747_s4 = scalar_lea.sflag [#allocation7], %s746_s23 }
  0x5d   : > { %p3532_p9 = pneg %p3958_p8 }
  0x60   : > { %s754_s24 = scalar_lea.hbm %s4702_s8, %s2770_s20  ;;  %s3535_s26 = scalar_lea.hbm %s4702_s8, 16 }
  0x61   : > { %s756_s27 = sshll.u32 %s754_s24, 4  ;;  %s757_s27 = int_to_ptr.hbm [resolvable:$true] %s756_s27 }
  0x62   : > { %s3528_s7 = sshra.s32 %s757_s27, 4  ;;  %s3529_s7 = int_to_ptr.hbm [resolvable:$true] %s3528_s7 }
  0x63   : > { %s3530_s9 = scalar_lea.hbm %s3529_s7, 8  ;;  %p3536_p0 = scmp.lt.s32.totalorder %s3529_s7, %s4702_s8 }
  0x64   : > { %p3531_p7 = scmp.ne.s32.totalorder %s3529_s7, %s3530_s9  ;;  %p3537_p2 = scmp.lt.s32.totalorder %s3535_s26, %s3530_s9 }
  0x66   : > { %p3533_p10 = pnand %p3532_p9, %p3531_p7  ;;  %p3538_p6 = por %p3537_p2, %p3536_p0 }
  0x68   : > { %p3534_p11 = pneg %p3533_p10 }
  0x6a   : > { %p3539_p4 = pnand %p3538_p6, %p3534_p11 }
  0x6c   : > { %3542 = shalt.err (!%p3539_p4)
}
  0x6d   : > { %2905 = dma.hbm_to_vmem [thread:$0]  (!%p3958_p8), %s757_s27, 128, %s759_s18, %s747_s4  }
  0x6e   : > { %767 = sbr.rel (%p3847_p3) target bundleno = 2127 (0x84f), region = 104  ;;  %s3975_s22 = sand.u32 (!%p3847_p3), 1, %s3676_s28  }
  0x6f   : > { %s3978_s20 = sshll.u32 (!%p3847_p3), %s3975_s22, 3  ;;  %s770_s7 = scalar_lea.sflag (!%p3847_p3), [#allocation7], %s3975_s22 }
  0x70   : > { %s773_s9 = scalar_lea.vmem (!%p3847_p3), [#allocation6], %s3978_s20 }
  0x73   : > { %3631 = dma.done.wait (%p3940_p12), %s770_s7, 128  }
  0x74   : > { %3633 = vsyncadd (%p3940_p12), %s770_s7, 4294967168 }
  0x75   : > { %3635 = dma.done.wait (%p70_p1), [#allocation10], 32  }
  0x76   : > { %3637 = vsyncadd (%p70_p1), [#allocation10], 4294967264 }
  0x77   : > { %3639 = dma.done.wait (%p70_p1), [#allocation13], 80  }
  0x78   : > { %3641 = vsyncadd (%p70_p1), [#allocation13], 4294967216 }
  0x79   : > { %3643 = dma.done.wait (%p70_p1), [#allocation16], 272  }
  0x7a   : > { %3645 = vsyncadd (%p70_p1), [#allocation16], 4294967024 }
  0x7b   : > { %3647 = dma.done.wait (%p70_p1), [#allocation19], 32  }
  0x7c   : > { %3649 = vsyncadd (%p70_p1), [#allocation19], 4294967264 }
  0x7d   : > { %3651 = dma.done.wait (%p70_p1), [#allocation22], 576  }
  0x7e   : > { %3653 = vsyncadd (%p70_p1), [#allocation22], 4294966720 }
  0x7f   : > { %3655 = dma.done.wait (%p70_p1), [#allocation25], 32  }
  0x80   : > { %3657 = vsyncadd (%p70_p1), [#allocation25], 4294967264 }
  0x81   : > { %3659 = dma.done.wait (%p70_p1), [#allocation28], 16  }
  0x82   : > { %3661 = vsyncadd (%p70_p1), [#allocation28], 4294967280  ;;  %vm906_vm0 = vcmask 261120   ;;  %v905_v0 = vld [vmem:[%s773_s9] sm:$0xff]  ;;  %v3701_v2 = vmov 32.0   ;;  %s4705_s18 = sld [smem:[#allocation46_spill]] }
  0x83   : > { %v907_v1 = vsel %vm906_vm0, %v905_v0, 0.0  ;;  %3043 = vrcp.f32 %v3701_v2  ;;  %v3033_v27 = vld [vmem:[#allocation9] ss:$0 sm:$0xff]  ;;  %v3034_v30 = vld [vmem:[#allocation11] ss:$0 sm:$0xff]  ;;  %s4706_s0 = sld [smem:[#allocation49_spill]] }
  0x84   : > { %908 = vadd.xlane.f32.xlu0 %v907_v1  ;;  %v973_v33 = vld [vmem:[#allocation12] sm:$0xf]  ;;  %vm977_vm5 = vcmask 1042432   ;;  %vm986_vm6 = vcmask 1046528   ;;  %vm997_vm7 = vcmask 1045504   ;;  %vm1008_vm8 = vcmask 1044480  }
  0x85   : > { %v981_v36 = vperm.slane %v973_v33, 1  ;;  %v992_v37 = vperm.slane %v973_v33, 2  ;;  %v1003_v41 = vperm.slane %v973_v33, 3  ;;  %v979_v46 = vperm.slane %v973_v33, 0  ;;  %s4707_s23 = sld [smem:[#allocation48_spill]]  ;;  %s3702_s7 = smov 64  }
  0x86   : > { %vm1047_vm13 = vcmask 523264   ;;  %s4708_s4 = sld [smem:[#allocation53_spill]]  ;;  %s4658_s25 = scalar_lea.vmem [#allocation30], %s3978_s20 }
  0x87   : > { %s4709_s2 = sld [smem:[#allocation59_spill]]  ;;  %s4713_s26 = scalar_lea.vmem [#allocation30], %s3978_s20 }
  0x88   : > { %v949_v14 = vld [vmem:[%s4705_s18 + $0x18] sm:$0xff]  ;;  %v948_v15 = vld [vmem:[%s4705_s18 + $0x10] sm:$0xff]  ;;  %v947_v16 = vld [vmem:[%s4705_s18 + $0x8] sm:$0xff]  ;;  %s4711_s27 = sld [smem:[#allocation61_spill]] }
  0x89   : > { %v3044_v3 = vpop.eup %3043  ;;  %965 = vmatpush.msra.mxu0 %v949_v14  ;;  %v946_v17 = vld [vmem:[%s4705_s18] sm:$0xff]  ;;  %v1046_v34 = vld [vmem:[%s4706_s0 + $0x38] sm:$0xff]  ;;  %v1045_v35 = vld [vmem:[%s4706_s0 + $0x30] sm:$0xff] }
  0x8a   : > { %v911_v4 = vmul.f32 32.0, %v3044_v3  ;;  %vm915_vm1 = vweird.f32 %v3044_v3  ;;  %1059 = vmatpush.msra.mxu1 %v1046_v34  ;;  %v1044_v39 = vld [vmem:[%s4706_s0 + $0x28] sm:$0xff]  ;;  %v1043_v42 = vld [vmem:[%s4706_s0 + $0x20] sm:$0xff]  ;;  %v1042_v49 = vld [vmem:[%s4706_s0 + $0x18] sm:$0xff] }
  0x8b   : > { %966 = vmatpush.msra.mxu0 %v948_v15  ;;  %v1041_v55 = vld [vmem:[%s4706_s0 + $0x10] sm:$0xff]  ;;  %v1040_v58 = vld [vmem:[%s4706_s0 + $0x8] sm:$0xff]  ;;  %v1039_v63 = vld [vmem:[%s4706_s0] sm:$0xff]  ;;  %s2523_s0 = sshll.u32 %s4713_s26, 4  ;;  %s2524_s0 = int_to_ptr.vmem [resolvable:$true] %s2523_s0 }
  0x8c   : > { %v912_v5 = vsub.f32 1.0, %v911_v4  ;;  %1060 = vmatpush.msra.mxu1 %v1045_v35  ;;  %v3035_v2 = vld [vmem:[%s4707_s23] ss:$0 sm:$0xff]  ;;  %s4712_s23 = sld [smem:[#allocation63_spill]] }
  0x8d   : > { %967 = vmatpush.msra.mxu0 %v947_v16 }
  0x8e   : > { %v913_v6 = vmul.f32 %v3044_v3, %v912_v5  ;;  %1061 = vmatpush.msra.mxu1 %v1044_v39 }
  0x8f   : > { %968 = vmatpush.msra.mxu0 %v946_v17 }
  0x90   : > { %v914_v7 = vadd.f32 %v3044_v3, %v913_v6  ;;  %1062 = vmatpush.msra.mxu1 %v1043_v42  ;;  %v1175_v6 = vlaneseq }
  0x92   : > { %v4017_v8 = vsel %vm915_vm1, %v3044_v3, %v914_v7  ;;  %1063 = vmatpush.msra.mxu1 %v1042_v49 }
  0x94   : > { %1064 = vmatpush.msra.mxu1 %v1041_v55 }
  0x96   : > { %1065 = vmatpush.msra.mxu1 %v1040_v58 }
  0x98   : > { %1066 = vmatpush.msra.mxu1 %v1039_v63 }
  0xf7   : > { %v909_v9 = vpop.xlane.xlu0 %908 }
  0xf8   : > { %v917_v10 = vmul.f32 %v4017_v8, %v909_v9  ;;  %v4069_v9 = vshrl.u32 %v1175_v6, 7 }
  0xfa   : > { %v918_v11 = vsub.f32 %v905_v0, %v917_v10  ;;  %v4072_v10 = vadd.s32 64, %v4069_v9  ;;  %v4097_v33 = vadd.s32 72, %v4069_v9 }
  0xfc   : > { %v919_v12 = vmul.f32 %v918_v11, %v918_v11  ;;  %2994 = vset.pattern.permute.xlu0 %v4072_v10  ;;  %2992 = vset.pattern.permute.xlu2 %v4072_v10 }
  0xfd   : > { %2990 = vset.pattern.permute.xlu1 %v4072_v10 }
  0xfe   : > { %v920_v13 = vsel %vm906_vm0, %v919_v12, 0.0 }
  0xff   : > { %921 = vadd.xlane.f32.xlu0 %v920_v13 }
 0x172   : > { %v922_v18 = vpop.xlane.xlu0 %921 }
 0x173   : > { %v923_v19 = vmul.f32 %v922_v18, %v4017_v8 }
 0x175   : > { %v924_v20 = vadd.f32 1e-05, %v923_v19 }
 0x177   : > { %3045 = vrsqrt.f32 %v924_v20  ;;  %vm931_vm3 = vweird.f32 %v924_v20 }
 0x17d   : > { %v3046_v21 = vpop.eup %3045 }
 0x17e   : > { %v926_v22 = vmul.f32 %v3046_v21, %v924_v20  ;;  %vm932_vm2 = vweird.f32 %v3046_v21 }
 0x17f   : > { %vm933_vm4 = vmor %vm931_vm3, %vm932_vm2 }
 0x180   : > { %v927_v23 = vmul.f32 %v3046_v21, %v926_v22 }
 0x182   : > { %v928_v24 = vmul.f32 0.5, %v927_v23 }
 0x184   : > { %v929_v25 = vsub.f32 1.5, %v928_v24  ;;  %v3036_v24 = vld [vmem:[#allocation14] ss:$0 sm:$0xff] }
 0x186   : > { %v930_v26 = vmul.f32 %v3046_v21, %v929_v25 }
 0x188   : > { %v934_v28 = vsel %vm933_vm4, %v3046_v21, %v930_v26  ;;  %vm1475_vm4 = vcmask 516096  }
 0x189   : > { %v935_v29 = vmul.f32 %v934_v28, %v918_v11 }
 0x18b   : > { %v940_v31 = vmul.f32 %v3033_v27, %v935_v29 }
 0x18d   : > { %v945_v32 = vadd.f32 %v3034_v30, %v940_v31 }
 0x18f   : > { %2788 = vmatmul.msk.f32.vlgmr.msra.gmra.mxu0 %vm906_vm0, %v945_v32 }
 0x20c   : > { %v4041_v38 = vpop.f32.mrf.mxu0 }
 0x20d   : > { %v975_v40 = vrot.slane %v4041_v38, 5 }
 0x20f   : > { %v978_v43 = vsel %vm977_vm5, 0.0, %v975_v40  ;;  %v983_v44 = vmul.f32 %v981_v36, %v975_v40  ;;  %v994_v45 = vmul.f32 %v992_v37, %v975_v40  ;;  %v1005_v51 = vmul.f32 %v1003_v41, %v975_v40 }
 0x210   : > { %v982_v47 = vmul.f32 %v981_v36, %v978_v43  ;;  %v993_v48 = vmul.f32 %v992_v37, %v978_v43  ;;  %v1004_v52 = vmul.f32 %v1003_v41, %v978_v43  ;;  %v980_v57 = vmul.f32 %v979_v46, %v978_v43 }
 0x211   : > { %v988_v50 = vrot.slane %v983_v44, 1  ;;  %v999_v54 = vrot.slane %v994_v45, 2  ;;  %v1010_v60 = vrot.slane %v1005_v51, 3  ;;  %v4109_v41 = vadd.s32 80, %v4069_v9  ;;  %v1099_v51 = vld [vmem:[#allocation15] sm:$0xff] }
 0x212   : > { %v987_v53 = vrot.slane %v982_v47, 1  ;;  %v998_v56 = vrot.slane %v993_v48, 2  ;;  %v1009_v62 = vrot.slane %v1004_v52, 3 }
 0x214   : > { %v989_v59 = vsel %vm986_vm6, %v987_v53, %v988_v50  ;;  %v1000_v0 = vsel %vm997_vm7, %v998_v56, %v999_v54  ;;  %v1011_v3 = vsel %vm1008_vm8, %v1009_v62, %v1010_v60  ;;  %v1100_v53 = vld [vmem:[#allocation15 + $0x8] sm:$0xff] }
 0x215   : > { %v991_v61 = vadd.f32 %v989_v59, %v980_v57 }
 0x217   : > { %v1002_v1 = vadd.f32 %v1000_v0, %v991_v61 }
 0x219   : > { %v1013_v4 = vadd.f32 %v1011_v3, %v1002_v1 }
 0x21b   : > { %v1018_v5 = vadd.f32 %v3035_v2, %v1013_v4  ;;  %v4129_v4 = vadd.s32 88, %v4069_v9 }
 0x21d   : > { %v2789_v7 = vmul.f32 -1.442695, %v1018_v5 }
 0x21f   : > { %3047 = vpow2.f32 %v2789_v7 }
 0x225   : > { %v3048_v11 = vpop.eup %3047 }
 0x226   : > { %v1022_v12 = vadd.f32 1.0, %v3048_v11 }
 0x228   : > { %3049 = vrcp.f32 %v1022_v12  ;;  %v1034_v16 = vand.u32 2147483648, %v1022_v12  ;;  %v1032_v18 = vand.u32 2147483647, %v1022_v12  ;;  %vm1028_vm10 = vweird.f32 %v1022_v12 }
 0x22a   : > { %v1035_v20 = vor.u32 1.1754944e-38, %v1034_v16  ;;  %vm1033_vm12 = vcmp.eq.f32.partialorder %v1032_v18, 8.507059e+37 }
 0x22e   : > { %v3050_v13 = vpop.eup %3049 }
 0x22f   : > { %v1024_v14 = vmul.f32 %v3050_v13, %v1022_v12  ;;  %vm1029_vm9 = vweird.f32 %v3050_v13 }
 0x230   : > { %vm1030_vm11 = vmor %vm1028_vm10, %vm1029_vm9 }
 0x231   : > { %v1025_v15 = vsub.f32 1.0, %v1024_v14 }
 0x233   : > { %v1026_v17 = vmul.f32 %v3050_v13, %v1025_v15 }
 0x235   : > { %v1027_v19 = vadd.f32 %v3050_v13, %v1026_v17 }
 0x237   : > { %v1031_v21 = vsel %vm1030_vm11, %v3050_v13, %v1027_v19 }
 0x238   : > { %v1036_v22 = vsel %vm1033_vm12, %v1035_v20, %v1031_v21 }
 0x239   : > { %v4077_v23 = vmul.f32 %v1036_v22, %v1018_v5 }
 0x23b   : > { %2790 = vmatmul.msk.f32.vlgmr.msra.gmra.mxu1 %vm1047_vm13, %v4077_v23 }
 0x2b8   : > { %v4081_v25 = vpop.f32.mrf.mxu1 }
 0x2b9   : > { %v1075_v26 = vadd.f32 %v3036_v24, %v4081_v25  ;;  %v4085_v27 = vperm.slane %v4081_v25, 2  ;;  %v4088_v28 = vperm.slane %v4081_v25, 1  ;;  %v4091_v29 = vperm.slane %v4081_v25, 0 }
 0x2ba   : > { %v4103_v37 = vperm.slane %v4081_v25, 7  ;;  %v4123_v63 = vperm.slane %v4081_v25, 3 }
 0x2bb   : > { %v1077_v30 = vand.u32 2147483647, %v1075_v26  ;;  %1205 = vperm.xlu0 %2994, %v4085_v27   ;;  %1192 = vperm.xlu2 %2992, %v4088_v28   ;;  %v1076_v45 = vmax.f32 %v1075_v26, 0.0 }
 0x2bc   : > { %1179 = vperm.xlu1 %2990, %v4091_v29  }
 0x2bd   : > { %v1078_v31 = vsub.f32 0.0, %v1077_v30  ;;  %v4134_v30 = vperm.slane %v4081_v25, 4 }
 0x2bf   : > { %v1079_v32 = vmul.f32 1.442695, %v1078_v31 }
 0x2c1   : > { %3051 = vpow2.f32 %v1079_v32 }
 0x2c3   : > { %2996 = vset.pattern.permute.xlu0 %v4097_v33  ;;  %2993 = vset.pattern.permute.xlu2 %v4097_v33 }
 0x2c4   : > { %2991 = vset.pattern.permute.xlu1 %v4097_v33 }
 0x2c7   : > { %v3052_v34 = vpop.eup %3051 }
 0x2c8   : > { %v1081_v35 = vadd.f32 1.0, %v3052_v34  ;;  %v1084_v36 = vmul.f32 -0.5, %v3052_v34  ;;  %v1087_v40 = vand.u32 2147483647, %v3052_v34 }
 0x2ca   : > { %3053 = vlog2.f32 %v1081_v35  ;;  %v1085_v39 = vadd.f32 1.0, %v1084_v36  ;;  %vm1088_vm14 = vcmp.lt.f32.partialorder %v1087_v40, 0.0004427343 }
 0x2cb   : > { %1276 = vperm.xlu0 %2996, %v4103_v37   ;;  %1198 = vperm.xlu2 %2993, %v4088_v28  }
 0x2cc   : > { %1185 = vperm.xlu1 %2991, %v4091_v29   ;;  %v1086_v44 = vmul.f32 %v3052_v34, %v1085_v39 }
 0x2d0   : > { %v3054_v42 = vpop.eup %3053 }
 0x2d1   : > { %v1083_v43 = vmul.f32 0.6931472, %v3054_v42 }
 0x2d3   : > { %v1089_v46 = vsel %vm1088_vm14, %v1086_v44, %v1083_v43  ;;  %2999 = vset.pattern.permute.xlu0 %v4109_v41  ;;  %2995 = vset.pattern.permute.xlu2 %v4072_v10 }
 0x2d4   : > { %v4113_v47 = vadd.f32 %v1089_v46, %v1076_v45  ;;  %1211 = vperm.xlu1 %2991, %v4085_v27  }
 0x2d6   : > { %v1092_v48 = vrot.slane %v4113_v47, 1  ;;  %v1093_v49 = vrot.slane %v4113_v47, 2  ;;  %v1094_v50 = vrot.slane %v4113_v47, 3  ;;  %v1095_v52 = vrot.slane %v4113_v47, 4 }
 0x2d7   : > { %v1101_v54 = vperm.slane %v4113_v47, 0  ;;  %v1096_v57 = vrot.slane %v4113_v47, 5  ;;  %v1097_v0 = vrot.slane %v4113_v47, 6  ;;  %v1098_v5 = vrot.slane %v4113_v47, 7 }
 0x2d8   : > { %v1102_v55 = vperm.slane %v1092_v48, 0  ;;  %v1103_v56 = vperm.slane %v1093_v49, 0  ;;  %v1104_v58 = vperm.slane %v1094_v50, 0  ;;  %v1105_v1 = vperm.slane %v1095_v52, 0 }
 0x2d9   : > { %v1117_v59 = vmul.f32 %v1101_v54, %v1099_v51  ;;  %v1118_v60 = vmul.f32 %v1101_v54, %v1100_v53  ;;  %v1106_v6 = vperm.slane %v1096_v57, 0  ;;  %v1107_v16 = vperm.slane %v1097_v0, 0 }
 0x2da   : > { %v1119_v61 = vmul.f32 %v1102_v55, %v1099_v51  ;;  %v1120_v62 = vmul.f32 %v1102_v55, %v1100_v53  ;;  %v1121_v2 = vmul.f32 %v1103_v56, %v1099_v51  ;;  %v1122_v3 = vmul.f32 %v1103_v56, %v1100_v53 }
 0x2db   : > { %1370 = vperm.xlu0 %2999, %v4085_v27   ;;  %1218 = vperm.xlu2 %2995, %v4123_v63   ;;  %v1123_v7 = vmul.f32 %v1104_v58, %v1099_v51  ;;  %v1133_v11 = vmul.f32 1.442695, %v1117_v59  ;;  %v1124_v12 = vmul.f32 %v1104_v58, %v1100_v53  ;;  %v1135_v13 = vmul.f32 1.442695, %v1118_v60 }
 0x2dc   : > { %1224 = vperm.xlu1 %2991, %v4123_v63   ;;  %v1137_v14 = vmul.f32 1.442695, %v1119_v61  ;;  %v1139_v15 = vmul.f32 1.442695, %v1120_v62  ;;  %v1125_v17 = vmul.f32 %v1105_v1, %v1099_v51  ;;  %v1141_v18 = vmul.f32 1.442695, %v1121_v2 }
 0x2dd   : > { %3055 = vpow2.f32 %v1133_v11  ;;  %v1126_v19 = vmul.f32 %v1105_v1, %v1100_v53  ;;  %v1143_v20 = vmul.f32 1.442695, %v1122_v3  ;;  %v1108_v9 = vperm.slane %v1098_v5, 0 }
 0x2de   : > { %3057 = vpow2.f32 %v1135_v13  ;;  %v1127_v21 = vmul.f32 %v1106_v6, %v1099_v51  ;;  %v1145_v22 = vmul.f32 1.442695, %v1123_v7  ;;  %v1128_v24 = vmul.f32 %v1106_v6, %v1100_v53 }
 0x2df   : > { %3059 = vpow2.f32 %v1137_v14  ;;  %v1147_v26 = vmul.f32 1.442695, %v1124_v12  ;;  %v1129_v31 = vmul.f32 %v1107_v16, %v1099_v51  ;;  %v1149_v32 = vmul.f32 1.442695, %v1125_v17 }
 0x2e0   : > { %3061 = vpow2.f32 %v1139_v15  ;;  %v1130_v34 = vmul.f32 %v1107_v16, %v1100_v53  ;;  %v1151_v35 = vmul.f32 1.442695, %v1126_v19  ;;  %v1131_v39 = vmul.f32 %v1108_v9, %v1099_v51 }
 0x2e1   : > { %3063 = vpow2.f32 %v1141_v18  ;;  %v1153_v40 = vmul.f32 1.442695, %v1127_v21  ;;  %v1132_v43 = vmul.f32 %v1108_v9, %v1100_v53  ;;  %v1155_v44 = vmul.f32 1.442695, %v1128_v24 }
 0x2e2   : > { %3065 = vpow2.f32 %v1143_v20  ;;  %v1157_v46 = vmul.f32 1.442695, %v1129_v31  ;;  %v1159_v49 = vmul.f32 1.442695, %v1130_v34  ;;  %v1161_v51 = vmul.f32 1.442695, %v1131_v39 }
 0x2e3   : > { %3002 = vset.pattern.permute.xlu0 %v4129_v4  ;;  %1231 = vperm.xlu2 %2995, %v4134_v30   ;;  %v3056_v36 = vpop.eup %3055  ;;  %3067 = vpow2.f32 %v1145_v22  ;;  %v1163_v53 = vmul.f32 1.442695, %v1132_v43  ;;  %v4145_v54 = vperm.slane %v4081_v25, 5  ;;  %v4159_v0 = vperm.slane %v4081_v25, 6 }
 0x2e4   : > { %1237 = vperm.xlu1 %2991, %v4134_v30   ;;  %v3058_v42 = vpop.eup %3057  ;;  %3069 = vpow2.f32 %v1147_v26  ;;  %1310 = vst.msk [vmem:[#allocation2] sm:$0xff] %vm1047_vm13, %v3056_v36  ;;  %v4176_v25 = vmul.f32 %v4113_v47, %v4077_v23  ;;  %v2791_v11 = vmul.f32 -1.442695, %v4041_v38 }
 0x2e5   : > { %v3060_v45 = vpop.eup %3059  ;;  %3071 = vpow2.f32 %v1149_v32  ;;  %1311 = vst.msk [vmem:[#allocation2 + $0x8] sm:$0xff] %vm1047_vm13, %v3058_v42 }
 0x2e6   : > { %v3062_v48 = vpop.eup %3061  ;;  %3073 = vpow2.f32 %v1151_v35  ;;  %1312 = vst.msk [vmem:[#allocation2 + $0x10] sm:$0xff] %vm1047_vm13, %v3060_v45  ;;  %v1167_v3 = vrot.slane %v4176_v25, 1  ;;  %v1168_v13 = vrot.slane %v4176_v25, 2  ;;  %v1278_v15 = vperm.slane %v4176_v25, 0 }
 0x2e7   : > { %v3064_v50 = vpop.eup %3063  ;;  %3075 = vpow2.f32 %v1153_v40  ;;  %1313 = vst.msk [vmem:[#allocation2 + $0x18] sm:$0xff] %vm1047_vm13, %v3062_v48  ;;  %v1169_v19 = vrot.slane %v4176_v25, 3  ;;  %v1173_v26 = vrot.slane %v4176_v25, 7 }
 0x2e8   : > { %v3066_v52 = vpop.eup %3065  ;;  %3077 = vpow2.f32 %v1155_v44  ;;  %1314 = vst.msk [vmem:[#allocation2 + $0x20] sm:$0xff] %vm1047_vm13, %v3064_v50  ;;  %v1279_v5 = vperm.slane %v1167_v3, 0  ;;  %v1280_v14 = vperm.slane %v1168_v13, 0 }
 0x2e9   : > { %v3068_v55 = vpop.eup %3067  ;;  %3079 = vpow2.f32 %v1157_v46  ;;  %1315 = vst.msk [vmem:[#allocation2 + $0x28] sm:$0xff] %vm1047_vm13, %v3066_v52  ;;  %v1281_v9 = vperm.slane %v1169_v19, 0  ;;  %v1285_v32 = vperm.slane %v1173_v26, 0  ;;  %v1171_v46 = vrot.slane %v4176_v25, 5 }
 0x2ea   : > { %v3070_v56 = vpop.eup %3069  ;;  %3081 = vpow2.f32 %v1159_v49  ;;  %1316 = vst.msk [vmem:[#allocation2 + $0x30] sm:$0xff] %vm1047_vm13, %v3068_v55 }
 0x2eb   : > { %1400 = vperm.xlu0 %3002, %v4134_v30   ;;  %1244 = vperm.xlu2 %2995, %v4145_v54   ;;  %v3072_v57 = vpop.eup %3071  ;;  %3083 = vpow2.f32 %v1161_v51  ;;  %1317 = vst.msk [vmem:[#allocation2 + $0x38] sm:$0xff] %vm1047_vm13, %v3070_v56  ;;  %v1283_v51 = vperm.slane %v1171_v46, 0 }
 0x2ec   : > { %1250 = vperm.xlu1 %2991, %v4145_v54   ;;  %v3074_v58 = vpop.eup %3073  ;;  %3085 = vpow2.f32 %v1163_v53  ;;  %1318 = vst.msk [vmem:[#allocation2 + $0x40] sm:$0xff] %vm1047_vm13, %v3072_v57  ;;  %v1172_v57 = vrot.slane %v4176_v25, 6 }
 0x2ed   : > { %v3076_v59 = vpop.eup %3075  ;;  %1319 = vst.msk [vmem:[#allocation2 + $0x48] sm:$0xff] %vm1047_vm13, %v3074_v58  ;;  %3087 = vpow2.f32 %v2791_v11 }
 0x2ee   : > { %v3078_v60 = vpop.eup %3077  ;;  %1320 = vst.msk [vmem:[#allocation2 + $0x50] sm:$0xff] %vm1047_vm13, %v3076_v59 }
 0x2ef   : > { %v3080_v61 = vpop.eup %3079  ;;  %1321 = vst.msk [vmem:[#allocation2 + $0x58] sm:$0xff] %vm1047_vm13, %v3078_v60  ;;  %v1284_v60 = vperm.slane %v1172_v57, 0 }
 0x2f0   : > { %v3082_v62 = vpop.eup %3081  ;;  %1322 = vst.msk [vmem:[#allocation2 + $0x60] sm:$0xff] %vm1047_vm13, %v3080_v61 }
 0x2f1   : > { %v3084_v1 = vpop.eup %3083  ;;  %1323 = vst.msk [vmem:[#allocation2 + $0x68] sm:$0xff] %vm1047_vm13, %v3082_v62 }
 0x2f2   : > { %v3086_v2 = vpop.eup %3085  ;;  %1324 = vst.msk [vmem:[#allocation2 + $0x70] sm:$0xff] %vm1047_vm13, %v3084_v1 }
 0x2f3   : > { %3005 = vset.pattern.permute.xlu0 %v4109_v41  ;;  %1257 = vperm.xlu2 %2995, %v4159_v0   ;;  %1325 = vst.msk [vmem:[#allocation2 + $0x78] sm:$0xff] %vm1047_vm13, %v3086_v2 }
 0x2f4   : > { %1263 = vperm.xlu1 %2991, %v4159_v0  }
 0x2fb   : > { %1430 = vperm.xlu0 %3005, %v4103_v37   ;;  %1270 = vperm.xlu2 %2995, %v4103_v37  }
 0x2fc   : > { %2997 = vset.pattern.permute.xlu1 %v4109_v41 }
 0x303   : > { %3007 = vset.pattern.permute.xlu0 %v4072_v10  ;;  %2998 = vset.pattern.permute.xlu2 %v4129_v4 }
 0x304   : > { %1346 = vperm.xlu1 %2997, %v4091_v29  }
 0x30b   : > { %1352 = vperm.xlu2 %2998, %v4091_v29   ;;  %v3088_v29 = vpop.eup %3087 }
 0x30c   : > { %1358 = vperm.xlu1 %2997, %v4088_v28   ;;  %v1662_v12 = vadd.f32 1.0, %v3088_v29  ;;  %v1454_v29 = vld [vmem:[#allocation2] sm:$0xff] }
 0x30d   : > { %v1456_v13 = vmul.f32 0.0, %v1454_v29 }
 0x30e   : > { %3089 = vrcp.f32 %v1662_v12  ;;  %v1674_v45 = vand.u32 2147483648, %v1662_v12  ;;  %vm1668_vm1 = vweird.f32 %v1662_v12  ;;  %v1672_v48 = vand.u32 2147483647, %v1662_v12 }
 0x310   : > { %v1675_v50 = vor.u32 1.1754944e-38, %v1674_v45  ;;  %vm1673_vm3 = vcmp.eq.f32.partialorder %v1672_v48, 8.507059e+37 }
 0x313   : > { %1364 = vperm.xlu2 %2998, %v4088_v28  }
 0x314   : > { %3000 = vset.pattern.permute.xlu1 %v4129_v4 }
 0x315   : > { %v1193_v6 = vpop.permute.xlu2 %1192 }
 0x316   : > { %v1296_v7 = vmul.f32 %v1279_v5, %v1193_v6 }
 0x318   : > { %1328 = vst.msk [vmem:[#allocation3 + $0x10] sm:$0xff] %vm1047_vm13, %v1296_v7 }
 0x31b   : > { %3001 = vset.pattern.permute.xlu2 %v4109_v41 }
 0x31c   : > { %1376 = vperm.xlu1 %3000, %v4085_v27  }
 0x323   : > { %1382 = vperm.xlu2 %3001, %v4123_v63  }
 0x324   : > { %1388 = vperm.xlu1 %3000, %v4123_v63   ;;  %v3090_v63 = vpop.eup %3089 }
 0x325   : > { %v1199_v28 = vpop.permute.xlu2 %1198  ;;  %v1664_v20 = vmul.f32 %v3090_v63, %v1662_v12  ;;  %vm1669_vm15 = vweird.f32 %v3090_v63  ;;  %v1455_v12 = vld [vmem:[#allocation2 + $0x8] sm:$0xff] }
 0x326   : > { %v1297_v47 = vmul.f32 %v1279_v5, %v1199_v28  ;;  %vm1670_vm2 = vmor %vm1668_vm1, %vm1669_vm15 }
 0x327   : > { %v1665_v24 = vsub.f32 1.0, %v1664_v20  ;;  %v1479_v20 = vld [vmem:[#allocation2 + $0x18] sm:$0xff] }
 0x328   : > { %1329 = vst.msk [vmem:[#allocation3 + $0x18] sm:$0xff] %vm1047_vm13, %v1297_v47 }
 0x329   : > { %v1666_v31 = vmul.f32 %v3090_v63, %v1665_v24 }
 0x32b   : > { %1394 = vperm.xlu2 %3001, %v4134_v30   ;;  %v1170_v30 = vrot.slane %v4176_v25, 4  ;;  %v1667_v44 = vadd.f32 %v3090_v63, %v1666_v31  ;;  %v1503_v31 = vld [vmem:[#allocation2 + $0x20] sm:$0xff] }
 0x32c   : > { %3003 = vset.pattern.permute.xlu1 %v4109_v41 }
 0x32d   : > { %v1206_v27 = vpop.permute.xlu0 %1205  ;;  %v1282_v35 = vperm.slane %v1170_v30, 0  ;;  %v1671_v49 = vsel %vm1670_vm2, %v3090_v63, %v1667_v44  ;;  %v1478_v63 = vld [vmem:[#allocation2 + $0x10] sm:$0xff] }
 0x32e   : > { %v1298_v16 = vmul.f32 %v1280_v14, %v1206_v27  ;;  %v1180_v17 = vpop.permute.xlu1 %1179 }
 0x32f   : > { %v1294_v18 = vmul.f32 %v1278_v15, %v1180_v17  ;;  %v1484_v24 = vld [vmem:[#allocation3 + $0x18] sm:$0xff] }
 0x330   : > { %1330 = vst.msk [vmem:[#allocation3 + $0x20] sm:$0xff] %vm1047_vm13, %v1298_v16 }
 0x331   : > { %1326 = vst.msk [vmem:[#allocation3] sm:$0xff] %vm1047_vm13, %v1294_v18 }
 0x333   : > { %3004 = vset.pattern.permute.xlu2 %v4129_v4 }
 0x334   : > { %1406 = vperm.xlu1 %3003, %v4145_v54  }
 0x335   : > { %v1219_v21 = vpop.permute.xlu2 %1218 }
 0x336   : > { %v1300_v22 = vmul.f32 %v1281_v9, %v1219_v21  ;;  %v1483_v21 = vld [vmem:[#allocation3 + $0x10] sm:$0xff] }
 0x338   : > { %1332 = vst.msk [vmem:[#allocation3 + $0x30] sm:$0xff] %vm1047_vm13, %v1300_v22  ;;  %v1458_v47 = vld [vmem:[#allocation3] sm:$0xff] }
 0x339   : > { %v1460_v27 = vadd.f32 %v1458_v47, %v1456_v13 }
 0x33b   : > { %1412 = vperm.xlu2 %3004, %v4145_v54   ;;  %v1676_v54 = vsel %vm1673_vm3, %v1675_v50, %v1671_v49  ;;  %v1480_v19 = vmul.f32 %v1478_v63, %v1460_v27  ;;  %v1528_v49 = vld [vmem:[#allocation2 + $0x30] sm:$0xff] }
 0x33c   : > { %1418 = vperm.xlu1 %3003, %v4159_v0   ;;  %v1678_v58 = vmul.f32 %v1676_v54, %v4041_v38 }
 0x33d   : > { %v1277_v34 = vpop.permute.xlu0 %1276  ;;  %v1232_v39 = vpop.permute.xlu2 %1231  ;;  %v1485_v22 = vadd.f32 %v1483_v21, %v1480_v19 }
 0x33e   : > { %v1309_v36 = vmul.f32 %v1285_v32, %v1277_v34  ;;  %v1186_v40 = vpop.permute.xlu1 %1185  ;;  %v1302_v42 = vmul.f32 %v1282_v35, %v1232_v39  ;;  %v1504_v34 = vld [vmem:[#allocation2 + $0x28] sm:$0xff]  ;;  %v1508_v39 = vld [vmem:[#allocation3 + $0x20] sm:$0xff] }
 0x33f   : > { %v1295_v43 = vmul.f32 %v1278_v15, %v1186_v40  ;;  %v1457_v15 = vmul.f32 0.0, %v1455_v12 }
 0x340   : > { %1341 = vst.msk [vmem:[#allocation3 + $0x78] sm:$0xff] %vm1047_vm13, %v1309_v36 }
 0x341   : > { %1334 = vst.msk [vmem:[#allocation3 + $0x40] sm:$0xff] %vm1047_vm13, %v1302_v42 }
 0x342   : > { %1327 = vst.msk [vmem:[#allocation3 + $0x8] sm:$0xff] %vm1047_vm13, %v1295_v43 }
 0x343   : > { %1424 = vperm.xlu2 %3004, %v4159_v0  }
 0x344   : > { %3006 = vset.pattern.permute.xlu1 %v4129_v4 }
 0x345   : > { %v1245_v52 = vpop.permute.xlu2 %1244 }
 0x346   : > { %v1212_v53 = vpop.permute.xlu1 %1211  ;;  %v1304_v55 = vmul.f32 %v1283_v51, %v1245_v52  ;;  %v1529_v52 = vld [vmem:[#allocation2 + $0x38] sm:$0xff] }
 0x347   : > { %v1299_v56 = vmul.f32 %v1280_v14, %v1212_v53 }
 0x348   : > { %1336 = vst.msk [vmem:[#allocation3 + $0x50] sm:$0xff] %vm1047_vm13, %v1304_v55  ;;  %v1558_v29 = vld [vmem:[#allocation3 + $0x40] sm:$0xff] }
 0x349   : > { %1331 = vst.msk [vmem:[#allocation3 + $0x28] sm:$0xff] %vm1047_vm13, %v1299_v56  ;;  %v1459_v14 = vld [vmem:[#allocation3 + $0x8] sm:$0xff] }
 0x34a   : > { %v1461_v18 = vadd.f32 %v1459_v14, %v1457_v15 }
 0x34b   : > { %1680 = vrot.lane.b32.xlu2 %v1678_v58, %s3702_s7 }
 0x34c   : > { %1436 = vperm.xlu1 %3006, %v4103_v37   ;;  %3010 = vset.pattern.permute.xlu2 %v4097_v33 }
 0x34d   : > { %v1371_v59 = vpop.permute.xlu0 %1370  ;;  %v1258_v61 = vpop.permute.xlu2 %1257 }
 0x34e   : > { %1442 = vst.msk [vmem:[#allocation4 + $0x20] sm:$0xff] %vm1047_vm13, %v1371_v59  ;;  %v1306_v62 = vmul.f32 %v1284_v60, %v1258_v61  ;;  %v1225_v0 = vpop.permute.xlu1 %1224  ;;  %v1533_v59 = vld [vmem:[#allocation3 + $0x30] sm:$0xff] }
 0x34f   : > { %v1301_v1 = vmul.f32 %v1281_v9, %v1225_v0  ;;  %v1481_v9 = vmul.f32 %v1479_v20, %v1461_v18 }
 0x350   : > { %1338 = vst.msk [vmem:[#allocation3 + $0x60] sm:$0xff] %vm1047_vm13, %v1306_v62  ;;  %v1509_v40 = vld [vmem:[#allocation3 + $0x28] sm:$0xff] }
 0x351   : > { %1333 = vst.msk [vmem:[#allocation3 + $0x38] sm:$0xff] %vm1047_vm13, %v1301_v1  ;;  %v1486_v26 = vadd.f32 %v1484_v24, %v1481_v9 }
 0x354   : > { %3011 = vset.pattern.permute.xlu1 %v4072_v10 }
 0x355   : > { %v1271_v38 = vpop.permute.xlu2 %1270 }
 0x356   : > { %v1308_v2 = vmul.f32 %v1285_v32, %v1271_v38  ;;  %v1238_v25 = vpop.permute.xlu1 %1237  ;;  %v1505_v32 = vmul.f32 %v1503_v31, %v1485_v22  ;;  %v1513_v31 = vld [vmem:[#allocation4 + $0x20] sm:$0xff] }
 0x357   : > { %v1303_v37 = vmul.f32 %v1282_v35, %v1238_v25  ;;  %v1506_v35 = vmul.f32 %v1504_v34, %v1486_v26  ;;  %v1553_v25 = vld [vmem:[#allocation2 + $0x40] sm:$0xff] }
 0x358   : > { %1340 = vst.msk [vmem:[#allocation3 + $0x70] sm:$0xff] %vm1047_vm13, %v1308_v2  ;;  %v1510_v42 = vadd.f32 %v1508_v39, %v1505_v32  ;;  %v1534_v53 = vld [vmem:[#allocation3 + $0x38] sm:$0xff] }
 0x359   : > { %1335 = vst.msk [vmem:[#allocation3 + $0x48] sm:$0xff] %vm1047_vm13, %v1303_v37  ;;  %v4229_v45 = vadd.f32 %v1509_v40, %v1506_v35 }
 0x35b   : > { %v1531_v56 = vmul.f32 %v1529_v52, %v4229_v45 }
 0x35d   : > { %v1401_v3 = vpop.permute.xlu0 %1400  ;;  %v4236_v61 = vadd.f32 %v1534_v53, %v1531_v56 }
 0x35e   : > { %1447 = vst.msk [vmem:[#allocation4 + $0x48] sm:$0xff] %vm1047_vm13, %v1401_v3  ;;  %v1251_v5 = vpop.permute.xlu1 %1250  ;;  %v1554_v3 = vld [vmem:[#allocation2 + $0x48] sm:$0xff] }
 0x35f   : > { %v1305_v6 = vmul.f32 %v1283_v51, %v1251_v5  ;;  %v1530_v51 = vmul.f32 %v1528_v49, %v1510_v42 }
 0x360   : > { %v1559_v37 = vld [vmem:[#allocation3 + $0x48] sm:$0xff] }
 0x361   : > { %1337 = vst.msk [vmem:[#allocation3 + $0x58] sm:$0xff] %vm1047_vm13, %v1305_v6 }
 0x365   : > { %v1353_v7 = vpop.permute.xlu2 %1352 }
 0x366   : > { %1439 = vst.msk [vmem:[#allocation4 + $0x8] sm:$0xff] %vm1047_vm13, %v1353_v7  ;;  %v1264_v11 = vpop.permute.xlu1 %1263  ;;  %v1556_v7 = vmul.f32 %v1554_v3, %v4236_v61 }
 0x367   : > { %v1307_v28 = vmul.f32 %v1284_v60, %v1264_v11  ;;  %v1535_v60 = vadd.f32 %v1533_v59, %v1530_v51 }
 0x368   : > { %v4242_v13 = vadd.f32 %v1559_v37, %v1556_v7  ;;  %v1584_v7 = vld [vmem:[#allocation3 + $0x58] sm:$0xff] }
 0x369   : > { %1339 = vst.msk [vmem:[#allocation3 + $0x68] sm:$0xff] %vm1047_vm13, %v1307_v28  ;;  %v1555_v6 = vmul.f32 %v1553_v25, %v1535_v60  ;;  %v1564_v28 = vld [vmem:[#allocation4 + $0x48] sm:$0xff] }
 0x36b   : > { %v4244_v15 = vadd.f32 %v1558_v29, %v1555_v6 }
 0x36d   : > { %v1431_v16 = vpop.permute.xlu0 %1430  ;;  %v1365_v17 = vpop.permute.xlu2 %1364  ;;  %v1463_v36 = vld [vmem:[#allocation4 + $0x8] sm:$0xff] }
 0x36e   : > { %1452 = vst.msk [vmem:[#allocation4 + $0x70] sm:$0xff] %vm1047_vm13, %v1431_v16  ;;  %v1465_v43 = vmul.f32 %v1463_v36, %v1461_v18  ;;  %v1566_v16 = vmul.f32 %v1564_v28, %v4242_v13  ;;  %v1515_v36 = vmul.f32 %v1513_v31, %v1510_v42  ;;  %v1583_v28 = vld [vmem:[#allocation3 + $0x50] sm:$0xff]  ;;  %v1608_v31 = vld [vmem:[#allocation3 + $0x60] sm:$0xff] }
 0x36f   : > { %1441 = vst.msk [vmem:[#allocation4 + $0x18] sm:$0xff] %vm1047_vm13, %v1365_v17 }
 0x370   : > { %v1467_v54 = vsel %vm1047_vm13, %v1465_v43, 0.0 }
 0x376   : > { %v1347_v30 = vpop.permute.xlu1 %1346  ;;  %v1489_v57 = vld [vmem:[#allocation4 + $0x18] sm:$0xff] }
 0x377   : > { %1438 = vst.msk [vmem:[#allocation4] sm:$0xff] %vm1047_vm13, %v1347_v30  ;;  %v1491_v0 = vmul.f32 %v1489_v57, %v1486_v26 }
 0x379   : > { %v1493_v47 = vsel %vm1047_vm13, %v1491_v0, 0.0 }
 0x37d   : > { %v1383_v44 = vpop.permute.xlu2 %1382 }
 0x37e   : > { %v1462_v46 = vld [vmem:[#allocation4] sm:$0xff]  ;;  %1444 = vst.msk [vmem:[#allocation4 + $0x30] sm:$0xff] %vm1047_vm13, %v1383_v44  ;;  %v1359_v48 = vpop.permute.xlu1 %1358 }
 0x37f   : > { %v1464_v50 = vmul.f32 %v1462_v46, %v1460_v27  ;;  %1440 = vst.msk [vmem:[#allocation4 + $0x10] sm:$0xff] %vm1047_vm13, %v1359_v48 }
 0x381   : > { %v1466_v55 = vsel %vm1047_vm13, %v1464_v50, 0.0  ;;  %v1517_v50 = vsel %vm1047_vm13, %v1515_v36, 0.0 }
 0x382   : > { %v1468_v58 = vadd.f32 %v1467_v54, %v1466_v55 }
 0x384   : > { %v1469_v62 = vrot.slane %v1468_v58, 4 }
 0x385   : > { %v1395_v1 = vpop.permute.xlu2 %1394  ;;  %v1538_v42 = vld [vmem:[#allocation4 + $0x30] sm:$0xff] }
 0x386   : > { %v1470_v38 = vadd.f32 %v1469_v62, %v1468_v58  ;;  %v1488_v2 = vld [vmem:[#allocation4 + $0x10] sm:$0xff]  ;;  %1446 = vst.msk [vmem:[#allocation4 + $0x40] sm:$0xff] %vm1047_vm13, %v1395_v1  ;;  %v1540_v56 = vmul.f32 %v1538_v42, %v1535_v60 }
 0x387   : > { %v1490_v5 = vmul.f32 %v1488_v2, %v1485_v22  ;;  %v1568_v22 = vsel %vm1047_vm13, %v1566_v16, 0.0 }
 0x388   : > { %v1471_v11 = vrot.slane %v1470_v38, 2  ;;  %v1542_v1 = vsel %vm1047_vm13, %v1540_v56, 0.0 }
 0x389   : > { %v1492_v12 = vsel %vm1047_vm13, %v1490_v5, 0.0 }
 0x38a   : > { %v1472_v14 = vadd.f32 %v1471_v11, %v1470_v38  ;;  %v1494_v27 = vadd.f32 %v1493_v47, %v1492_v12  ;;  %v1579_v11 = vld [vmem:[#allocation2 + $0x58] sm:$0xff]  ;;  %v1578_v47 = vld [vmem:[#allocation2 + $0x50] sm:$0xff] }
 0x38c   : > { %v1473_v17 = vrot.slane %v1472_v14, 1  ;;  %v1495_v18 = vrot.slane %v1494_v27, 4 }
 0x38d   : > { %v1563_v63 = vld [vmem:[#allocation4 + $0x40] sm:$0xff] }
 0x38e   : > { %v1474_v19 = vadd.f32 %v1473_v17, %v1472_v14  ;;  %v1496_v20 = vadd.f32 %v1495_v18, %v1494_v27  ;;  %v1565_v9 = vmul.f32 %v1563_v63, %v4244_v15  ;;  %v1377_v21 = vpop.permute.xlu1 %1376  ;;  %v1580_v27 = vmul.f32 %v1578_v47, %v4244_v15  ;;  %v1603_v15 = vld [vmem:[#allocation2 + $0x60] sm:$0xff] }
 0x38f   : > { %1443 = vst.msk [vmem:[#allocation4 + $0x28] sm:$0xff] %vm1047_vm13, %v1377_v21 }
 0x390   : > { %1476 = vst.msk [vmem:[#allocation5] sm:$0x1] %vm1475_vm4, %v1474_v19  ;;  %v1497_v24 = vrot.slane %v1496_v20, 2  ;;  %v1567_v26 = vsel %vm1047_vm13, %v1565_v9, 0.0  ;;  %v1585_v18 = vadd.f32 %v1583_v28, %v1580_v27  ;;  %v1684_v28 = vld [vmem:[%s4708_s4] sm:$0xff] }
 0x391   : > { %v1569_v30 = vadd.f32 %v1568_v22, %v1567_v26  ;;  %v1609_v22 = vld [vmem:[#allocation3 + $0x68] sm:$0xff] }
 0x392   : > { %v1498_v32 = vadd.f32 %v1497_v24, %v1496_v20 }
 0x393   : > { %v1570_v34 = vrot.slane %v1569_v30, 4 }
 0x394   : > { %v1499_v35 = vrot.slane %v1498_v32, 1 }
 0x395   : > { %v1571_v39 = vadd.f32 %v1570_v34, %v1569_v30  ;;  %v1413_v40 = vpop.permute.xlu2 %1412 }
 0x396   : > { %v1500_v43 = vadd.f32 %v1499_v35, %v1498_v32  ;;  %v1514_v44 = vld [vmem:[#allocation4 + $0x28] sm:$0xff]  ;;  %1449 = vst.msk [vmem:[#allocation4 + $0x58] sm:$0xff] %vm1047_vm13, %v1413_v40  ;;  %v1389_v46 = vpop.permute.xlu1 %1388  ;;  %v1605_v35 = vmul.f32 %v1603_v15, %v1585_v18 }
 0x397   : > { %v1572_v48 = vrot.slane %v1571_v39, 2  ;;  %v1516_v49 = vmul.f32 %v1514_v44, %v4229_v45  ;;  %1445 = vst.msk [vmem:[#allocation4 + $0x38] sm:$0xff] %vm1047_vm13, %v1389_v46 }
 0x398   : > { %1501 = vst.msk [vmem:[#allocation5 + $0x1] sm:$0x1] %vm1475_vm4, %v1500_v43  ;;  %v1610_v40 = vadd.f32 %v1608_v31, %v1605_v35  ;;  %v3137_v35 = vld [vmem:[%s773_s9] sm:$0xff]  ;;  %s4710_s9 = sld [smem:[#allocation60_spill]] }
 0x399   : > { %v1573_v51 = vadd.f32 %v1572_v48, %v1571_v39  ;;  %v1518_v52 = vsel %vm1047_vm13, %v1516_v49, 0.0 }
 0x39a   : > { %v1519_v53 = vadd.f32 %v1518_v52, %v1517_v50  ;;  %v1691_v50 = vld [vmem:[%s4708_s4 + $0x38] sm:$0xff] }
 0x39b   : > { %v1574_v54 = vrot.slane %v1573_v51, 1  ;;  %1703 = vmatpush.msra.mxu2 %v1691_v50  ;;  %v1748_v50 = vld [vmem:[#allocation21 + $0x8] sm:$0xff] }
 0x39c   : > { %v1520_v55 = vrot.slane %v1519_v53, 4 }
 0x39d   : > { %v1575_v57 = vadd.f32 %v1574_v54, %v1573_v51  ;;  %v1425_v58 = vpop.permute.xlu2 %1424  ;;  %v1589_v12 = vld [vmem:[#allocation4 + $0x58] sm:$0xff]  ;;  %v1690_v51 = vld [vmem:[%s4708_s4 + $0x30] sm:$0xff] }
 0x39e   : > { %v1521_v59 = vadd.f32 %v1520_v55, %v1519_v53  ;;  %v1539_v62 = vld [vmem:[#allocation4 + $0x38] sm:$0xff]  ;;  %1451 = vst.msk [vmem:[#allocation4 + $0x68] sm:$0xff] %vm1047_vm13, %v1425_v58  ;;  %v1689_v55 = vld [vmem:[%s4708_s4 + $0x28] sm:$0xff]  ;;  %1704 = vmatpush.msra.mxu2 %v1690_v51  ;;  %v1688_v58 = vld [vmem:[%s4708_s4 + $0x20] sm:$0xff] }
 0x39f   : > { %1576 = vst.msk [vmem:[#allocation5 + $0x4] sm:$0x1] %vm1475_vm4, %v1575_v57  ;;  %v1541_v45 = vmul.f32 %v1539_v62, %v4236_v61  ;;  %v1581_v61 = vmul.f32 %v1579_v11, %v4242_v13  ;;  %v1604_v13 = vld [vmem:[#allocation2 + $0x68] sm:$0xff]  ;;  %v1747_v51 = vld [vmem:[#allocation21] sm:$0xff] }
 0x3a0   : > { %v1522_v0 = vrot.slane %v1521_v59, 2  ;;  %1705 = vmatpush.msra.mxu2 %v1689_v55 }
 0x3a1   : > { %v1543_v38 = vsel %vm1047_vm13, %v1541_v45, 0.0  ;;  %v1586_v16 = vadd.f32 %v1584_v7, %v1581_v61  ;;  %v1685_v7 = vld [vmem:[%s4708_s4 + $0x8] sm:$0xff] }
 0x3a2   : > { %v1523_v2 = vadd.f32 %v1522_v0, %v1521_v59  ;;  %v1544_v25 = vadd.f32 %v1543_v38, %v1542_v1  ;;  %v1687_v0 = vld [vmem:[%s4708_s4 + $0x18] sm:$0xff]  ;;  %v1628_v1 = vld [vmem:[#allocation2 + $0x70] sm:$0xff]  ;;  %1706 = vmatpush.msra.mxu2 %v1688_v58 }
 0x3a3   : > { %v1591_v63 = vmul.f32 %v1589_v12, %v1586_v16  ;;  %v1606_v26 = vmul.f32 %v1604_v13, %v1586_v16  ;;  %v1633_v38 = vld [vmem:[#allocation3 + $0x70] sm:$0xff] }
 0x3a4   : > { %v1524_v37 = vrot.slane %v1523_v2, 1  ;;  %v1545_v3 = vrot.slane %v1544_v25, 4  ;;  %1707 = vmatpush.msra.mxu2 %v1687_v0 }
 0x3a5   : > { %v1593_v24 = vsel %vm1047_vm13, %v1591_v63, 0.0  ;;  %v1614_v32 = vld [vmem:[#allocation4 + $0x68] sm:$0xff]  ;;  %v1611_v36 = vadd.f32 %v1609_v22, %v1606_v26  ;;  %v1681_v31 = vpop.permute.xlu2 %1680 }
 0x3a6   : > { %v1525_v60 = vadd.f32 %v1524_v37, %v1523_v2  ;;  %v1546_v5 = vadd.f32 %v1545_v3, %v1544_v25  ;;  %v1407_v6 = vpop.permute.xlu1 %1406  ;;  %v1629_v25 = vld [vmem:[#allocation2 + $0x78] sm:$0xff]  ;;  %v1686_v37 = vld [vmem:[%s4708_s4 + $0x10] sm:$0xff]  ;;  %v1630_v3 = vmul.f32 %v1628_v1, %v1610_v40  ;;  %s2497_s4 = scalar_lea.sflag [#allocation31], %s3975_s22 }
 0x3a7   : > { %1448 = vst.msk [vmem:[#allocation4 + $0x50] sm:$0xff] %vm1047_vm13, %v1407_v6  ;;  %v1616_v43 = vmul.f32 %v1614_v32, %v1611_v36  ;;  %1708 = vmatpush.msra.mxu2 %v1686_v37  ;;  %v3039_v1 = vld [vmem:[#allocation20] ss:$0 sm:$0xff] }
 0x3a8   : > { %1526 = vst.msk [vmem:[#allocation5 + $0x2] sm:$0x1] %vm1475_vm4, %v1525_v60  ;;  %v1547_v29 = vrot.slane %v1546_v5, 2  ;;  %v1631_v60 = vmul.f32 %v1629_v25, %v1611_v36  ;;  %v1635_v11 = vadd.f32 %v1633_v38, %v1630_v3  ;;  %v1843_v3 = vld [vmem:[%s4709_s2 + $0x38] sm:$0xff] }
 0x3a9   : > { %v1618_v52 = vsel %vm1047_vm13, %v1616_v43, 0.0  ;;  %1709 = vmatpush.msra.mxu2 %v1685_v7  ;;  %1855 = vmatpush.msrb.mxu0 %v1843_v3 }
 0x3aa   : > { %v1548_v14 = vadd.f32 %v1547_v29, %v1546_v5  ;;  %v1638_v5 = vld [vmem:[#allocation4 + $0x70] sm:$0xff]  ;;  %v1634_v29 = vld [vmem:[#allocation3 + $0x78] sm:$0xff] }
 0x3ab   : > { %v1640_v47 = vmul.f32 %v1638_v5, %v1635_v11  ;;  %v1636_v12 = vadd.f32 %v1634_v29, %v1631_v60  ;;  %1710 = vmatpush.msra.mxu2 %v1684_v28  ;;  %v1842_v60 = vld [vmem:[%s4709_s2 + $0x30] sm:$0xff]  ;;  %v1841_v11 = vld [vmem:[%s4709_s2 + $0x28] sm:$0xff] }
 0x3ac   : > { %v1549_v17 = vrot.slane %v1548_v14, 1  ;;  %1856 = vmatpush.msrb.mxu0 %v1842_v60 }
 0x3ae   : > { %v1550_v19 = vadd.f32 %v1549_v17, %v1548_v14  ;;  %v1588_v20 = vld [vmem:[#allocation4 + $0x50] sm:$0xff]  ;;  %v1419_v9 = vpop.permute.xlu1 %1418  ;;  %v1642_v17 = vsel %vm1047_vm13, %v1640_v47, 0.0  ;;  %1857 = vmatpush.msrb.mxu0 %v1841_v11 }
 0x3af   : > { %v1590_v21 = vmul.f32 %v1588_v20, %v1585_v18  ;;  %1450 = vst.msk [vmem:[#allocation4 + $0x60] sm:$0xff] %vm1047_vm13, %v1419_v9 }
 0x3b0   : > { %1551 = vst.msk [vmem:[#allocation5 + $0x3] sm:$0x1] %vm1475_vm4, %v1550_v19 }
 0x3b1   : > { %v1592_v30 = vsel %vm1047_vm13, %v1590_v21, 0.0 }
 0x3b2   : > { %v1594_v34 = vadd.f32 %v1593_v24, %v1592_v30  ;;  %v3037_v24 = vld [vmem:[#allocation17] ss:$0 sm:$0xff] }
 0x3b3   : > { %v1657_v26 = vmul.f32 %v3037_v24, %v4077_v23 }
 0x3b4   : > { %v1595_v39 = vrot.slane %v1594_v34, 4 }
 0x3b6   : > { %v1596_v44 = vadd.f32 %v1595_v39, %v1594_v34  ;;  %v1613_v46 = vld [vmem:[#allocation4 + $0x60] sm:$0xff] }
 0x3b7   : > { %v1615_v48 = vmul.f32 %v1613_v46, %v1610_v40 }
 0x3b8   : > { %v1597_v49 = vrot.slane %v1596_v44, 2 }
 0x3b9   : > { %v1617_v42 = vsel %vm1047_vm13, %v1615_v48, 0.0  ;;  %v1750_v48 = vld [vmem:[#allocation21 + $0x18] sm:$0xff] }
 0x3ba   : > { %v1598_v53 = vadd.f32 %v1597_v49, %v1596_v44  ;;  %v1619_v54 = vadd.f32 %v1618_v52, %v1617_v42  ;;  %v1749_v49 = vld [vmem:[#allocation21 + $0x10] sm:$0xff]  ;;  %1766 = vmatpush.msra.mxu3 %v1750_v48 }
 0x3bc   : > { %v1599_v56 = vrot.slane %v1598_v53, 1  ;;  %v1620_v57 = vrot.slane %v1619_v54, 4  ;;  %1767 = vmatpush.msra.mxu3 %v1749_v49 }
 0x3be   : > { %v1600_v59 = vadd.f32 %v1599_v56, %v1598_v53  ;;  %v1621_v62 = vadd.f32 %v1620_v57, %v1619_v54  ;;  %v1437_v45 = vpop.permute.xlu1 %1436  ;;  %1768 = vmatpush.msra.mxu3 %v1748_v50 }
 0x3bf   : > { %1453 = vst.msk [vmem:[#allocation4 + $0x78] sm:$0xff] %vm1047_vm13, %v1437_v45 }
 0x3c0   : > { %1601 = vst.msk [vmem:[#allocation5 + $0x5] sm:$0x1] %vm1475_vm4, %v1600_v59  ;;  %v1622_v2 = vrot.slane %v1621_v62, 2  ;;  %1769 = vmatpush.msra.mxu3 %v1747_v51 }
 0x3c2   : > { %v1623_v6 = vadd.f32 %v1622_v2, %v1621_v62  ;;  %v3038_v62 = vld [vmem:[#allocation18] ss:$0 sm:$0xff] }
 0x3c4   : > { %v1624_v61 = vrot.slane %v1623_v6, 1 }
 0x3c6   : > { %v1625_v14 = vadd.f32 %v1624_v61, %v1623_v6  ;;  %v1639_v27 = vld [vmem:[#allocation4 + $0x78] sm:$0xff] }
 0x3c7   : > { %v1641_v16 = vmul.f32 %v1639_v27, %v1636_v12  ;;  %v1840_v12 = vld [vmem:[%s4709_s2 + $0x20] sm:$0xff] }
 0x3c8   : > { %1626 = vst.msk [vmem:[#allocation5 + $0x6] sm:$0x1] %vm1475_vm4, %v1625_v14  ;;  %1858 = vmatpush.msrb.mxu0 %v1840_v12 }
 0x3c9   : > { %v1643_v18 = vsel %vm1047_vm13, %v1641_v16, 0.0 }
 0x3ca   : > { %v1644_v63 = vadd.f32 %v1643_v18, %v1642_v17 }
 0x3cc   : > { %v1645_v19 = vrot.slane %v1644_v63, 4 }
 0x3ce   : > { %v1646_v20 = vadd.f32 %v1645_v19, %v1644_v63  ;;  %v1839_v63 = vld [vmem:[%s4709_s2 + $0x18] sm:$0xff] }
 0x3cf   : > { %1859 = vmatpush.msrb.mxu0 %v1839_v63 }
 0x3d0   : > { %v1647_v9 = vrot.slane %v1646_v20, 2 }
 0x3d2   : > { %v1648_v21 = vadd.f32 %v1647_v9, %v1646_v20 }
 0x3d4   : > { %v1649_v22 = vrot.slane %v1648_v21, 1 }
 0x3d6   : > { %v1650_v13 = vadd.f32 %v1649_v22, %v1648_v21  ;;  %v1838_v22 = vld [vmem:[%s4709_s2 + $0x10] sm:$0xff] }
 0x3d7   : > { %1860 = vmatpush.msrb.mxu0 %v1838_v22 }
 0x3d8   : > { %1651 = vst.msk [vmem:[#allocation5 + $0x7] sm:$0x1] %vm1475_vm4, %v1650_v13 }
 0x3df   : > { %v1652_v30 = vld [vmem:[#allocation5] sm:$0xff] }
 0x3e0   : > { %v1658_v15 = vadd.f32 %v1657_v26, %v1652_v30  ;;  %v1837_v30 = vld [vmem:[%s4709_s2 + $0x8] sm:$0xff] }
 0x3e1   : > { %1861 = vmatpush.msrb.mxu0 %v1837_v30 }
 0x3e2   : > { %v1683_v32 = vmul.f32 %v1681_v31, %v1658_v15 }
 0x3e4   : > { %2792 = vmatmul.msk.f32.vlgmr.msra.gmra.mxu2 %vm1047_vm13, %v1683_v32  ;;  %v1836_v32 = vld [vmem:[%s4709_s2] sm:$0xff] }
 0x3e5   : > { %1862 = vmatpush.msrb.mxu0 %v1836_v32 }
 0x467   : > { %v1712_v34 = vpop.f32.mrf.mxu2 }
 0x468   : > { %v1713_v36 = vadd.f32 %v3137_v35, %v1712_v34  ;;  %v3040_v35 = vld [vmem:[#allocation24] ss:$0 sm:$0xff] }
 0x46a   : > { %v1715_v39 = vsel %vm906_vm0, %v1713_v36, 0.0  ;;  %2490 = vst.msk [vmem:[%s4658_s25] sm:$0xff] %vm906_vm0, %v1713_v36  ;;  %s2800_s25 = sshll.u32 %s3842_s5, 3  ;;  %s3578_s5 = scalar_lea.hbm %s4712_s23, 16 }
 0x46b   : > { %1716 = vadd.xlane.f32.xlu1 %v1715_v39  ;;  %s2521_s16 = scalar_lea.hbm %s4712_s23, %s2800_s25 }
 0x46c   : > { %s2525_s2 = sshll.u32 %s2521_s16, 4  ;;  %s2526_s2 = int_to_ptr.hbm [resolvable:$true] %s2525_s2 }
 0x46d   : > { %s3572_s8 = sshra.s32 %s2526_s2, 4  ;;  %s3573_s8 = int_to_ptr.hbm [resolvable:$true] %s3572_s8 }
 0x46e   : > { %p3579_p12 = scmp.lt.s32.totalorder %s3573_s8, %s4712_s23 }
 0x4de   : > { %v1717_v40 = vpop.xlane.xlu1 %1716 }
 0x4df   : > { %v1718_v23 = vmul.f32 %v1717_v40, %v4017_v8 }
 0x4e1   : > { %v1719_v43 = vsub.f32 %v1713_v36, %v1718_v23 }
 0x4e3   : > { %v1720_v44 = vmul.f32 %v1719_v43, %v1719_v43 }
 0x4e5   : > { %v1721_v46 = vsel %vm906_vm0, %v1720_v44, 0.0 }
 0x4e6   : > { %1722 = vadd.xlane.f32.xlu2 %v1721_v46 }
 0x559   : > { %v1723_v52 = vpop.xlane.xlu2 %1722 }
 0x55a   : > { %v1724_v42 = vmul.f32 %v1723_v52, %v4017_v8  ;;  %v1774_v8 = vld [vmem:[#allocation23] sm:$0xf] }
 0x55b   : > { %v1781_v25 = vperm.slane %v1774_v8, 1  ;;  %v1791_v37 = vperm.slane %v1774_v8, 2  ;;  %v1801_v6 = vperm.slane %v1774_v8, 3  ;;  %v1779_v61 = vperm.slane %v1774_v8, 0 }
 0x55c   : > { %v1725_v53 = vadd.f32 1e-05, %v1724_v42 }
 0x55e   : > { %3091 = vrsqrt.f32 %v1725_v53  ;;  %vm1732_vm10 = vweird.f32 %v1725_v53 }
 0x564   : > { %v3092_v54 = vpop.eup %3091 }
 0x565   : > { %v1727_v55 = vmul.f32 %v3092_v54, %v1725_v53  ;;  %vm1733_vm9 = vweird.f32 %v3092_v54 }
 0x566   : > { %vm1734_vm11 = vmor %vm1732_vm10, %vm1733_vm9 }
 0x567   : > { %v1728_v56 = vmul.f32 %v3092_v54, %v1727_v55 }
 0x569   : > { %v1729_v57 = vmul.f32 0.5, %v1728_v56 }
 0x56b   : > { %v1730_v58 = vsub.f32 1.5, %v1729_v57  ;;  %v3041_v57 = vld [vmem:[#allocation26] ss:$0 sm:$0xff] }
 0x56d   : > { %v1731_v59 = vmul.f32 %v3092_v54, %v1730_v58 }
 0x56f   : > { %v1735_v45 = vsel %vm1734_vm11, %v3092_v54, %v1731_v59 }
 0x570   : > { %v1736_v0 = vmul.f32 %v1735_v45, %v1719_v43 }
 0x572   : > { %v1741_v38 = vmul.f32 %v3038_v62, %v1736_v0 }
 0x574   : > { %v1746_v2 = vadd.f32 %v3039_v1, %v1741_v38 }
 0x576   : > { %2793 = vmatmul.msk.f32.vlgmr.msra.gmra.mxu3 %vm906_vm0, %v1746_v2 }
 0x5f9   : > { %v4322_v5 = vpop.f32.mrf.mxu3 }
 0x5fa   : > { %v1776_v7 = vrot.slane %v4322_v5, 5 }
 0x5fc   : > { %v1778_v29 = vsel %vm977_vm5, 0.0, %v1776_v7  ;;  %v1783_v28 = vmul.f32 %v1781_v25, %v1776_v7  ;;  %v1793_v47 = vmul.f32 %v1791_v37, %v1776_v7  ;;  %v1803_v17 = vmul.f32 %v1801_v6, %v1776_v7 }
 0x5fd   : > { %v1782_v14 = vmul.f32 %v1781_v25, %v1778_v29  ;;  %v1792_v27 = vmul.f32 %v1791_v37, %v1778_v29  ;;  %v1802_v16 = vmul.f32 %v1801_v6, %v1778_v29  ;;  %v1780_v21 = vmul.f32 %v1779_v61, %v1778_v29 }
 0x5fe   : > { %v1787_v18 = vrot.slane %v1783_v28, 1  ;;  %v1797_v9 = vrot.slane %v1793_v47, 2  ;;  %v1807_v24 = vrot.slane %v1803_v17, 3 }
 0x5ff   : > { %v1786_v19 = vrot.slane %v1782_v14, 1  ;;  %v1796_v20 = vrot.slane %v1792_v27, 2  ;;  %v1806_v13 = vrot.slane %v1802_v16, 3  ;;  %v1895_v16 = vld [vmem:[%s4710_s9] sm:$0xff] }
 0x601   : > { %v1788_v26 = vsel %vm986_vm6, %v1786_v19, %v1787_v18  ;;  %v1798_v31 = vsel %vm997_vm7, %v1796_v20, %v1797_v9  ;;  %v1808_v36 = vsel %vm1008_vm8, %v1806_v13, %v1807_v24  ;;  %v1896_v18 = vld [vmem:[%s4710_s9 + $0x8] sm:$0xff]  ;;  %s3574_s9 = scalar_lea.hbm %s3573_s8, 8 }
 0x602   : > { %v1790_v15 = vadd.f32 %v1788_v26, %v1780_v21  ;;  %p3575_p1 = scmp.ne.s32.totalorder %s3573_s8, %s3574_s9  ;;  %p3580_p8 = scmp.lt.s32.totalorder %s3578_s5, %s3574_s9 }
 0x604   : > { %v1800_v34 = vadd.f32 %v1798_v31, %v1790_v15  ;;  %p3576_p3 = pnand %p3575_p1, %p3944_p13  ;;  %p3581_p7 = por %p3580_p8, %p3579_p12 }
 0x606   : > { %v1810_v39 = vadd.f32 %v1808_v36, %v1800_v34  ;;  %p3577_p4 = pneg %p3576_p3 }
 0x608   : > { %v1815_v40 = vadd.f32 %v3040_v35, %v1810_v39  ;;  %p3582_p9 = pnand %p3581_p7, %p3577_p4 }
 0x60a   : > { %v2794_v23 = vmul.f32 -1.442695, %v1815_v40 }
 0x60c   : > { %3093 = vpow2.f32 %v2794_v23 }
 0x612   : > { %v3094_v43 = vpop.eup %3093 }
 0x613   : > { %v1819_v44 = vadd.f32 1.0, %v3094_v43 }
 0x615   : > { %3095 = vrcp.f32 %v1819_v44  ;;  %v1831_v50 = vand.u32 2147483648, %v1819_v44  ;;  %v1829_v52 = vand.u32 2147483647, %v1819_v44  ;;  %vm1825_vm6 = vweird.f32 %v1819_v44 }
 0x617   : > { %v1832_v53 = vor.u32 1.1754944e-38, %v1831_v50  ;;  %vm1830_vm8 = vcmp.eq.f32.partialorder %v1829_v52, 8.507059e+37 }
 0x61b   : > { %v3096_v46 = vpop.eup %3095 }
 0x61c   : > { %v1821_v48 = vmul.f32 %v3096_v46, %v1819_v44  ;;  %vm1826_vm5 = vweird.f32 %v3096_v46 }
 0x61d   : > { %vm1827_vm7 = vmor %vm1825_vm6, %vm1826_vm5 }
 0x61e   : > { %v1822_v49 = vsub.f32 1.0, %v1821_v48 }
 0x620   : > { %v1823_v51 = vmul.f32 %v3096_v46, %v1822_v49 }
 0x622   : > { %v1824_v42 = vadd.f32 %v3096_v46, %v1823_v51 }
 0x624   : > { %v1828_v54 = vsel %vm1827_vm7, %v3096_v46, %v1824_v42 }
 0x625   : > { %v1833_v55 = vsel %vm1830_vm8, %v1832_v53, %v1828_v54 }
 0x626   : > { %v4347_v56 = vmul.f32 %v1833_v55, %v1815_v40 }
 0x628   : > { %2795 = vmatmul.msk.f32.vlgmr.msrb.gmra.mxu0 %vm1047_vm13, %v4347_v56 }
 0x6a5   : > { %v4351_v58 = vpop.f32.mrf.mxu0 }
 0x6a6   : > { %v1871_v59 = vadd.f32 %v3041_v57, %v4351_v58  ;;  %v4355_v62 = vperm.slane %v4351_v58, 2  ;;  %v4358_v45 = vperm.slane %v4351_v58, 1  ;;  %v4361_v0 = vperm.slane %v4351_v58, 0 }
 0x6a7   : > { %v4370_v3 = vperm.slane %v4351_v58, 3  ;;  %v4393_v13 = vperm.slane %v4351_v58, 5  ;;  %v4396_v15 = vperm.slane %v4351_v58, 4  ;;  %v4404_v53 = vperm.slane %v4351_v58, 6 }
 0x6a8   : > { %v1873_v1 = vand.u32 2147483647, %v1871_v59  ;;  %2001 = vperm.xlu1 %3011, %v4355_v62   ;;  %1994 = vperm.xlu2 %3010, %v4358_v45   ;;  %v1872_v61 = vmax.f32 %v1871_v59, 0.0 }
 0x6a9   : > { %1975 = vperm.xlu0 %3007, %v4361_v0  }
 0x6aa   : > { %v1874_v38 = vsub.f32 0.0, %v1873_v1 }
 0x6ac   : > { %v1875_v2 = vmul.f32 1.442695, %v1874_v38 }
 0x6ae   : > { %3097 = vpow2.f32 %v1875_v2 }
 0x6b0   : > { %3014 = vset.pattern.permute.xlu1 %v4097_v33  ;;  %3013 = vset.pattern.permute.xlu2 %v4072_v10 }
 0x6b1   : > { %3008 = vset.pattern.permute.xlu0 %v4097_v33 }
 0x6b4   : > { %v3098_v8 = vpop.eup %3097 }
 0x6b5   : > { %v1877_v25 = vadd.f32 1.0, %v3098_v8  ;;  %v1880_v37 = vmul.f32 -0.5, %v3098_v8  ;;  %v1883_v6 = vand.u32 2147483647, %v3098_v8 }
 0x6b7   : > { %3099 = vlog2.f32 %v1877_v25  ;;  %v1881_v60 = vadd.f32 1.0, %v1880_v37  ;;  %vm1884_vm12 = vcmp.lt.f32.partialorder %v1883_v6, 0.0004427343 }
 0x6b8   : > { %2020 = vperm.xlu1 %3014, %v4370_v3   ;;  %2014 = vperm.xlu2 %3013, %v4370_v3  }
 0x6b9   : > { %1981 = vperm.xlu0 %3008, %v4361_v0   ;;  %v1882_v29 = vmul.f32 %v3098_v8, %v1881_v60 }
 0x6bd   : > { %v3100_v7 = vpop.eup %3099 }
 0x6be   : > { %v1879_v11 = vmul.f32 0.6931472, %v3100_v7 }
 0x6c0   : > { %v1885_v28 = vsel %vm1884_vm12, %v1882_v29, %v1879_v11  ;;  %3017 = vset.pattern.permute.xlu1 %v4072_v10  ;;  %3016 = vset.pattern.permute.xlu2 %v4097_v33 }
 0x6c1   : > { %v4377_v47 = vadd.f32 %v1885_v28, %v1872_v61  ;;  %3009 = vset.pattern.permute.xlu0 %v4072_v10 }
 0x6c3   : > { %v1888_v12 = vrot.slane %v4377_v47, 1  ;;  %v1889_v14 = vrot.slane %v4377_v47, 2  ;;  %v1890_v27 = vrot.slane %v4377_v47, 3  ;;  %v1891_v17 = vrot.slane %v4377_v47, 4 }
 0x6c4   : > { %v1897_v63 = vperm.slane %v4377_v47, 0  ;;  %v1892_v9 = vrot.slane %v4377_v47, 5  ;;  %v1893_v31 = vrot.slane %v4377_v47, 6  ;;  %v1894_v36 = vrot.slane %v4377_v47, 7 }
 0x6c5   : > { %v1898_v19 = vperm.slane %v1888_v12, 0  ;;  %v1899_v20 = vperm.slane %v1889_v14, 0  ;;  %v1900_v21 = vperm.slane %v1890_v27, 0  ;;  %v1901_v32 = vperm.slane %v1891_v17, 0 }
 0x6c6   : > { %v1913_v22 = vmul.f32 %v1897_v63, %v1895_v16  ;;  %v1914_v24 = vmul.f32 %v1897_v63, %v1896_v18  ;;  %v1902_v39 = vperm.slane %v1892_v9, 0  ;;  %v1903_v49 = vperm.slane %v1893_v31, 0 }
 0x6c7   : > { %v1915_v26 = vmul.f32 %v1898_v19, %v1895_v16  ;;  %v1916_v30 = vmul.f32 %v1898_v19, %v1896_v18  ;;  %v1917_v34 = vmul.f32 %v1899_v20, %v1895_v16  ;;  %v1918_v35 = vmul.f32 %v1899_v20, %v1896_v18 }
 0x6c8   : > { %2040 = vperm.xlu1 %3017, %v4393_v13   ;;  %2033 = vperm.xlu2 %3016, %v4396_v15   ;;  %v1919_v40 = vmul.f32 %v1900_v21, %v1895_v16  ;;  %v1929_v23 = vmul.f32 1.442695, %v1913_v22  ;;  %v1920_v43 = vmul.f32 %v1900_v21, %v1896_v18  ;;  %v1931_v44 = vmul.f32 1.442695, %v1914_v24 }
 0x6c9   : > { %1988 = vperm.xlu0 %3009, %v4358_v45   ;;  %v1933_v46 = vmul.f32 1.442695, %v1915_v26  ;;  %v1935_v48 = vmul.f32 1.442695, %v1916_v30  ;;  %v1921_v50 = vmul.f32 %v1901_v32, %v1895_v16  ;;  %v1937_v51 = vmul.f32 1.442695, %v1917_v34 }
 0x6ca   : > { %3101 = vpow2.f32 %v1929_v23  ;;  %v1922_v52 = vmul.f32 %v1901_v32, %v1896_v18  ;;  %v1939_v42 = vmul.f32 1.442695, %v1918_v35  ;;  %v1904_v54 = vperm.slane %v1894_v36, 0 }
 0x6cb   : > { %3103 = vpow2.f32 %v1931_v44  ;;  %v1923_v55 = vmul.f32 %v1902_v39, %v1895_v16  ;;  %v1941_v57 = vmul.f32 1.442695, %v1919_v40  ;;  %v1924_v59 = vmul.f32 %v1902_v39, %v1896_v18 }
 0x6cc   : > { %3105 = vpow2.f32 %v1933_v46  ;;  %v1943_v1 = vmul.f32 1.442695, %v1920_v43  ;;  %v1925_v38 = vmul.f32 %v1903_v49, %v1895_v16  ;;  %v1945_v2 = vmul.f32 1.442695, %v1921_v50 }
 0x6cd   : > { %3107 = vpow2.f32 %v1935_v48  ;;  %v1926_v8 = vmul.f32 %v1903_v49, %v1896_v18  ;;  %v1947_v25 = vmul.f32 1.442695, %v1922_v52  ;;  %v1927_v60 = vmul.f32 %v1904_v54, %v1895_v16 }
 0x6ce   : > { %3109 = vpow2.f32 %v1937_v51  ;;  %v1949_v6 = vmul.f32 1.442695, %v1923_v55  ;;  %v1928_v11 = vmul.f32 %v1904_v54, %v1896_v18  ;;  %v1951_v29 = vmul.f32 1.442695, %v1924_v59 }
 0x6cf   : > { %3111 = vpow2.f32 %v1939_v42  ;;  %v1953_v28 = vmul.f32 1.442695, %v1925_v38  ;;  %v1955_v14 = vmul.f32 1.442695, %v1926_v8  ;;  %v1957_v16 = vmul.f32 1.442695, %v1927_v60 }
 0x6d0   : > { %2053 = vperm.xlu1 %3017, %v4404_v53   ;;  %2046 = vperm.xlu2 %3016, %v4393_v13   ;;  %v3102_v37 = vpop.eup %3101  ;;  %3113 = vpow2.f32 %v1941_v57  ;;  %v1959_v18 = vmul.f32 1.442695, %v1928_v11  ;;  %v4425_v26 = vperm.slane %v4351_v58, 7  ;;  %v4444_v58 = vmul.f32 %v4377_v47, %v4347_v56 }
 0x6d1   : > { %3012 = vset.pattern.permute.xlu0 %v4097_v33  ;;  %v3104_v7 = vpop.eup %3103  ;;  %3115 = vpow2.f32 %v1943_v1  ;;  %2106 = vst.msk [vmem:[#allocation2] sm:$0xff] %vm1047_vm13, %v3102_v37  ;;  %v2796_v47 = vmul.f32 -1.442695, %v4322_v5 }
 0x6d2   : > { %v3106_v61 = vpop.eup %3105  ;;  %3117 = vpow2.f32 %v1945_v2  ;;  %2107 = vst.msk [vmem:[#allocation2 + $0x8] sm:$0xff] %vm1047_vm13, %v3104_v7  ;;  %v1965_v35 = vrot.slane %v4444_v58, 3  ;;  %v2074_v46 = vperm.slane %v4444_v58, 0  ;;  %v1966_v52 = vrot.slane %v4444_v58, 4 }
 0x6d3   : > { %v3108_v12 = vpop.eup %3107  ;;  %3119 = vpow2.f32 %v1947_v25  ;;  %2108 = vst.msk [vmem:[#allocation2 + $0x10] sm:$0xff] %vm1047_vm13, %v3106_v61  ;;  %v1967_v57 = vrot.slane %v4444_v58, 5 }
 0x6d4   : > { %v3110_v27 = vpop.eup %3109  ;;  %3121 = vpow2.f32 %v1949_v6  ;;  %2109 = vst.msk [vmem:[#allocation2 + $0x18] sm:$0xff] %vm1047_vm13, %v3108_v12  ;;  %v2077_v39 = vperm.slane %v1965_v35, 0 }
 0x6d5   : > { %v3112_v17 = vpop.eup %3111  ;;  %3123 = vpow2.f32 %v1951_v29  ;;  %2110 = vst.msk [vmem:[#allocation2 + $0x20] sm:$0xff] %vm1047_vm13, %v3110_v27  ;;  %v2079_v1 = vperm.slane %v1967_v57, 0 }
 0x6d6   : > { %v3114_v63 = vpop.eup %3113  ;;  %3125 = vpow2.f32 %v1953_v28  ;;  %2111 = vst.msk [vmem:[#allocation2 + $0x28] sm:$0xff] %vm1047_vm13, %v3112_v17  ;;  %v1969_v28 = vrot.slane %v4444_v58, 7 }
 0x6d7   : > { %v3116_v19 = vpop.eup %3115  ;;  %3127 = vpow2.f32 %v1955_v14  ;;  %2112 = vst.msk [vmem:[#allocation2 + $0x30] sm:$0xff] %vm1047_vm13, %v3114_v63 }
 0x6d8   : > { %3020 = vset.pattern.permute.xlu1 %v4097_v33  ;;  %3019 = vset.pattern.permute.xlu2 %v4072_v10  ;;  %v3118_v20 = vpop.eup %3117  ;;  %3129 = vpow2.f32 %v1957_v16  ;;  %2113 = vst.msk [vmem:[#allocation2 + $0x38] sm:$0xff] %vm1047_vm13, %v3116_v19  ;;  %v2081_v14 = vperm.slane %v1969_v28, 0 }
 0x6d9   : > { %2007 = vperm.xlu0 %3012, %v4355_v62   ;;  %v3120_v9 = vpop.eup %3119  ;;  %3131 = vpow2.f32 %v1959_v18  ;;  %2114 = vst.msk [vmem:[#allocation2 + $0x40] sm:$0xff] %vm1047_vm13, %v3118_v20 }
 0x6da   : > { %v3122_v21 = vpop.eup %3121  ;;  %2115 = vst.msk [vmem:[#allocation2 + $0x48] sm:$0xff] %vm1047_vm13, %v3120_v9  ;;  %3133 = vpow2.f32 %v2796_v47 }
 0x6db   : > { %v3124_v22 = vpop.eup %3123  ;;  %2116 = vst.msk [vmem:[#allocation2 + $0x50] sm:$0xff] %vm1047_vm13, %v3122_v21 }
 0x6dc   : > { %v3126_v24 = vpop.eup %3125  ;;  %2117 = vst.msk [vmem:[#allocation2 + $0x58] sm:$0xff] %vm1047_vm13, %v3124_v22 }
 0x6dd   : > { %v3128_v30 = vpop.eup %3127  ;;  %2118 = vst.msk [vmem:[#allocation2 + $0x60] sm:$0xff] %vm1047_vm13, %v3126_v24 }
 0x6de   : > { %v3130_v31 = vpop.eup %3129  ;;  %2119 = vst.msk [vmem:[#allocation2 + $0x68] sm:$0xff] %vm1047_vm13, %v3128_v30 }
 0x6df   : > { %v3132_v32 = vpop.eup %3131  ;;  %2120 = vst.msk [vmem:[#allocation2 + $0x70] sm:$0xff] %vm1047_vm13, %v3130_v31 }
 0x6e0   : > { %2072 = vperm.xlu1 %3020, %v4425_v26   ;;  %2066 = vperm.xlu2 %3019, %v4425_v26   ;;  %2121 = vst.msk [vmem:[#allocation2 + $0x78] sm:$0xff] %vm1047_vm13, %v3132_v32  ;;  %v3134_v36 = vpop.eup %3133  ;;  %v2250_v32 = vld [vmem:[#allocation2] sm:$0xff] }
 0x6e1   : > { %3015 = vset.pattern.permute.xlu0 %v4072_v10  ;;  %v1963_v10 = vrot.slane %v4444_v58, 1  ;;  %v2436_v23 = vadd.f32 1.0, %v3134_v36 }
 0x6e3   : > { %v4450_v34 = vperm.slane %v1963_v10, 0  ;;  %3135 = vrcp.f32 %v2436_v23  ;;  %v2448_v6 = vand.u32 2147483648, %v2436_v23  ;;  %vm2442_vm15 = vweird.f32 %v2436_v23 }
 0x6e4   : > { %v2446_v7 = vand.u32 2147483647, %v2436_v23 }
 0x6e5   : > { %v2449_v11 = vor.u32 1.1754944e-38, %v2448_v6 }
 0x6e6   : > { %vm2447_vm2 = vcmp.eq.f32.partialorder %v2446_v7, 8.507059e+37 }
 0x6e8   : > { %3022 = vset.pattern.permute.xlu1 %v4129_v4  ;;  %3021 = vset.pattern.permute.xlu2 %v4109_v41 }
 0x6e9   : > { %2027 = vperm.xlu0 %3015, %v4396_v15   ;;  %v3136_v51 = vpop.eup %3135 }
 0x6ea   : > { %v2438_v42 = vmul.f32 %v3136_v51, %v2436_v23  ;;  %vm2443_vm14 = vweird.f32 %v3136_v51 }
 0x6eb   : > { %vm2444_vm1 = vmor %vm2442_vm15, %vm2443_vm14 }
 0x6ec   : > { %v2439_v54 = vsub.f32 1.0, %v2438_v42 }
 0x6ee   : > { %v2440_v59 = vmul.f32 %v3136_v51, %v2439_v54 }
 0x6f0   : > { %2148 = vperm.xlu1 %3022, %v4361_v0   ;;  %2142 = vperm.xlu2 %3021, %v4361_v0   ;;  %v2441_v25 = vadd.f32 %v3136_v51, %v2440_v59 }
 0x6f1   : > { %3018 = vset.pattern.permute.xlu0 %v4097_v33 }
 0x6f8   : > { %3025 = vset.pattern.permute.xlu1 %v4109_v41  ;;  %3024 = vset.pattern.permute.xlu2 %v4129_v4 }
 0x6f9   : > { %2059 = vperm.xlu0 %3018, %v4404_v53  }
 0x700   : > { %2166 = vperm.xlu1 %3025, %v4355_v62   ;;  %2160 = vperm.xlu2 %3024, %v4358_v45  }
 0x701   : > { %3023 = vset.pattern.permute.xlu0 %v4109_v41 }
 0x702   : > { %v1995_v33 = vpop.permute.xlu2 %1994 }
 0x703   : > { %v2093_v0 = vmul.f32 %v4450_v34, %v1995_v33  ;;  %v2251_v33 = vld [vmem:[#allocation2 + $0x8] sm:$0xff] }
 0x705   : > { %2125 = vst.msk [vmem:[#allocation3 + $0x18] sm:$0xff] %vm1047_vm13, %v2093_v0  ;;  %v2252_v0 = vmul.f32 0.0, %v2250_v32 }
 0x708   : > { %2178 = vperm.xlu1 %3025, %v4370_v3   ;;  %2172 = vperm.xlu2 %3024, %v4355_v62   ;;  %v1964_v62 = vrot.slane %v4444_v58, 2 }
 0x709   : > { %2154 = vperm.xlu0 %3023, %v4358_v45  }
 0x70a   : > { %v4467_v45 = vperm.slane %v1964_v62, 0 }
 0x710   : > { %3028 = vset.pattern.permute.xlu1 %v4129_v4  ;;  %3027 = vset.pattern.permute.xlu2 %v4109_v41 }
 0x711   : > { %3026 = vset.pattern.permute.xlu0 %v4129_v4 }
 0x712   : > { %v2015_v40 = vpop.permute.xlu2 %2014 }
 0x713   : > { %v2096_v43 = vmul.f32 %v2077_v39, %v2015_v40 }
 0x715   : > { %2128 = vst.msk [vmem:[#allocation3 + $0x30] sm:$0xff] %vm1047_vm13, %v2096_v43 }
 0x718   : > { %2196 = vperm.xlu1 %3028, %v4396_v15   ;;  %2190 = vperm.xlu2 %3027, %v4396_v15  }
 0x719   : > { %2184 = vperm.xlu0 %3026, %v4370_v3   ;;  %v4478_v3 = vperm.slane %v1966_v52, 0  ;;  %v2272_v52 = vld [vmem:[#allocation2 + $0x10] sm:$0xff] }
 0x71a   : > { %v2002_v44 = vpop.permute.xlu1 %2001 }
 0x71b   : > { %v2094_v48 = vmul.f32 %v4467_v45, %v2002_v44  ;;  %v1976_v49 = vpop.permute.xlu0 %1975 }
 0x71c   : > { %v2090_v50 = vmul.f32 %v2074_v46, %v1976_v49 }
 0x71d   : > { %2126 = vst.msk [vmem:[#allocation3 + $0x20] sm:$0xff] %vm1047_vm13, %v2094_v48 }
 0x71e   : > { %2122 = vst.msk [vmem:[#allocation3] sm:$0xff] %vm1047_vm13, %v2090_v50 }
 0x720   : > { %2208 = vperm.xlu1 %3028, %v4393_v13   ;;  %2202 = vperm.xlu2 %3027, %v4393_v13  }
 0x721   : > { %3029 = vset.pattern.permute.xlu0 %v4109_v41 }
 0x722   : > { %v2034_v15 = vpop.permute.xlu2 %2033 }
 0x723   : > { %v2099_v55 = vmul.f32 %v4478_v3, %v2034_v15  ;;  %v2277_v15 = vld [vmem:[#allocation3 + $0x18] sm:$0xff] }
 0x725   : > { %2131 = vst.msk [vmem:[#allocation3 + $0x48] sm:$0xff] %vm1047_vm13, %v2099_v55 }
 0x728   : > { %3031 = vset.pattern.permute.xlu1 %v4109_v41  ;;  %3030 = vset.pattern.permute.xlu2 %v4129_v4  ;;  %v2445_v41 = vsel %vm2444_vm1, %v3136_v51, %v2441_v25  ;;  %v2294_v25 = vld [vmem:[#allocation2 + $0x20] sm:$0xff] }
 0x729   : > { %2214 = vperm.xlu0 %3029, %v4404_v53   ;;  %v2450_v29 = vsel %vm2447_vm2, %v2449_v11, %v2445_v41 }
 0x72a   : > { %v2021_v13 = vpop.permute.xlu1 %2020  ;;  %v2047_v2 = vpop.permute.xlu2 %2046  ;;  %v2452_v61 = vmul.f32 %v2450_v29, %v4322_v5  ;;  %v2298_v29 = vld [vmem:[#allocation3 + $0x20] sm:$0xff] }
 0x72b   : > { %v2097_v38 = vmul.f32 %v2077_v39, %v2021_v13  ;;  %v1982_v8 = vpop.permute.xlu0 %1981  ;;  %v2101_v37 = vmul.f32 %v2079_v1, %v2047_v2  ;;  %v2253_v39 = vmul.f32 0.0, %v2251_v33  ;;  %v2295_v2 = vld [vmem:[#allocation2 + $0x28] sm:$0xff] }
 0x72c   : > { %v2091_v60 = vmul.f32 %v2074_v46, %v1982_v8 }
 0x72d   : > { %2129 = vst.msk [vmem:[#allocation3 + $0x38] sm:$0xff] %vm1047_vm13, %v2097_v38 }
 0x72e   : > { %2133 = vst.msk [vmem:[#allocation3 + $0x58] sm:$0xff] %vm1047_vm13, %v2101_v37 }
 0x72f   : > { %2123 = vst.msk [vmem:[#allocation3 + $0x8] sm:$0xff] %vm1047_vm13, %v2091_v60 }
 0x730   : > { %2226 = vperm.xlu1 %3031, %v4425_v26   ;;  %2220 = vperm.xlu2 %3030, %v4404_v53  }
 0x731   : > { %3032 = vset.pattern.permute.xlu0 %v4129_v4  ;;  %v1968_v4 = vrot.slane %v4444_v58, 6 }
 0x733   : > { %v2080_v5 = vperm.slane %v1968_v4, 0 }
 0x736   : > { %v2255_v47 = vld [vmem:[#allocation3 + $0x8] sm:$0xff] }
 0x737   : > { %v2257_v23 = vadd.f32 %v2255_v47, %v2253_v39 }
 0x738   : > { %2454 = vrot.lane.b32.xlu1 %v2452_v61, %s3702_s7  ;;  %2232 = vperm.xlu2 %3030, %v4425_v26  }
 0x73a   : > { %v2041_v12 = vpop.permute.xlu1 %2040  ;;  %v2067_v16 = vpop.permute.xlu2 %2066 }
 0x73b   : > { %v2100_v27 = vmul.f32 %v2079_v1, %v2041_v12  ;;  %v2104_v17 = vmul.f32 %v2081_v14, %v2067_v16  ;;  %v1989_v18 = vpop.permute.xlu0 %1988 }
 0x73c   : > { %v2092_v53 = vmul.f32 %v4450_v34, %v1989_v18  ;;  %v2254_v34 = vld [vmem:[#allocation3] sm:$0xff] }
 0x73d   : > { %2132 = vst.msk [vmem:[#allocation3 + $0x50] sm:$0xff] %vm1047_vm13, %v2100_v27  ;;  %v2256_v36 = vadd.f32 %v2254_v34, %v2252_v0  ;;  %v2320_v34 = vld [vmem:[#allocation3 + $0x30] sm:$0xff] }
 0x73e   : > { %2136 = vst.msk [vmem:[#allocation3 + $0x70] sm:$0xff] %vm1047_vm13, %v2104_v17 }
 0x73f   : > { %2124 = vst.msk [vmem:[#allocation3 + $0x10] sm:$0xff] %vm1047_vm13, %v2092_v53 }
 0x742   : > { %v2054_v63 = vpop.permute.xlu1 %2053 }
 0x743   : > { %v2102_v19 = vmul.f32 %v2080_v5, %v2054_v63 }
 0x745   : > { %2134 = vst.msk [vmem:[#allocation3 + $0x60] sm:$0xff] %vm1047_vm13, %v2102_v19 }
 0x746   : > { %v2276_v51 = vld [vmem:[#allocation3 + $0x10] sm:$0xff] }
 0x74a   : > { %v2143_v20 = vpop.permute.xlu2 %2142 }
 0x74b   : > { %2234 = vst.msk [vmem:[#allocation4] sm:$0xff] %vm1047_vm13, %v2143_v20  ;;  %v2008_v9 = vpop.permute.xlu0 %2007 }
 0x74c   : > { %v2095_v21 = vmul.f32 %v4467_v45, %v2008_v9  ;;  %v2273_v45 = vld [vmem:[#allocation2 + $0x18] sm:$0xff] }
 0x74d   : > { %v2275_v48 = vmul.f32 %v2273_v45, %v2257_v23  ;;  %v2317_v9 = vld [vmem:[#allocation2 + $0x38] sm:$0xff] }
 0x74e   : > { %2127 = vst.msk [vmem:[#allocation3 + $0x28] sm:$0xff] %vm1047_vm13, %v2095_v21 }
 0x74f   : > { %v2279_v55 = vadd.f32 %v2277_v15, %v2275_v48  ;;  %v2343_v15 = vld [vmem:[#allocation3 + $0x48] sm:$0xff] }
 0x751   : > { %v2297_v37 = vmul.f32 %v2295_v2, %v2279_v55 }
 0x752   : > { %v2073_v22 = vpop.permute.xlu1 %2072  ;;  %v2258_v35 = vld [vmem:[#allocation4] sm:$0xff] }
 0x753   : > { %v2105_v24 = vmul.f32 %v2081_v14, %v2073_v22  ;;  %v2260_v40 = vmul.f32 %v2258_v35, %v2256_v36 }
 0x755   : > { %2137 = vst.msk [vmem:[#allocation3 + $0x78] sm:$0xff] %vm1047_vm13, %v2105_v24  ;;  %v2262_v46 = vsel %vm1047_vm13, %v2260_v40, 0.0  ;;  %v2299_v8 = vld [vmem:[#allocation3 + $0x28] sm:$0xff] }
 0x756   : > { %v2301_v41 = vadd.f32 %v2299_v8, %v2297_v37  ;;  %v2361_v37 = vld [vmem:[#allocation2 + $0x58] sm:$0xff] }
 0x758   : > { %v2319_v22 = vmul.f32 %v2317_v9, %v2301_v41 }
 0x75a   : > { %v2161_v26 = vpop.permute.xlu2 %2160 }
 0x75b   : > { %2237 = vst.msk [vmem:[#allocation4 + $0x18] sm:$0xff] %vm1047_vm13, %v2161_v26  ;;  %v2028_v30 = vpop.permute.xlu0 %2027  ;;  %v2316_v26 = vld [vmem:[#allocation2 + $0x30] sm:$0xff] }
 0x75c   : > { %v2098_v31 = vmul.f32 %v4478_v3, %v2028_v30  ;;  %v2274_v3 = vmul.f32 %v2272_v52, %v2256_v36 }
 0x75e   : > { %2130 = vst.msk [vmem:[#allocation3 + $0x40] sm:$0xff] %vm1047_vm13, %v2098_v31  ;;  %v2278_v57 = vadd.f32 %v2276_v51, %v2274_v3 }
 0x760   : > { %v2296_v60 = vmul.f32 %v2294_v25, %v2278_v57 }
 0x762   : > { %v2149_v58 = vpop.permute.xlu1 %2148  ;;  %v2173_v10 = vpop.permute.xlu2 %2172  ;;  %v2300_v28 = vadd.f32 %v2298_v29, %v2296_v60  ;;  %v2281_v19 = vld [vmem:[#allocation4 + $0x18] sm:$0xff] }
 0x763   : > { %2235 = vst.msk [vmem:[#allocation4 + $0x8] sm:$0xff] %vm1047_vm13, %v2149_v58  ;;  %v2283_v21 = vmul.f32 %v2281_v19, %v2279_v55 }
 0x764   : > { %2239 = vst.msk [vmem:[#allocation4 + $0x28] sm:$0xff] %vm1047_vm13, %v2173_v10  ;;  %v2318_v30 = vmul.f32 %v2316_v26, %v2300_v28  ;;  %v2321_v10 = vld [vmem:[#allocation3 + $0x38] sm:$0xff] }
 0x765   : > { %v2285_v33 = vsel %vm1047_vm13, %v2283_v21, 0.0  ;;  %v2323_v35 = vadd.f32 %v2321_v10, %v2319_v22  ;;  %v2383_v21 = vld [vmem:[#allocation2 + $0x68] sm:$0xff] }
 0x766   : > { %v2322_v36 = vadd.f32 %v2320_v34, %v2318_v30 }
 0x76a   : > { %v2259_v43 = vld [vmem:[#allocation4 + $0x8] sm:$0xff] }
 0x76b   : > { %v2261_v62 = vmul.f32 %v2259_v43, %v2257_v23  ;;  %v2060_v44 = vpop.permute.xlu0 %2059  ;;  %v2303_v7 = vld [vmem:[#allocation4 + $0x28] sm:$0xff] }
 0x76c   : > { %v2103_v50 = vmul.f32 %v2080_v5, %v2060_v44  ;;  %v2305_v61 = vmul.f32 %v2303_v7, %v2301_v41  ;;  %v2338_v44 = vld [vmem:[#allocation2 + $0x40] sm:$0xff] }
 0x76d   : > { %v2263_v49 = vsel %vm1047_vm13, %v2261_v62, 0.0  ;;  %v2339_v62 = vld [vmem:[#allocation2 + $0x48] sm:$0xff] }
 0x76e   : > { %v2264_v42 = vadd.f32 %v2263_v49, %v2262_v46  ;;  %2135 = vst.msk [vmem:[#allocation3 + $0x68] sm:$0xff] %vm1047_vm13, %v2103_v50  ;;  %v2307_v53 = vsel %vm1047_vm13, %v2305_v61, 0.0  ;;  %v2342_v46 = vld [vmem:[#allocation3 + $0x40] sm:$0xff]  ;;  %v2341_v48 = vmul.f32 %v2339_v62, %v2323_v35  ;;  %v2340_v50 = vmul.f32 %v2338_v44, %v2322_v36 }
 0x76f   : > { %v2386_v62 = vld [vmem:[#allocation3 + $0x60] sm:$0xff] }
 0x770   : > { %v2265_v54 = vrot.slane %v2264_v42, 4 }
 0x772   : > { %v2266_v59 = vadd.f32 %v2265_v54, %v2264_v42  ;;  %v2167_v13 = vpop.permute.xlu1 %2166  ;;  %v2191_v1 = vpop.permute.xlu2 %2190  ;;  %v2344_v42 = vadd.f32 %v2342_v46, %v2340_v50  ;;  %v2345_v54 = vadd.f32 %v2343_v15, %v2341_v48 }
 0x773   : > { %2238 = vst.msk [vmem:[#allocation4 + $0x20] sm:$0xff] %vm1047_vm13, %v2167_v13  ;;  %v2360_v13 = vld [vmem:[#allocation2 + $0x50] sm:$0xff] }
 0x774   : > { %v2267_v38 = vrot.slane %v2266_v59, 2  ;;  %2242 = vst.msk [vmem:[#allocation4 + $0x40] sm:$0xff] %vm1047_vm13, %v2191_v1  ;;  %v2362_v2 = vmul.f32 %v2360_v13, %v2344_v42  ;;  %v2363_v7 = vmul.f32 %v2361_v37, %v2345_v54 }
 0x776   : > { %v2268_v6 = vadd.f32 %v2267_v38, %v2266_v59 }
 0x778   : > { %v2269_v11 = vrot.slane %v2268_v6, 1 }
 0x77a   : > { %v2270_v12 = vadd.f32 %v2269_v11, %v2268_v6  ;;  %v2302_v14 = vld [vmem:[#allocation4 + $0x20] sm:$0xff]  ;;  %v2179_v27 = vpop.permute.xlu1 %2178  ;;  %v2203_v17 = vpop.permute.xlu2 %2202 }
 0x77b   : > { %v2304_v16 = vmul.f32 %v2302_v14, %v2300_v28  ;;  %2240 = vst.msk [vmem:[#allocation4 + $0x30] sm:$0xff] %vm1047_vm13, %v2179_v27  ;;  %v2155_v18 = vpop.permute.xlu0 %2154  ;;  %v2346_v52 = vld [vmem:[#allocation4 + $0x40] sm:$0xff]  ;;  %v2364_v28 = vld [vmem:[#allocation3 + $0x50] sm:$0xff] }
 0x77c   : > { %2271 = vst.msk [vmem:[#allocation5] sm:$0x1] %vm1475_vm4, %v2270_v12  ;;  %v2348_v55 = vmul.f32 %v2346_v52, %v2344_v42 }
 0x77d   : > { %v2306_v4 = vsel %vm1047_vm13, %v2304_v16, 0.0  ;;  %2244 = vst.msk [vmem:[#allocation4 + $0x50] sm:$0xff] %vm1047_vm13, %v2203_v17  ;;  %v2365_v16 = vld [vmem:[#allocation3 + $0x58] sm:$0xff]  ;;  %v2366_v17 = vadd.f32 %v2364_v28, %v2362_v2 }
 0x77e   : > { %v2308_v5 = vadd.f32 %v2307_v53, %v2306_v4  ;;  %2236 = vst.msk [vmem:[#allocation4 + $0x10] sm:$0xff] %vm1047_vm13, %v2155_v18  ;;  %v2350_v41 = vsel %vm1047_vm13, %v2348_v55, 0.0  ;;  %v2367_v4 = vadd.f32 %v2365_v16, %v2363_v7  ;;  %v2465_v2 = vld [vmem:[%s4711_s27 + $0x38] sm:$0xff] }
 0x77f   : > { %2477 = vmatpush.msrb.mxu3 %v2465_v2 }
 0x780   : > { %v2309_v63 = vrot.slane %v2308_v5, 4  ;;  %v2385_v30 = vmul.f32 %v2383_v21, %v2367_v4  ;;  %v2459_v21 = vld [vmem:[%s4711_s27 + $0x8] sm:$0xff] }
 0x782   : > { %v2310_v20 = vadd.f32 %v2309_v63, %v2308_v5 }
 0x784   : > { %v2311_v24 = vrot.slane %v2310_v20, 2  ;;  %v2368_v12 = vld [vmem:[#allocation4 + $0x50] sm:$0xff] }
 0x785   : > { %v2280_v31 = vld [vmem:[#allocation4 + $0x10] sm:$0xff]  ;;  %v2370_v63 = vmul.f32 %v2368_v12, %v2366_v17 }
 0x786   : > { %v2312_v32 = vadd.f32 %v2311_v24, %v2310_v20  ;;  %v2282_v58 = vmul.f32 %v2280_v31, %v2278_v57  ;;  %v2324_v57 = vld [vmem:[#allocation4 + $0x30] sm:$0xff]  ;;  %v2387_v31 = vld [vmem:[#allocation3 + $0x68] sm:$0xff] }
 0x787   : > { %v2326_v6 = vmul.f32 %v2324_v57, %v2322_v36  ;;  %v2372_v10 = vsel %vm1047_vm13, %v2370_v63, 0.0  ;;  %v2389_v36 = vadd.f32 %v2387_v31, %v2385_v30  ;;  %v2409_v57 = vld [vmem:[#allocation3 + $0x78] sm:$0xff] }
 0x788   : > { %v2313_v0 = vrot.slane %v2312_v32, 1  ;;  %v2284_v47 = vsel %vm1047_vm13, %v2282_v58, 0.0  ;;  %v2382_v58 = vld [vmem:[#allocation2 + $0x60] sm:$0xff] }
 0x789   : > { %v2286_v39 = vadd.f32 %v2285_v33, %v2284_v47  ;;  %v2328_v18 = vsel %vm1047_vm13, %v2326_v6, 0.0 }
 0x78a   : > { %v2314_v40 = vadd.f32 %v2313_v0, %v2312_v32  ;;  %v2197_v23 = vpop.permute.xlu1 %2196  ;;  %v2221_v45 = vpop.permute.xlu2 %2220  ;;  %v2384_v0 = vmul.f32 %v2382_v58, %v2366_v17 }
 0x78b   : > { %v2287_v43 = vrot.slane %v2286_v39, 4  ;;  %2243 = vst.msk [vmem:[#allocation4 + $0x48] sm:$0xff] %vm1047_vm13, %v2197_v23  ;;  %v2185_v49 = vpop.permute.xlu0 %2184 }
 0x78c   : > { %2315 = vst.msk [vmem:[#allocation5 + $0x2] sm:$0x1] %vm1475_vm4, %v2314_v40  ;;  %v2388_v44 = vadd.f32 %v2386_v62, %v2384_v0 }
 0x78d   : > { %v2288_v51 = vadd.f32 %v2287_v43, %v2286_v39  ;;  %2247 = vst.msk [vmem:[#allocation4 + $0x68] sm:$0xff] %vm1047_vm13, %v2221_v45 }
 0x78e   : > { %2241 = vst.msk [vmem:[#allocation4 + $0x38] sm:$0xff] %vm1047_vm13, %v2185_v49  ;;  %v2405_v49 = vld [vmem:[#allocation2 + $0x78] sm:$0xff] }
 0x78f   : > { %v2289_v3 = vrot.slane %v2288_v51, 2  ;;  %v2407_v42 = vmul.f32 %v2405_v49, %v2389_v36 }
 0x791   : > { %v2290_v59 = vadd.f32 %v2289_v3, %v2288_v51  ;;  %v2411_v37 = vadd.f32 %v2409_v57, %v2407_v42 }
 0x792   : > { %v2347_v1 = vld [vmem:[#allocation4 + $0x48] sm:$0xff]  ;;  %v2209_v38 = vpop.permute.xlu1 %2208  ;;  %v2233_v60 = vpop.permute.xlu2 %2232 }
 0x793   : > { %v2291_v8 = vrot.slane %v2290_v59, 1  ;;  %v2349_v25 = vmul.f32 %v2347_v1, %v2345_v54  ;;  %2245 = vst.msk [vmem:[#allocation4 + $0x58] sm:$0xff] %vm1047_vm13, %v2209_v38  ;;  %v2404_v54 = vld [vmem:[#allocation2 + $0x70] sm:$0xff] }
 0x794   : > { %2249 = vst.msk [vmem:[#allocation4 + $0x78] sm:$0xff] %vm1047_vm13, %v2233_v60  ;;  %v2391_v23 = vld [vmem:[#allocation4 + $0x68] sm:$0xff]  ;;  %v2406_v13 = vmul.f32 %v2404_v54, %v2388_v44 }
 0x795   : > { %v2292_v11 = vadd.f32 %v2291_v8, %v2290_v59  ;;  %v2351_v29 = vsel %vm1047_vm13, %v2349_v25, 0.0  ;;  %v2325_v61 = vld [vmem:[#allocation4 + $0x38] sm:$0xff]  ;;  %v2393_v51 = vmul.f32 %v2391_v23, %v2389_v36  ;;  %v2464_v8 = vld [vmem:[%s4711_s27 + $0x30] sm:$0xff] }
 0x796   : > { %v2352_v14 = vadd.f32 %v2351_v29, %v2350_v41  ;;  %v2327_v27 = vmul.f32 %v2325_v61, %v2323_v35  ;;  %v2408_v41 = vld [vmem:[#allocation3 + $0x70] sm:$0xff]  ;;  %2478 = vmatpush.msrb.mxu3 %v2464_v8 }
 0x797   : > { %2293 = vst.msk [vmem:[#allocation5 + $0x1] sm:$0x1] %vm1475_vm4, %v2292_v11  ;;  %v2395_v25 = vsel %vm1047_vm13, %v2393_v51, 0.0  ;;  %v2463_v11 = vld [vmem:[%s4711_s27 + $0x28] sm:$0xff]  ;;  %v2410_v61 = vadd.f32 %v2408_v41, %v2406_v13 }
 0x798   : > { %v2353_v53 = vrot.slane %v2352_v14, 4  ;;  %v2329_v5 = vsel %vm1047_vm13, %v2327_v27, 0.0  ;;  %v2462_v27 = vld [vmem:[%s4711_s27 + $0x20] sm:$0xff]  ;;  %2479 = vmatpush.msrb.mxu3 %v2463_v11 }
 0x799   : > { %v2330_v19 = vadd.f32 %v2329_v5, %v2328_v18  ;;  %v2461_v18 = vld [vmem:[%s4711_s27 + $0x18] sm:$0xff] }
 0x79a   : > { %v2354_v20 = vadd.f32 %v2353_v53, %v2352_v14  ;;  %v2369_v9 = vld [vmem:[#allocation4 + $0x58] sm:$0xff]  ;;  %2480 = vmatpush.msrb.mxu3 %v2462_v27 }
 0x79b   : > { %v2331_v22 = vrot.slane %v2330_v19, 4  ;;  %v2371_v24 = vmul.f32 %v2369_v9, %v2367_v4  ;;  %v2215_v32 = vpop.permute.xlu0 %2214  ;;  %v2413_v38 = vld [vmem:[#allocation4 + $0x78] sm:$0xff] }
 0x79c   : > { %v2355_v26 = vrot.slane %v2354_v20, 2  ;;  %2246 = vst.msk [vmem:[#allocation4 + $0x60] sm:$0xff] %vm1047_vm13, %v2215_v32  ;;  %v2415_v29 = vmul.f32 %v2413_v38, %v2411_v37  ;;  %2481 = vmatpush.msrb.mxu3 %v2461_v18 }
 0x79d   : > { %v2332_v34 = vadd.f32 %v2331_v22, %v2330_v19  ;;  %v2373_v33 = vsel %vm1047_vm13, %v2371_v24, 0.0  ;;  %v2460_v19 = vld [vmem:[%s4711_s27 + $0x10] sm:$0xff] }
 0x79e   : > { %v2356_v47 = vadd.f32 %v2355_v26, %v2354_v20  ;;  %v2374_v35 = vadd.f32 %v2373_v33, %v2372_v10  ;;  %v2417_v53 = vsel %vm1047_vm13, %v2415_v29, 0.0  ;;  %2482 = vmatpush.msrb.mxu3 %v2460_v19  ;;  %v2458_v26 = vld [vmem:[%s4711_s27] sm:$0xff] }
 0x79f   : > { %v2333_v39 = vrot.slane %v2332_v34, 2 }
 0x7a0   : > { %v2357_v40 = vrot.slane %v2356_v47, 1  ;;  %v2375_v43 = vrot.slane %v2374_v35, 4  ;;  %2483 = vmatpush.msrb.mxu3 %v2459_v21 }
 0x7a1   : > { %v2334_v45 = vadd.f32 %v2333_v39, %v2332_v34  ;;  %v3042_v34 = vld [vmem:[#allocation27] ss:$0 sm:$0xff] }
 0x7a2   : > { %v2358_v46 = vadd.f32 %v2357_v40, %v2356_v47  ;;  %v2376_v48 = vadd.f32 %v2375_v43, %v2374_v35  ;;  %v2227_v50 = vpop.permute.xlu1 %2226  ;;  %2484 = vmatpush.msrb.mxu3 %v2458_v26  ;;  %v2431_v33 = vmul.f32 %v3042_v34, %v4347_v56 }
 0x7a3   : > { %v2335_v52 = vrot.slane %v2334_v45, 1  ;;  %2248 = vst.msk [vmem:[#allocation4 + $0x70] sm:$0xff] %vm1047_vm13, %v2227_v50  ;;  %v2390_v15 = vld [vmem:[#allocation4 + $0x60] sm:$0xff] }
 0x7a4   : > { %2359 = vst.msk [vmem:[#allocation5 + $0x4] sm:$0x1] %vm1475_vm4, %v2358_v46  ;;  %v2377_v3 = vrot.slane %v2376_v48, 2  ;;  %v2392_v59 = vmul.f32 %v2390_v15, %v2388_v44 }
 0x7a5   : > { %v2336_v55 = vadd.f32 %v2335_v52, %v2334_v45 }
 0x7a6   : > { %v2378_v1 = vadd.f32 %v2377_v3, %v2376_v48  ;;  %v2394_v60 = vsel %vm1047_vm13, %v2392_v59, 0.0 }
 0x7a7   : > { %2337 = vst.msk [vmem:[#allocation5 + $0x3] sm:$0x1] %vm1475_vm4, %v2336_v55  ;;  %v2396_v7 = vadd.f32 %v2395_v25, %v2394_v60 }
 0x7a8   : > { %v2379_v6 = vrot.slane %v2378_v1, 1 }
 0x7a9   : > { %v2397_v12 = vrot.slane %v2396_v7, 4 }
 0x7aa   : > { %v2380_v28 = vadd.f32 %v2379_v6, %v2378_v1  ;;  %v2412_v14 = vld [vmem:[#allocation4 + $0x70] sm:$0xff]  ;;  %v2455_v35 = vpop.permute.xlu1 %2454 }
 0x7ab   : > { %v2414_v16 = vmul.f32 %v2412_v14, %v2410_v61  ;;  %v2398_v17 = vadd.f32 %v2397_v12, %v2396_v7 }
 0x7ac   : > { %2381 = vst.msk [vmem:[#allocation5 + $0x5] sm:$0x1] %vm1475_vm4, %v2380_v28 }
 0x7ad   : > { %v2416_v4 = vsel %vm1047_vm13, %v2414_v16, 0.0  ;;  %v2399_v5 = vrot.slane %v2398_v17, 2 }
 0x7ae   : > { %v2418_v63 = vadd.f32 %v2417_v53, %v2416_v4 }
 0x7af   : > { %v2400_v20 = vadd.f32 %v2399_v5, %v2398_v17 }
 0x7b0   : > { %v2419_v9 = vrot.slane %v2418_v63, 4 }
 0x7b1   : > { %v2401_v22 = vrot.slane %v2400_v20, 1 }
 0x7b2   : > { %v2420_v24 = vadd.f32 %v2419_v9, %v2418_v63 }
 0x7b3   : > { %v2402_v30 = vadd.f32 %v2401_v22, %v2400_v20 }
 0x7b4   : > { %v2421_v31 = vrot.slane %v2420_v24, 2 }
 0x7b5   : > { %2403 = vst.msk [vmem:[#allocation5 + $0x6] sm:$0x1] %vm1475_vm4, %v2402_v30 }
 0x7b6   : > { %v2422_v32 = vadd.f32 %v2421_v31, %v2420_v24 }
 0x7b8   : > { %v2423_v58 = vrot.slane %v2422_v32, 1 }
 0x7ba   : > { %v2424_v10 = vadd.f32 %v2423_v58, %v2422_v32 }
 0x7bc   : > { %2425 = vst.msk [vmem:[#allocation5 + $0x7] sm:$0x1] %vm1475_vm4, %v2424_v10 }
 0x7c3   : > { %v2426_v0 = vld [vmem:[#allocation5] sm:$0xff] }
 0x7c4   : > { %v2432_v47 = vadd.f32 %v2431_v33, %v2426_v0 }
 0x7c6   : > { %v2457_v36 = vmul.f32 %v2455_v35, %v2432_v47 }
 0x7c8   : > { %2797 = vmatmul.msk.f32.vlgmr.msrb.gmra.mxu3 %vm1047_vm13, %v2457_v36 }
 0x7c9   : > { %3585 = shalt.err (!%p3582_p9)
}
 0x7ca   : > { %2859 = dma.vmem_to_hbm [thread:$0]  (%p3944_p13), %s2524_s0, 128, %s2526_s2, %s2497_s4  }
 0x7cb   : > { %s4714_s26 = sld [smem:[#allocation62_spill]]  ;;  %s897_s11 = scalar_lea.vmem [#allocation29], %s3978_s20 }
 0x7cc   : > { %s2509_s12 = sshll.u32 %s897_s11, 4  ;;  %s2492_s13 = scalar_lea.sflag [#allocation8], %s3975_s22  ;;  %s2510_s12 = int_to_ptr.vmem [resolvable:$true] %s2509_s12 }
 0x7d1   : > { %s2507_s14 = scalar_lea.hbm %s4714_s26, %s2800_s25  ;;  %s3606_s2 = scalar_lea.hbm %s4714_s26, 16 }
 0x7d2   : > { %s2511_s15 = sshll.u32 %s2507_s14, 4  ;;  %s2512_s15 = int_to_ptr.hbm [resolvable:$true] %s2511_s15 }
 0x7d3   : > { %s3600_s8 = sshra.s32 %s2512_s15, 4  ;;  %s3601_s8 = int_to_ptr.hbm [resolvable:$true] %s3600_s8 }
 0x7d4   : > { %s3602_s9 = scalar_lea.hbm %s3601_s8, 8  ;;  %p3607_p2 = scmp.lt.s32.totalorder %s3601_s8, %s4714_s26 }
 0x7d5   : > { %p3603_p10 = scmp.ne.s32.totalorder %s3601_s8, %s3602_s9  ;;  %p3608_p6 = scmp.lt.s32.totalorder %s3606_s2, %s3602_s9 }
 0x7d7   : > { %p3604_p11 = pnand %p3603_p10, %p3944_p13  ;;  %p3609_p1 = por %p3608_p6, %p3607_p2 }
 0x7d9   : > { %p3605_p0 = pneg %p3604_p11 }
 0x7db   : > { %p3610_p3 = pnand %p3609_p1, %p3605_p0 }
 0x84b   : > { %v2486_v56 = vpop.f32.mrf.mxu3 }
 0x84c   : > { %2489 = vst.msk [vmem:[%s897_s11] sm:$0xff] %vm906_vm0, %v2486_v56 }
 0x84d   : > { %3613 = shalt.err (!%p3610_p3)
}
 0x84e   : > { %2858 = dma.vmem_to_hbm [thread:$0]  (%p3944_p13), %s2510_s12, 128, %s2512_s15, %s2492_s13  }
 0x84f PF: > { %s2537_s14 = sand.u32 1, %s3672_s3   ;;  %p4715_p4 = scmp.ge.s32.totalorder %s3684_s30, 2 }
 0x850   : > { %s2538_s22 = scalar_lea.sflag [#allocation8], %s2537_s14 }
 0x851   : > { %p2907_p12 = pnand %p4715_p4, %p3949_p5 }
 0x853   : > { %p2908_p8 = pneg %p2907_p12 }
 0x855   : > { %3663 = dma.done.wait (%p2908_p8), %s2538_s22, 128  }
 0x856   : > { %3665 = vsyncadd (%p2908_p8), %s2538_s22, 4294967168  ;;  %s2548_s5 = scalar_lea.sflag [#allocation31], %s2537_s14 }
 0x857   : > { %3667 = dma.done.wait (%p2908_p8), %s2548_s5, 128  }
 0x858   : > { %3669 = vsyncadd (%p2908_p8), %s2548_s5, 4294967168  ;;  %p46_p13 = scmp.ge.s32.totalorder %s3924_s6, 4   ;;  %s4716_s3 = smov %s3676_s28 }
 0x859   : > { %s4717_s28 = smov %s3680_s29  ;;  %s4718_s29 = smov %s3936_s1 }
 0x85a   : > { %s4719_s30 = smov %s3924_s6  ;;  %48 = sbr.rel (!%p46_p13) target bundleno = 36 (0x24), region = 239 }
 0x85f   :  { %2554 = vsyncpa [#allocation7], 1 }
 0x860   :  { %2556 = vsyncpa [#allocation7 + $0x1], 1 }
 0x861   :  { %2557 = vsyncpa [#allocation10], 1 }
 0x862   :  { %2558 = vsyncpa [#allocation13], 1 }
 0x863   :  { %2559 = vsyncpa [#allocation16], 1 }
 0x864   :  { %2560 = vsyncpa [#allocation19], 1 }
 0x865   :  { %2561 = vsyncpa [#allocation22], 1 }
 0x866   :  { %2562 = vsyncpa [#allocation25], 1 }
 0x867   :  { %2563 = vsyncpa [#allocation28], 1 }
 0x868   :  { %2564 = vsyncpa [#allocation8], 1 }
 0x869   :  { %2566 = vsyncpa [#allocation8 + $0x1], 1 }
 0x86a   :  { %2567 = vsyncpa [#allocation31], 1 }
 0x86b   :  { %2569 = vsyncpa [#allocation31 + $0x1], 1 }

</bundles_post_ra>
